<compile_context>
chip_gen: v7x
topology: tpu7x:2x2x1
jax: 0.10.0
libtpu: 0.0.40
codegen_flags: <defaults>
</compile_context>

<pallas_src>
import math

import jax
import jax.numpy as jnp
from jax.experimental import pallas as pl
from jax.experimental.pallas import tpu as pltpu

# ----- shapes (scaled-down but structurally identical to the module) ---------
B = 512          # batch (>=2 full tiles so both v7x TensorCores are busy)
TB = 256         # rows per grid step (fills the 256-row MXU pass on v6e/v7x)
CHEM_DIM = 256   # (orig 768)
BERT_DIM = 512   # (orig 1024)
HID = 128        # hidden_dim (orig 512)
HID2 = HID // 2  # 64
HID4 = HID // 4  # 32
BN_EPS = 1e-5

W1_ROWS = CHEM_DIM + BERT_DIM   # packed first-layer weights      (768, 128) bf16
W2_ROWS = 4 * HID               # packed combined/tail weights    (512, 128) bf16
BIAS_ROWS = 8                   # packed biases/head row/bo2      (8, 256)   f32
BIAS_COLS = 2 * HID


def _gelu(x):
    # tanh-approx GELU (transcendental on the EUP slot).  ~1e-3 abs difference
    # from PyTorch's default exact-erf GELU.
    c = math.sqrt(2.0 / math.pi)
    return 0.5 * x * (1.0 + jnp.tanh(c * (x + 0.044715 * x * x * x)))


def combined_model_kernel(chem_ref, bert_ref, w1_ref, wblk_ref, w2_ref,
                          bias_ref, out_ref):
    bf16 = jnp.bfloat16

    def dotf(x_bf16, w_bf16):
        return jnp.dot(x_bf16, w_bf16, preferred_element_type=jnp.float32)

    # ---- static views into the packed weight slabs (zero-cost slices) -------
    wc1 = w1_ref[0:CHEM_DIM, :]                          # (256, 128)
    wb1 = w1_ref[CHEM_DIM:CHEM_DIM + BERT_DIM, :]        # (512, 128)
    wblk = wblk_ref[...]                                 # (256, 256) block-diag fc2
    wm1 = w2_ref[0:2 * HID, :]                           # (256, 128) stacked wm1
    wm2 = w2_ref[2 * HID:3 * HID, :]                     # (128, 128) cols 64: zero
    wo1 = w2_ref[3 * HID:4 * HID, :]                     # (128, 128) rows64/cols32 zero

    bc1 = bias_ref[0:1, 0:HID]
    bb1 = bias_ref[0:1, HID:2 * HID]
    bcb2 = bias_ref[1:2, :]                              # [bc2 | bb2]  (1, 256)
    bm1 = bias_ref[2:3, 0:HID]
    bm2 = bias_ref[3:4, 0:HID]                           # lanes 64: zero
    bo1 = bias_ref[4:5, 0:HID]                           # lanes 32: zero
    wo2_row = bias_ref[5:6, 0:HID]                       # (1,128), lanes 32: zero
    bo2 = bias_ref[6:7, 0:1]                             # (1,1) scalar bias

    # ---- fc_chem / fc_bert layer 1 (inputs already bf16) ---------------------
    c1 = _gelu(dotf(chem_ref[...], wc1) + bc1)           # (TB, 128) f32
    b1 = _gelu(dotf(bert_ref[...], wb1) + bb1)           # (TB, 128) f32

    # ---- fused layer 2: block-diagonal (256,256) weight, one full MXU pass ---
    cb1 = jnp.concatenate([c1.astype(bf16), b1.astype(bf16)], axis=-1)  # (TB,256)
    cb2 = _gelu(dotf(cb1, wblk) + bcb2)                  # (TB, 256) = [c2 | b2]

    # ---- fc_combined layer 1: single K=256 dot with the stacked wm1 ----------
    m = _gelu(dotf(cb2.astype(bf16), wm1) + bm1)         # (TB, 128)

    # ---- fc_combined layer 2 (lanes 64: stay exactly zero) -------------------
    m = _gelu(dotf(m.astype(bf16), wm2) + bm2)           # (TB, 128)

    # ---- output head, layer 1 (lanes 32: stay exactly zero) ------------------
    o = _gelu(dotf(m.astype(bf16), wo1) + bo1)           # (TB, 128)

    # ---- output head, layer 2: lane-dense (1, TB) row via A @ B^T on the MXU -
    wo2_mat = jnp.broadcast_to(wo2_row.astype(bf16), (8, HID))          # (8, 128)
    out8 = jax.lax.dot_general(
        wo2_mat, o.astype(bf16),
        dimension_numbers=(((1,), (1,)), ((), ())),      # contract lane dims
        preferred_element_type=jnp.float32)              # (8, TB)
    out_row = out8[0:1, :] + bo2                         # (1, TB), lane-dense
    out_ref[...] = out_row.astype(out_ref.dtype)


# ------------------------------ parameter setup ------------------------------
def _fold_bn(w, b, gamma, beta, mean, var, eps=BN_EPS):
    """Fold eval-mode BatchNorm1d into the preceding Linear (exact)."""
    scale = gamma / jnp.sqrt(var + eps)          # (out,)
    w_f = w * scale[None, :]                     # (in, out)
    b_f = (b - mean) * scale + beta
    return w_f, b_f


def init_params(key):
    """Deterministic parameter init (shapes follow CombinedModel.__init__)."""
    ks = iter(jax.random.split(key, 64))

    def linear(fan_in, fan_out):
        bound = 1.0 / math.sqrt(fan_in)
        w = jax.random.uniform(next(ks), (fan_in, fan_out), jnp.float32, -bound, bound)
        b = jax.random.uniform(next(ks), (fan_out,), jnp.float32, -bound, bound)
        return w, b

    def bn(dim):
        gamma = 1.0 + 0.1 * jax.random.normal(next(ks), (dim,), jnp.float32)
        beta = 0.1 * jax.random.normal(next(ks), (dim,), jnp.float32)
        mean = 0.1 * jax.random.normal(next(ks), (dim,), jnp.float32)
        var = jnp.abs(1.0 + 0.1 * jax.random.normal(next(ks), (dim,), jnp.float32))
        return gamma, beta, mean, var

    p = {}
    # fc_chem: Linear(CHEM,HID)+BN, Linear(HID,HID)+BN
    p["wc1"], p["bc1"] = _fold_bn(*linear(CHEM_DIM, HID), *bn(HID))
    p["wc2"], p["bc2"] = _fold_bn(*linear(HID, HID), *bn(HID))
    # fc_bert: Linear(BERT,HID)+BN, Linear(HID,HID)+BN
    p["wb1"], p["bb1"] = _fold_bn(*linear(BERT_DIM, HID), *bn(HID))
    p["wb2"], p["bb2"] = _fold_bn(*linear(HID, HID), *bn(HID))
    # fc_combined: Linear(2*HID,HID)+BN, Linear(HID,HID//2)
    p["wm1"], p["bm1"] = _fold_bn(*linear(2 * HID, HID), *bn(HID))
    p["wm2"], p["bm2"] = linear(HID, HID2)
    # output: Linear(HID//2,HID//4), Linear(HID//4,1)
    p["wo1"], p["bo1"] = linear(HID2, HID4)
    p["wo2"], p["bo2"] = linear(HID4, 1)
    return p


def pack_params(p):
    """Pack the 16 tensors into 3 bf16 weight slabs + 1 f32 bias tile."""
    bf16 = jnp.bfloat16

    # Slab 1: first-layer weights (K = chem_dim / bert_dim).
    w1 = jnp.concatenate([p["wc1"], p["wb1"]], axis=0).astype(bf16)      # (768,128)

    # Slab 2: block-diagonal fused second-layer weight (full-width MXU pass).
    z = jnp.zeros((HID, HID), jnp.float32)
    wblk = jnp.block([[p["wc2"], z], [z, p["wb2"]]]).astype(bf16)        # (256,256)

    # Slab 3: stacked wm1 + zero-padded wm2 / wo1.
    wm2_p = jnp.pad(p["wm2"], ((0, 0), (0, HID - HID2)))                 # (128,128)
    wo1_p = jnp.pad(p["wo1"], ((0, HID - HID2), (0, HID - HID4)))        # (128,128)
    w2 = jnp.concatenate([p["wm1"], wm2_p, wo1_p], axis=0).astype(bf16)  # (512,128)

    # Bias tile (8, 256): one row per bias (+ final head row + bo2).
    def half(v):
        v = v.reshape(-1)
        return jnp.pad(v, (0, HID - v.shape[0]))

    zr = jnp.zeros((HID,), jnp.float32)
    rows = [
        jnp.concatenate([half(p["bc1"]), half(p["bb1"])]),
        jnp.concatenate([half(p["bc2"]), half(p["bb2"])]),
        jnp.concatenate([half(p["bm1"]), zr]),
        jnp.concatenate([half(p["bm2"]), zr]),
        jnp.concatenate([half(p["bo1"]), zr]),
        jnp.concatenate([half(p["wo2"]), zr]),               # wo2 as a row
        jnp.full((BIAS_COLS,), p["bo2"][0], jnp.float32),    # bo2 broadcast row
        jnp.zeros((BIAS_COLS,), jnp.float32),
    ]
    bias = jnp.stack(rows, axis=0).astype(jnp.float32)       # (8, 256)
    return w1, wblk, w2, bias


# --------------------------------- wrapper ------------------------------------
@jax.jit
def combined_model_forward(chem_emb, bert_emb, w1, wblk, w2, bias):
    n_tiles = B // TB
    grid_spec = pltpu.PrefetchScalarGridSpec(
        num_scalar_prefetch=0,
        grid=(n_tiles,),
        in_specs=[
            pl.BlockSpec((TB, CHEM_DIM), lambda i: (i, 0)),
            pl.BlockSpec((TB, BERT_DIM), lambda i: (i, 0)),
            # Constant block index -> weights DMA'd once, VMEM-resident across steps.
            pl.BlockSpec((W1_ROWS, HID), lambda i: (0, 0)),
            pl.BlockSpec((2 * HID, 2 * HID), lambda i: (0, 0)),
            pl.BlockSpec((W2_ROWS, HID), lambda i: (0, 0)),
            pl.BlockSpec((BIAS_ROWS, BIAS_COLS), lambda i: (0, 0)),
        ],
        # Lane-dense output: (1, B) row, batch along lanes.
        out_specs=pl.BlockSpec((1, TB), lambda i: (0, i)),
    )
    out_row = pl.pallas_call(
        combined_model_kernel,
        out_shape=jax.ShapeDtypeStruct((1, B), jnp.float32),
        grid_spec=grid_spec,
        compiler_params=pltpu.CompilerParams(
            dimension_semantics=("parallel",),   # batch axis shards across TCs on v7x
        ),
    )(chem_emb, bert_emb, w1, wblk, w2, bias)
    return out_row.reshape(B, 1)


# ------------------------------- JAX references --------------------------------
def reference_forward(chem_emb, bert_emb, p):
    """Pure-JAX reference of the same forward (same bf16 MXU path, tanh GELU)."""
    bf16 = jnp.bfloat16

    def lin(x, w, b):
        return jnp.dot(x.astype(bf16), w.astype(bf16),
                       preferred_element_type=jnp.float32) + b

    g = _gelu
    c = g(lin(chem_emb, p["wc1"], p["bc1"]))
    c = g(lin(c, p["wc2"], p["bc2"]))
    b = g(lin(bert_emb, p["wb1"], p["bb1"]))
    b = g(lin(b, p["wb2"], p["bb2"]))
    cb = jnp.concatenate([c, b], axis=-1)
    m = g(lin(cb, p["wm1"], p["bm1"]))
    m = g(lin(m, p["wm2"], p["bm2"]))
    o = g(lin(m, p["wo1"], p["bo1"]))
    return jnp.dot(o.astype(bf16), p["wo2"].astype(bf16),
                   preferred_element_type=jnp.float32) + p["bo2"]


def reference_forward_f32(chem_emb, bert_emb, p):
    """f32 / exact-erf GELU reference (PyTorch eval-mode semantics)."""
    def g(x):
        return 0.5 * x * (1.0 + jax.lax.erf(x * (1.0 / math.sqrt(2.0))))

    def lin(x, w, b):
        return jnp.dot(x, w, preferred_element_type=jnp.float32) + b

    c = chem_emb.astype(jnp.float32)
    b = bert_emb.astype(jnp.float32)
    c = g(lin(c, p["wc1"], p["bc1"]))
    c = g(lin(c, p["wc2"], p["bc2"]))
    b = g(lin(b, p["wb1"], p["bb1"]))
    b = g(lin(b, p["wb2"], p["bb2"]))
    m = g(lin(jnp.concatenate([c, b], axis=-1), p["wm1"], p["bm1"]))
    m = g(lin(m, p["wm2"], p["bm2"]))
    o = g(lin(m, p["wo1"], p["bo1"]))
    return jnp.dot(o, p["wo2"]) + p["bo2"]


if __name__ == "__main__":
    key = jax.random.PRNGKey(0)
    k_chem, k_bert, k_params = jax.random.split(key, 3)

    # Producer emits bf16 (no wrapper-side astype pass over HBM).
    chem_emb = jax.random.normal(k_chem, (B, CHEM_DIM), jnp.bfloat16)
    bert_emb = jax.random.normal(k_bert, (B, BERT_DIM), jnp.bfloat16)
    params = init_params(k_params)
    w1, wblk, w2, bias = pack_params(params)

    out = combined_model_forward(chem_emb, bert_emb, w1, wblk, w2, bias)
    out = jax.block_until_ready(out)
    assert out.shape == (B, 1)

    # Tight check against a reference with the same bf16/tanh-GELU math.
    ref = reference_forward(chem_emb, bert_emb, params)
    assert jnp.allclose(out, ref, atol=1e-2, rtol=1e-2), (out[:4], ref[:4])

    # Loose parity check against a full-f32, exact-erf (PyTorch-default) forward.
    ref32 = reference_forward_f32(chem_emb, bert_emb, params)
    assert jnp.allclose(out, ref32, atol=1e-1, rtol=1e-1), (out[:4], ref32[:4])

    print("KERNEL_OK")
</pallas_src>

<mosaic_0001>
module attributes {stable_mosaic.version = 11 : i64} {
  func.func @combined_model_kernel(%arg0: i32, %arg1: memref<256x256xbf16, #tpu.memory_space<vmem>>, %arg2: memref<256x512xbf16, #tpu.memory_space<vmem>>, %arg3: memref<768x128xbf16, #tpu.memory_space<vmem>>, %arg4: memref<256x256xbf16, #tpu.memory_space<vmem>>, %arg5: memref<512x128xbf16, #tpu.memory_space<vmem>>, %arg6: memref<8x256xf32, #tpu.memory_space<vmem>>, %arg7: memref<1x256xf32, #tpu.memory_space<vmem>>) attributes {dimension_semantics = [#tpu.dimension_semantics<parallel>], iteration_bounds = array<i64: 2>, scalar_prefetch = 0 : i64, scratch_operands = 0 : i64, tpu.core_type = #tpu.core_type<tc>, window_params = [{transform_indices = @transform_0, window_bounds = array<i64: 256, 256>}, {transform_indices = @transform_1, window_bounds = array<i64: 256, 512>}, {pipeline_mode = #tpu.pipeline_mode<synchronous>, transform_indices = @transform_2, window_bounds = array<i64: 768, 128>}, {pipeline_mode = #tpu.pipeline_mode<synchronous>, transform_indices = @transform_3, window_bounds = array<i64: 256, 256>}, {pipeline_mode = #tpu.pipeline_mode<synchronous>, transform_indices = @transform_4, window_bounds = array<i64: 512, 128>}, {pipeline_mode = #tpu.pipeline_mode<synchronous>, transform_indices = @transform_5, window_bounds = array<i64: 8, 256>}, {transform_indices = @transform_6, window_bounds = array<i64: 1, 256>}]} {
    %c0 = arith.constant 0 : index
    %c0_0 = arith.constant 0 : index
    %0 = vector.load %arg3[%c0, %c0_0] : memref<768x128xbf16, #tpu.memory_space<vmem>>, vector<256x128xbf16>
    %c256 = arith.constant 256 : index
    %c0_1 = arith.constant 0 : index
    %1 = vector.load %arg3[%c256, %c0_1] : memref<768x128xbf16, #tpu.memory_space<vmem>>, vector<512x128xbf16>
    %c0_2 = arith.constant 0 : index
    %c0_3 = arith.constant 0 : index
    %2 = vector.load %arg4[%c0_2, %c0_3] : memref<256x256xbf16, #tpu.memory_space<vmem>>, vector<256x256xbf16>
    %c0_4 = arith.constant 0 : index
    %c0_5 = arith.constant 0 : index
    %3 = vector.load %arg5[%c0_4, %c0_5] : memref<512x128xbf16, #tpu.memory_space<vmem>>, vector<256x128xbf16>
    %c256_6 = arith.constant 256 : index
    %c0_7 = arith.constant 0 : index
    %4 = vector.load %arg5[%c256_6, %c0_7] : memref<512x128xbf16, #tpu.memory_space<vmem>>, vector<128x128xbf16>
    %c384 = arith.constant 384 : index
    %c0_8 = arith.constant 0 : index
    %5 = vector.load %arg5[%c384, %c0_8] : memref<512x128xbf16, #tpu.memory_space<vmem>>, vector<128x128xbf16>
    %c0_9 = arith.constant 0 : index
    %c0_10 = arith.constant 0 : index
    %6 = vector.load %arg6[%c0_9, %c0_10] : memref<8x256xf32, #tpu.memory_space<vmem>>, vector<1x128xf32>
    %c0_11 = arith.constant 0 : index
    %c128 = arith.constant 128 : index
    %7 = vector.load %arg6[%c0_11, %c128] : memref<8x256xf32, #tpu.memory_space<vmem>>, vector<1x128xf32>
    %c1 = arith.constant 1 : index
    %c0_12 = arith.constant 0 : index
    %8 = vector.load %arg6[%c1, %c0_12] : memref<8x256xf32, #tpu.memory_space<vmem>>, vector<1x256xf32>
    %c2 = arith.constant 2 : index
    %c0_13 = arith.constant 0 : index
    %9 = vector.load %arg6[%c2, %c0_13] : memref<8x256xf32, #tpu.memory_space<vmem>>, vector<1x128xf32>
    %c3 = arith.constant 3 : index
    %c0_14 = arith.constant 0 : index
    %10 = vector.load %arg6[%c3, %c0_14] : memref<8x256xf32, #tpu.memory_space<vmem>>, vector<1x128xf32>
    %c4 = arith.constant 4 : index
    %c0_15 = arith.constant 0 : index
    %11 = vector.load %arg6[%c4, %c0_15] : memref<8x256xf32, #tpu.memory_space<vmem>>, vector<1x128xf32>
    %c5 = arith.constant 5 : index
    %c0_16 = arith.constant 0 : index
    %12 = vector.load %arg6[%c5, %c0_16] : memref<8x256xf32, #tpu.memory_space<vmem>>, vector<1x128xf32>
    %c6 = arith.constant 6 : index
    %c0_17 = arith.constant 0 : index
    %13 = vector.load %arg6[%c6, %c0_17] : memref<8x256xf32, #tpu.memory_space<vmem>>, vector<1x1xf32>
    %c0_18 = arith.constant 0 : index
    %c0_19 = arith.constant 0 : index
    %14 = vector.load %arg1[%c0_18, %c0_19] : memref<256x256xbf16, #tpu.memory_space<vmem>>, vector<256x256xbf16>
    %cst = arith.constant dense<0.000000e+00> : vector<256x128xf32>
    %15 = tpu.matmul %14, %0, %cst {dimension_numbers = #tpu.dot_dimension_numbers<[1], [0], [0], [1], [0, 0, 1, 1], [], []>} : vector<256x256xbf16>, vector<256x128xbf16>, vector<256x128xf32> -> vector<256x128xf32>
    %16 = vector.broadcast %6 : vector<1x128xf32> to vector<256x128xf32>
    %17 = arith.addf %15, %16 : vector<256x128xf32>
    %cst_20 = arith.constant 5.000000e-01 : f32
    %18 = vector.broadcast %cst_20 : f32 to vector<256x128xf32>
    %19 = arith.mulf %18, %17 : vector<256x128xf32>
    %cst_21 = arith.constant 4.471500e-02 : f32
    %20 = vector.broadcast %cst_21 : f32 to vector<256x128xf32>
    %21 = arith.mulf %20, %17 : vector<256x128xf32>
    %22 = arith.mulf %21, %17 : vector<256x128xf32>
    %23 = arith.mulf %22, %17 : vector<256x128xf32>
    %24 = arith.addf %17, %23 : vector<256x128xf32>
    %cst_22 = arith.constant 0.797884583 : f32
    %25 = vector.broadcast %cst_22 : f32 to vector<256x128xf32>
    %26 = arith.mulf %25, %24 : vector<256x128xf32>
    %27 = math.tanh %26 : vector<256x128xf32>
    %cst_23 = arith.constant 1.000000e+00 : f32
    %28 = vector.broadcast %cst_23 : f32 to vector<256x128xf32>
    %29 = arith.addf %28, %27 : vector<256x128xf32>
    %30 = arith.mulf %19, %29 : vector<256x128xf32>
    %c0_24 = arith.constant 0 : index
    %c0_25 = arith.constant 0 : index
    %31 = vector.load %arg2[%c0_24, %c0_25] : memref<256x512xbf16, #tpu.memory_space<vmem>>, vector<256x512xbf16>
    %cst_26 = arith.constant dense<0.000000e+00> : vector<256x128xf32>
    %32 = tpu.matmul %31, %1, %cst_26 {dimension_numbers = #tpu.dot_dimension_numbers<[1], [0], [0], [1], [0, 0, 1, 1], [], []>} : vector<256x512xbf16>, vector<512x128xbf16>, vector<256x128xf32> -> vector<256x128xf32>
    %33 = vector.broadcast %7 : vector<1x128xf32> to vector<256x128xf32>
    %34 = arith.addf %32, %33 : vector<256x128xf32>
    %cst_27 = arith.constant 5.000000e-01 : f32
    %35 = vector.broadcast %cst_27 : f32 to vector<256x128xf32>
    %36 = arith.mulf %35, %34 : vector<256x128xf32>
    %cst_28 = arith.constant 4.471500e-02 : f32
    %37 = vector.broadcast %cst_28 : f32 to vector<256x128xf32>
    %38 = arith.mulf %37, %34 : vector<256x128xf32>
    %39 = arith.mulf %38, %34 : vector<256x128xf32>
    %40 = arith.mulf %39, %34 : vector<256x128xf32>
    %41 = arith.addf %34, %40 : vector<256x128xf32>
    %cst_29 = arith.constant 0.797884583 : f32
    %42 = vector.broadcast %cst_29 : f32 to vector<256x128xf32>
    %43 = arith.mulf %42, %41 : vector<256x128xf32>
    %44 = math.tanh %43 : vector<256x128xf32>
    %cst_30 = arith.constant 1.000000e+00 : f32
    %45 = vector.broadcast %cst_30 : f32 to vector<256x128xf32>
    %46 = arith.addf %45, %44 : vector<256x128xf32>
    %47 = arith.mulf %36, %46 : vector<256x128xf32>
    %48 = arith.truncf %30 : vector<256x128xf32> to vector<256x128xbf16>
    %49 = arith.truncf %47 : vector<256x128xf32> to vector<256x128xbf16>
    %50 = tpu.concatenate %48, %49 in 1 : vector<256x128xbf16>, vector<256x128xbf16> -> vector<256x256xbf16>
    %cst_31 = arith.constant dense<0.000000e+00> : vector<256x256xf32>
    %51 = tpu.matmul %50, %2, %cst_31 {dimension_numbers = #tpu.dot_dimension_numbers<[1], [0], [0], [1], [0, 0, 1, 1], [], []>} : vector<256x256xbf16>, vector<256x256xbf16>, vector<256x256xf32> -> vector<256x256xf32>
    %52 = vector.broadcast %8 : vector<1x256xf32> to vector<256x256xf32>
    %53 = arith.addf %51, %52 : vector<256x256xf32>
    %cst_32 = arith.constant 5.000000e-01 : f32
    %54 = vector.broadcast %cst_32 : f32 to vector<256x256xf32>
    %55 = arith.mulf %54, %53 : vector<256x256xf32>
    %cst_33 = arith.constant 4.471500e-02 : f32
    %56 = vector.broadcast %cst_33 : f32 to vector<256x256xf32>
    %57 = arith.mulf %56, %53 : vector<256x256xf32>
    %58 = arith.mulf %57, %53 : vector<256x256xf32>
    %59 = arith.mulf %58, %53 : vector<256x256xf32>
    %60 = arith.addf %53, %59 : vector<256x256xf32>
    %cst_34 = arith.constant 0.797884583 : f32
    %61 = vector.broadcast %cst_34 : f32 to vector<256x256xf32>
    %62 = arith.mulf %61, %60 : vector<256x256xf32>
    %63 = math.tanh %62 : vector<256x256xf32>
    %cst_35 = arith.constant 1.000000e+00 : f32
    %64 = vector.broadcast %cst_35 : f32 to vector<256x256xf32>
    %65 = arith.addf %64, %63 : vector<256x256xf32>
    %66 = arith.mulf %55, %65 : vector<256x256xf32>
    %67 = arith.truncf %66 : vector<256x256xf32> to vector<256x256xbf16>
    %cst_36 = arith.constant dense<0.000000e+00> : vector<256x128xf32>
    %68 = tpu.matmul %67, %3, %cst_36 {dimension_numbers = #tpu.dot_dimension_numbers<[1], [0], [0], [1], [0, 0, 1, 1], [], []>} : vector<256x256xbf16>, vector<256x128xbf16>, vector<256x128xf32> -> vector<256x128xf32>
    %69 = vector.broadcast %9 : vector<1x128xf32> to vector<256x128xf32>
    %70 = arith.addf %68, %69 : vector<256x128xf32>
    %cst_37 = arith.constant 5.000000e-01 : f32
    %71 = vector.broadcast %cst_37 : f32 to vector<256x128xf32>
    %72 = arith.mulf %71, %70 : vector<256x128xf32>
    %cst_38 = arith.constant 4.471500e-02 : f32
    %73 = vector.broadcast %cst_38 : f32 to vector<256x128xf32>
    %74 = arith.mulf %73, %70 : vector<256x128xf32>
    %75 = arith.mulf %74, %70 : vector<256x128xf32>
    %76 = arith.mulf %75, %70 : vector<256x128xf32>
    %77 = arith.addf %70, %76 : vector<256x128xf32>
    %cst_39 = arith.constant 0.797884583 : f32
    %78 = vector.broadcast %cst_39 : f32 to vector<256x128xf32>
    %79 = arith.mulf %78, %77 : vector<256x128xf32>
    %80 = math.tanh %79 : vector<256x128xf32>
    %cst_40 = arith.constant 1.000000e+00 : f32
    %81 = vector.broadcast %cst_40 : f32 to vector<256x128xf32>
    %82 = arith.addf %81, %80 : vector<256x128xf32>
    %83 = arith.mulf %72, %82 : vector<256x128xf32>
    %84 = arith.truncf %83 : vector<256x128xf32> to vector<256x128xbf16>
    %cst_41 = arith.constant dense<0.000000e+00> : vector<256x128xf32>
    %85 = tpu.matmul %84, %4, %cst_41 {dimension_numbers = #tpu.dot_dimension_numbers<[1], [0], [0], [1], [0, 0, 1, 1], [], []>} : vector<256x128xbf16>, vector<128x128xbf16>, vector<256x128xf32> -> vector<256x128xf32>
    %86 = vector.broadcast %10 : vector<1x128xf32> to vector<256x128xf32>
    %87 = arith.addf %85, %86 : vector<256x128xf32>
    %cst_42 = arith.constant 5.000000e-01 : f32
    %88 = vector.broadcast %cst_42 : f32 to vector<256x128xf32>
    %89 = arith.mulf %88, %87 : vector<256x128xf32>
    %cst_43 = arith.constant 4.471500e-02 : f32
    %90 = vector.broadcast %cst_43 : f32 to vector<256x128xf32>
    %91 = arith.mulf %90, %87 : vector<256x128xf32>
    %92 = arith.mulf %91, %87 : vector<256x128xf32>
    %93 = arith.mulf %92, %87 : vector<256x128xf32>
    %94 = arith.addf %87, %93 : vector<256x128xf32>
    %cst_44 = arith.constant 0.797884583 : f32
    %95 = vector.broadcast %cst_44 : f32 to vector<256x128xf32>
    %96 = arith.mulf %95, %94 : vector<256x128xf32>
    %97 = math.tanh %96 : vector<256x128xf32>
    %cst_45 = arith.constant 1.000000e+00 : f32
    %98 = vector.broadcast %cst_45 : f32 to vector<256x128xf32>
    %99 = arith.addf %98, %97 : vector<256x128xf32>
    %100 = arith.mulf %89, %99 : vector<256x128xf32>
    %101 = arith.truncf %100 : vector<256x128xf32> to vector<256x128xbf16>
    %cst_46 = arith.constant dense<0.000000e+00> : vector<256x128xf32>
    %102 = tpu.matmul %101, %5, %cst_46 {dimension_numbers = #tpu.dot_dimension_numbers<[1], [0], [0], [1], [0, 0, 1, 1], [], []>} : vector<256x128xbf16>, vector<128x128xbf16>, vector<256x128xf32> -> vector<256x128xf32>
    %103 = vector.broadcast %11 : vector<1x128xf32> to vector<256x128xf32>
    %104 = arith.addf %102, %103 : vector<256x128xf32>
    %cst_47 = arith.constant 5.000000e-01 : f32
    %105 = vector.broadcast %cst_47 : f32 to vector<256x128xf32>
    %106 = arith.mulf %105, %104 : vector<256x128xf32>
    %cst_48 = arith.constant 4.471500e-02 : f32
    %107 = vector.broadcast %cst_48 : f32 to vector<256x128xf32>
    %108 = arith.mulf %107, %104 : vector<256x128xf32>
    %109 = arith.mulf %108, %104 : vector<256x128xf32>
    %110 = arith.mulf %109, %104 : vector<256x128xf32>
    %111 = arith.addf %104, %110 : vector<256x128xf32>
    %cst_49 = arith.constant 0.797884583 : f32
    %112 = vector.broadcast %cst_49 : f32 to vector<256x128xf32>
    %113 = arith.mulf %112, %111 : vector<256x128xf32>
    %114 = math.tanh %113 : vector<256x128xf32>
    %cst_50 = arith.constant 1.000000e+00 : f32
    %115 = vector.broadcast %cst_50 : f32 to vector<256x128xf32>
    %116 = arith.addf %115, %114 : vector<256x128xf32>
    %117 = arith.mulf %106, %116 : vector<256x128xf32>
    %118 = arith.truncf %12 : vector<1x128xf32> to vector<1x128xbf16>
    %119 = vector.shape_cast %118 : vector<1x128xbf16> to vector<1x128xbf16>
    %120 = vector.broadcast %119 : vector<1x128xbf16> to vector<8x128xbf16>
    %121 = arith.truncf %117 : vector<256x128xf32> to vector<256x128xbf16>
    %cst_51 = arith.constant dense<0.000000e+00> : vector<8x256xf32>
    %122 = tpu.matmul %120, %121, %cst_51 {dimension_numbers = #tpu.dot_dimension_numbers<[1], [1], [0], [0], [0, 0, 1, 0], [], []>} : vector<8x128xbf16>, vector<256x128xbf16>, vector<8x256xf32> -> vector<8x256xf32>
    %123 = vector.extract_strided_slice %122 {offsets = [0, 0], sizes = [1, 256], strides = [1, 1]} : vector<8x256xf32> to vector<1x256xf32>
    %124 = vector.broadcast %13 : vector<1x1xf32> to vector<1x256xf32>
    %125 = arith.addf %123, %124 : vector<1x256xf32>
    %c0_52 = arith.constant 0 : index
    %c0_53 = arith.constant 0 : index
    %126 = vector.load %arg7[%c0_52, %c0_53] : memref<1x256xf32, #tpu.memory_space<vmem>>, vector<1x256xf32>
    tpu.vector_store %arg7[%c0_52, %c0_53], %125 {strides = array<i32>} : memref<1x256xf32, #tpu.memory_space<vmem>>, vector<1x256xf32>,
    return
  }
  func.func @transform_0(%arg0: i32) -> (i32, i32) {
    %c0_i32 = arith.constant 0 : i32
    %c0_i32_0 = arith.constant 0 : i32
    return %arg0, %c0_i32 : i32, i32
  }
  func.func @transform_1(%arg0: i32) -> (i32, i32) {
    %c0_i32 = arith.constant 0 : i32
    %c0_i32_0 = arith.constant 0 : i32
    return %arg0, %c0_i32 : i32, i32
  }
  func.func @transform_2(%arg0: i32) -> (i32, i32) {
    %c0_i32 = arith.constant 0 : i32
    %c0_i32_0 = arith.constant 0 : i32
    %c0_i32_1 = arith.constant 0 : i32
    return %c0_i32, %c0_i32_0 : i32, i32
  }
  func.func @transform_3(%arg0: i32) -> (i32, i32) {
    %c0_i32 = arith.constant 0 : i32
    %c0_i32_0 = arith.constant 0 : i32
    %c0_i32_1 = arith.constant 0 : i32
    return %c0_i32, %c0_i32_0 : i32, i32
  }
  func.func @transform_4(%arg0: i32) -> (i32, i32) {
    %c0_i32 = arith.constant 0 : i32
    %c0_i32_0 = arith.constant 0 : i32
    %c0_i32_1 = arith.constant 0 : i32
    return %c0_i32, %c0_i32_0 : i32, i32
  }
  func.func @transform_5(%arg0: i32) -> (i32, i32) {
    %c0_i32 = arith.constant 0 : i32
    %c0_i32_0 = arith.constant 0 : i32
    %c0_i32_1 = arith.constant 0 : i32
    return %c0_i32, %c0_i32_0 : i32, i32
  }
  func.func @transform_6(%arg0: i32) -> (i32, i32) {
    %c0_i32 = arith.constant 0 : i32
    %c0_i32_0 = arith.constant 0 : i32
    return %c0_i32, %arg0 : i32, i32
  }
}

</mosaic_0001>

<bundles_post_ra>
// kernel: combined_model_forward.1
= control target key start
LH: loop header
LB: loop body
LE: loop exit
PB: predicated region body
PF: predicated region fallthrough
CT: control target
= control target key end

     0   :  { %s9578_s0 = inlined_call_operand.hbm [shape: bf16[512,256], index: 0, kind: input, shape index: {}]   ;;  %s9579_s1 = inlined_call_operand.hbm [shape: bf16[512,512], index: 1, kind: input, shape index: {}]   ;;  %s9580_s2 = inlined_call_operand.hbm [shape: bf16[768,128], index: 2, kind: input, shape index: {}]   ;;  %s9581_s3 = inlined_call_operand.hbm [shape: bf16[256,256], index: 3, kind: input, shape index: {}]   ;;  %s9582_s4 = inlined_call_operand.hbm [shape: bf16[512,128], index: 4, kind: input, shape index: {}]   ;;  %s9583_s5 = inlined_call_operand.vmem [shape: f32[8,256], index: 5, kind: input, shape index: {}]   ;;  %s9584_s6 = inlined_call_operand.hbm [shape: f32[1,512], index: 6, kind: output, shape index: {}]  }
   0x1   :  { %9609 = sst [smem:[#allocation39_spill]] %s9578_s0 }
   0x2   :  { %9610 = sst [smem:[#allocation40_spill]] %s9580_s2 }
   0x3   :  { %9611 = sst [smem:[#allocation41_spill]] %s9581_s3 }
   0x4   :  { %9612 = sst [smem:[#allocation42_spill]] %s9582_s4 }
   0x5   :  { %11 = vsyncpa [#allocation3], 0 }
   0x6   :  { %13 = vsyncpa [#allocation3 + $0x1], 0 }
   0x7   :  { %14 = vsyncpa [#allocation6], 0 }
   0x8   :  { %16 = vsyncpa [#allocation6 + $0x1], 0 }
   0x9   :  { %17 = vsyncpa [#allocation9], 0 }
   0xa   :  { %18 = vsyncpa [#allocation4], 0 }
   0xb   :  { %20 = vsyncpa [#allocation4 + $0x1], 0  ;;  %s7218_s21 = smov 0   ;;  %s7220_s22 = smov 0  }
   0xc   :  { %s7222_s23 = smov 0   ;;  %s7224_s24 = smov 0  }
   0xd LB: > { %s7239_s25 = sadd.s32 4294967295, %s7167_s24   ;;  %s5282_s26 = sadd.s32 4294967294, %s7167_s24   ;;  %s7167_s24 = sphi %s7224_s24, %s9700_s24   ;;  %s7163_s23 = sphi %s7222_s23, %s9699_s23   ;;  %s7159_s22 = sphi %s7220_s22, %s9698_s22   ;;  %s7155_s21 = sphi %s7218_s21, %s9697_s21  }
   0xe   : > { %p46_p0 = scmp.ne.s32.totalorder %s7159_s22, %s7155_s21  ;;  %p9585_p1 = scmp.eq.s32.totalorder %s7239_s25, 0 }
   0xf   : > { %p186_p3 = scmp.eq.s32.totalorder %s5282_s26, 1  ;;  %p5283_p5 = scmp.ge.s32.totalorder %s7167_s24, 1 }
  0x10   : > { %p7248_p4 = por %p9585_p1, %p46_p0  ;;  %p193_p7 = scmp.lt.s32.totalorder %s7167_s24, 3 }
  0x11   : > { %p7253_p6 = por %p186_p3, %p46_p0  ;;  %s7169_s30 = smov [#allocation7]  }
  0x12   : > { %s9613_s27 = scalar_select %p7248_p4, 1, 0 }
  0x13   : > { %s9614_s28 = scalar_select %p7253_p6, 1, 0 }
  0x14   : > { %p7258_p8 = pnand %p5283_p5, %p193_p7  ;;  %s205_s7 = sshll.u32 %s7169_s30, 4  ;;  %s7262_s7 = int_to_ptr.vmem [resolvable:$true] %s205_s7 }
  0x15   : > { %s7170_s9 = smov [#allocation8]   ;;  %s9617_s2 = sld [smem:[#allocation40_spill]] }
  0x16   : > { %s9615_s29 = scalar_select %p7258_p8, 1, 0 }
  0x17   : > { %p6150_p9 = pneg %p7258_p8  ;;  %s218_s10 = sshll.u32 %s7170_s9, 4  ;;  %s7273_s10 = int_to_ptr.vmem [resolvable:$true] %s218_s10 }
  0x19   : > { %p7269_p11 = pnand %p6150_p9, %p9585_p1 }
  0x1b   : > { %s6945_s13 = scalar_lea.hbm %s9617_s2, 6144  ;;  %p7283_p13 = pneg %p7269_p11 }
  0x1c   : > { %p6946_p12 = scmp.ne.s32.totalorder %s9617_s2, %s6945_s13  ;;  %p6952_p5 = scmp.lt.u32.totalorder %s6945_s13, %s9617_s2 }
  0x1e   : > { %p6948_p0 = pnand %p7283_p13, %p6946_p12 }
  0x20   : > { %p6949_p3 = pneg %p6948_p0 }
  0x22   : > { %p6954_p7 = pnand %p6952_p5, %p6949_p3 }
  0x24   : > { %6957 = shalt.err (!%p6954_p7)
}
  0x25   : > { %s6958_s19 = scalar_lea.vmem %s7262_s7, 6144  ;;  %p6966_p2 = scmp.lt.s32.totalorder %s7262_s7, %s7262_s7 }
  0x26   : > { %p6959_p9 = scmp.ne.s32.totalorder %s7262_s7, %s6958_s19  ;;  %p6967_p6 = scmp.lt.s32.totalorder %s6958_s19, %s6958_s19 }
  0x28   : > { %p6961_p10 = pnand %p6959_p9, %p7283_p13  ;;  %p6968_p12 = por %p6967_p6, %p6966_p2 }
  0x2a   : > { %p6962_p1 = pneg %p6961_p10 }
  0x2c   : > { %p6969_p0 = pnand %p6968_p12, %p6962_p1 }
  0x2e   : > { %6972 = shalt.err (!%p6969_p0)
}
  0x2f   : > { %s9586_s20 = smov 64   ;;  %s9587_s26 = smov 4  }
  0x30   : > { %6153 = dma.hbm_to_vmem [thread:$0]  (!%p7269_p11), %s9617_s2, 6144, %s7262_s7, [#allocation6], %s9586_s20, %s9586_s20, %s9587_s26  }
  0x31   : > { %s9619_s3 = sld [smem:[#allocation41_spill]] }
  0x37   : > { %s6973_s13 = scalar_lea.hbm %s9619_s3, 4096 }
  0x38   : > { %p6974_p1 = scmp.ne.s32.totalorder %s9619_s3, %s6973_s13  ;;  %p6980_p10 = scmp.lt.u32.totalorder %s6973_s13, %s9619_s3 }
  0x3a   : > { %p6976_p2 = pnand %p6974_p1, %p7283_p13 }
  0x3c   : > { %p6977_p6 = pneg %p6976_p2 }
  0x3e   : > { %p6982_p3 = pnand %p6980_p10, %p6977_p6 }
  0x40   : > { %6985 = shalt.err (!%p6982_p3)
}
  0x41   : > { %s6986_s7 = scalar_lea.vmem %s7273_s10, 4096  ;;  %p6994_p12 = scmp.lt.s32.totalorder %s7273_s10, %s7273_s10 }
  0x42   : > { %p6987_p5 = scmp.ne.s32.totalorder %s7273_s10, %s6986_s7  ;;  %p6995_p0 = scmp.lt.s32.totalorder %s6986_s7, %s6986_s7 }
  0x44   : > { %p6989_p7 = pnand %p6987_p5, %p7283_p13  ;;  %p6996_p1 = por %p6995_p0, %p6994_p12 }
  0x46   : > { %p6990_p9 = pneg %p6989_p7 }
  0x48   : > { %p6997_p2 = pnand %p6996_p1, %p6990_p9 }
  0x4a   : > { %7000 = shalt.err (!%p6997_p2)
}
  0x4b   : > { %s7173_s19 = smov 128   ;;  %s7174_s30 = smov 8  }
  0x4c   : > { %6156 = dma.hbm_to_vmem [thread:$0]  (!%p7269_p11), %s9619_s3, 4096, %s7273_s10, [#allocation9], %s7173_s19, %s7173_s19, %s7174_s30  }
  0x4d   : > { %s7175_s12 = smov [#allocation10]   ;;  %s7334_s14 = sadd.s32 1, %s7167_s24  }
  0x4e   : > { %s231_s13 = sshll.u32 %s7175_s12, 4  ;;  %s9620_s4 = sld [smem:[#allocation42_spill]]  ;;  %s232_s13 = int_to_ptr.vmem [resolvable:$true] %s231_s13 }
  0x54   : > { %s7001_s18 = scalar_lea.hbm %s9620_s4, 4096 }
  0x55   : > { %p7002_p6 = scmp.ne.s32.totalorder %s9620_s4, %s7001_s18  ;;  %p7008_p5 = scmp.lt.u32.totalorder %s7001_s18, %s9620_s4 }
  0x57   : > { %p7004_p10 = pnand %p7002_p6, %p7283_p13 }
  0x59   : > { %p7005_p3 = pneg %p7004_p10 }
  0x5b   : > { %p7010_p7 = pnand %p7008_p5, %p7005_p3 }
  0x5d   : > { %7013 = shalt.err (!%p7010_p7)
}
  0x5e   : > { %s7014_s10 = scalar_lea.vmem %s232_s13, 4096  ;;  %p7022_p1 = scmp.lt.s32.totalorder %s232_s13, %s232_s13 }
  0x5f   : > { %p7015_p9 = scmp.ne.s32.totalorder %s232_s13, %s7014_s10  ;;  %p7023_p2 = scmp.lt.s32.totalorder %s7014_s10, %s7014_s10 }
  0x61   : > { %p7017_p12 = pnand %p7015_p9, %p7283_p13  ;;  %p7024_p4 = por %p7023_p2, %p7022_p1 }
  0x63   : > { %p7018_p0 = pneg %p7017_p12 }
  0x65   : > { %p7025_p8 = pnand %p7024_p4, %p7018_p0 }
  0x67   : > { %7028 = shalt.err (!%p7025_p8)
}
  0x68   : > { %s9621_s20 = smov 4   ;;  %s9622_s9 = smov 64  }
  0x69   : > { %6159 = dma.hbm_to_vmem [thread:$0]  (!%p7269_p11), %s9620_s4, 4096, %s232_s13, [#allocation9], %s9622_s9, %s9622_s9, %s9621_s20  }
  0x6a   : > { %s30_s16 = ssub.s32 %s7167_s24, %s7334_s14  ;;  %s33_s8 = sadd.s32 1, %s7163_s23 }
  0x6b   : > { %p31_p4 = scmp.eq.s32.totalorder %s30_s16, 0  ;;  %p40_p8 = scmp.ne.s32.totalorder %s7163_s23, %s7159_s22 }
  0x6c   : > { %p41_p13 = scmp.eq.s32.totalorder %s7167_s24, 0  ;;  %p6174_p6 = scmp.lt.s32.totalorder %s7167_s24, 2 }
  0x6d   : > { %s7365_s11 = scalar_select %p31_p4, %s7163_s23, %s33_s8  }
  0x6e   : > { %p42_p10 = por %p41_p13, %p40_p8  ;;  %p9623_p3 = scmp.eq.s32.totalorder %s7239_s25, 1 }
  0x6f   : > { %s7374_s15 = sand.u32 1, %s7163_s23   ;;  %s5518_s13 = sshll.u32 %s7167_s24, 12 }
  0x70   : > { %p7369_p5 = por %p9623_p3, %p40_p8  ;;  %s5288_s17 = sshll.u32 %s7374_s15, 8 }
  0x71   : > { %s9625_s0 = sld [smem:[#allocation39_spill]]  ;;  %s252_s20 = scalar_lea.vmem [#allocation2], %s5288_s17 }
  0x72   : > { %s260_s9 = sshll.u32 %s252_s20, 4  ;;  %p7383_p11 = pnand %p6174_p6, %p42_p10  ;;  %s7387_s9 = int_to_ptr.vmem [resolvable:$true] %s260_s9 }
  0x73   : > { %s249_s16 = scalar_lea.sflag [#allocation3], %s7374_s15 }
  0x74   : > { %p7031_p9 = pneg %p7383_p11 }
  0x77   : > { %s7381_s10 = scalar_lea.hbm %s9625_s0, %s5518_s13  ;;  %s7034_s18 = scalar_lea.hbm %s9625_s0, 8192 }
  0x78   : > { %s7029_s8 = scalar_lea.hbm %s7381_s10, 4096  ;;  %p7035_p1 = scmp.lt.u32.totalorder %s7381_s10, %s9625_s0 }
  0x79   : > { %p7030_p7 = scmp.ne.s32.totalorder %s7381_s10, %s7029_s8  ;;  %p7036_p2 = scmp.lt.u32.totalorder %s7034_s18, %s7029_s8 }
  0x7a   : > { %p7038_p8 = scmp.lt.u32.totalorder %s7029_s8, %s7381_s10 }
  0x7b   : > { %p7032_p12 = pnand %p7031_p9, %p7030_p7  ;;  %p7037_p4 = por %p7036_p2, %p7035_p1 }
  0x7d   : > { %p7033_p0 = pneg %p7032_p12  ;;  %p7039_p13 = por %p7038_p8, %p7037_p4 }
  0x7f   : > { %p7040_p6 = pnand %p7039_p13, %p7033_p0 }
  0x81   : > { %7043 = shalt.err (!%p7040_p6)
}
  0x82   : > { %s7044_s26 = scalar_lea.vmem %s7387_s9, 4096  ;;  %s7176_s13 = smov [#allocation2]  }
  0x83   : > { %p7045_p10 = scmp.ne.s32.totalorder %s7387_s9, %s7044_s26  ;;  %s7049_s17 = sshll.u32 %s7176_s13, 4  ;;  %s7050_s17 = int_to_ptr.vmem [resolvable:$false] %s7049_s17 }
  0x84   : > { %s7051_s7 = scalar_lea.vmem %s7050_s17, 8192  ;;  %p7052_p12 = scmp.lt.s32.totalorder %s7387_s9, %s7050_s17 }
  0x85   : > { %p7047_p3 = pnand %p7045_p10, %p7031_p9  ;;  %p7053_p1 = scmp.lt.s32.totalorder %s7051_s7, %s7044_s26 }
  0x87   : > { %p7048_p7 = pneg %p7047_p3  ;;  %p7054_p2 = por %p7053_p1, %p7052_p12 }
  0x89   : > { %p7055_p4 = pnand %p7054_p2, %p7048_p7 }
  0x8b   : > { %7058 = shalt.err (!%p7055_p4)
}
  0x8c   : > { %6163 = dma.hbm_to_vmem [thread:$0]  (!%p7383_p11), %s7381_s10, 4096, %s7387_s9, %s249_s16, %s7173_s19, %s7173_s19, %s7174_s30  }
  0x8d   : > { %s5292_s8 = sshll.u32 %s7374_s15, 9  ;;  %s5520_s18 = sshll.u32 %s7167_s24, 13 }
  0x8e   : > { %s7426_s13 = scalar_lea.hbm %s9579_s1, %s5520_s18  ;;  %s274_s17 = scalar_lea.vmem [#allocation5], %s5292_s8 }
  0x8f   : > { %s282_s7 = sshll.u32 %s274_s17, 4  ;;  %s9627_s0 = sand.u32 1, %s7167_s24   ;;  %s7428_s7 = int_to_ptr.vmem [resolvable:$true] %s282_s7 }
  0x90   : > { %s7432_s3 = scalar_lea.sflag [#allocation6], %s9627_s0  ;;  %s7059_s4 = scalar_lea.hbm %s7426_s13, 8192 }
  0x91   : > { %p7060_p0 = scmp.ne.s32.totalorder %s7426_s13, %s7059_s4  ;;  %s7064_s15 = scalar_lea.hbm %s9579_s1, 16384 }
  0x92   : > { %p7065_p6 = scmp.lt.u32.totalorder %s7426_s13, %s9579_s1  ;;  %p7066_p10 = scmp.lt.u32.totalorder %s7064_s15, %s7059_s4 }
  0x93   : > { %p7062_p8 = pnand %p7060_p0, %p7031_p9  ;;  %p7068_p7 = scmp.lt.u32.totalorder %s7059_s4, %s7426_s13 }
  0x94   : > { %p7067_p3 = por %p7066_p10, %p7065_p6 }
  0x95   : > { %p7063_p13 = pneg %p7062_p8 }
  0x96   : > { %p7069_p12 = por %p7068_p7, %p7067_p3 }
  0x98   : > { %p7070_p1 = pnand %p7069_p12, %p7063_p13 }
  0x9a   : > { %7073 = shalt.err (!%p7070_p1)
}
  0x9b   : > { %s7074_s0 = scalar_lea.vmem %s7428_s7, 8192  ;;  %s7177_s16 = smov [#allocation5]  }
  0x9c   : > { %p7075_p2 = scmp.ne.s32.totalorder %s7428_s7, %s7074_s0  ;;  %s7079_s8 = sshll.u32 %s7177_s16, 4  ;;  %s7080_s8 = int_to_ptr.vmem [resolvable:$false] %s7079_s8 }
  0x9d   : > { %s7081_s18 = scalar_lea.vmem %s7080_s8, 16384  ;;  %p7082_p8 = scmp.lt.s32.totalorder %s7428_s7, %s7080_s8 }
  0x9e   : > { %p7077_p4 = pnand %p7075_p2, %p7031_p9  ;;  %p7083_p6 = scmp.lt.s32.totalorder %s7081_s18, %s7074_s0 }
  0xa0   : > { %p7078_p0 = pneg %p7077_p4  ;;  %p7084_p10 = por %p7083_p6, %p7082_p8 }
  0xa2   : > { %p7085_p3 = pnand %p7084_p10, %p7078_p0 }
  0xa4   : > { %7088 = shalt.err (!%p7085_p3)
}
  0xa5   : > { %s7178_s4 = smov 256   ;;  %s7179_s26 = smov 16  }
  0xa6   : > { %6166 = dma.hbm_to_vmem [thread:$0]  (!%p7383_p11), %s7426_s13, 8192, %s7428_s7, %s7432_s3, %s7178_s4, %s7178_s4, %s7179_s26  }
  0xa7   : > { %p9628_p9 = scmp.ne.s32.totalorder %s9615_s29, 0 }
  0xa9   : > { %294 = sbr.rel (%p9628_p9) target bundleno = 1986 (0x7c2), region = 44 }
  0xb0   : > { %s7461_s20 = sand.u32 1, %s7159_s22   ;;  %p9629_p13 = scmp.ne.s32.totalorder %s9613_s27, 0 }
  0xb1   : > { %s5297_s17 = sshll.u32 %s7461_s20, 8  ;;  %s297_s19 = scalar_lea.sflag [#allocation3], %s7461_s20 }
  0xb2   : > { %s7465_s30 = scalar_lea.vmem [#allocation2], %s5297_s17 }
  0xb3   : > { %7134 = dma.done.wait (%p9629_p13), %s297_s19, 4096  }
  0xb4   : > { %7136 = vsyncadd (%p9629_p13), %s297_s19, 4294963200  ;;  %s305_s3 = sand.u32 1, %s7239_s25   ;;  %s5298_s29 = sshll.u32 %s7461_s20, 9 }
  0xb5   : > { %s306_s2 = scalar_lea.sflag [#allocation6], %s305_s3  ;;  %s7473_s13 = scalar_lea.vmem [#allocation5], %s5298_s29 }
  0xb6   : > { %7138 = dma.done.wait (%p9629_p13), %s306_s2, 8192  }
  0xb7   : > { %7140 = vsyncadd (%p9629_p13), %s306_s2, 4294959104  ;;  %p9630_p11 = scmp.eq.s32.totalorder %s7239_s25, 0 }
  0xb9   : > { %7142 = dma.done.wait (%p9630_p11), [#allocation6], 6144   ;;  %p9631_p7 = pmov %p9630_p11 }
  0xbb   : > { %7144 = vsyncadd (%p9631_p7), [#allocation6], 4294961152  ;;  %p9632_p12 = pmov %p9631_p7 }
  0xbc   : > { %p9633_p1 = pmov %p9631_p7 }
  0xbd   : > { %7146 = dma.done.wait (%p9632_p12), [#allocation9], 8192  }
  0xbe   : > { %7148 = vsyncadd (%p9633_p1), [#allocation9], 4294959104  ;;  %v6223_v0 = vld [vmem:[#allocation7 + $0x40] sm:$0xff]   ;;  %v6225_v2 = vld [vmem:[#allocation7 + $0x48] sm:$0xff]   ;;  %s5302_s15 = sshll.u32 %s7461_s20, 1  ;;  %s5521_s10 = sshll.u32 %s7239_s25, 5 }
  0xbf   : > { %v6224_v1 = vld [vmem:[#allocation7] sm:$0xff]   ;;  %5522 = vmatprep.subr.bf16.mxu0 %v6223_v0  ;;  %v6226_v3 = vld [vmem:[#allocation7 + $0x8] sm:$0xff]   ;;  %v6227_v4 = vld [vmem:[#allocation7 + $0x50] sm:$0xff]   ;;  %s354_s9 = scalar_lea.vmem [#allocation11], %s5302_s15  ;;  %s9534_s18 = scalar_lea.hbm %s9584_s6, %s5521_s10 }
  0xc0   : > { %5523 = vmatpush3.bf16.msra.mxu0 %v6224_v1  ;;  %v6228_v5 = vld [vmem:[#allocation7 + $0x10] sm:$0xff]   ;;  %v6229_v6 = vld [vmem:[#allocation7 + $0x58] sm:$0xff]   ;;  %v6231_v8 = vld [vmem:[#allocation7 + $0x60] sm:$0xff]   ;;  %s5161_s0 = sshll.u32 %s354_s9, 4  ;;  %s5147_s4 = scalar_lea.sflag [#allocation4], %s7461_s20  ;;  %s9536_s0 = int_to_ptr.vmem [resolvable:$true] %s5161_s0 }
  0xc1   : > { %5524 = vmatprep.subr.bf16.mxu0 %v6225_v2  ;;  %v6230_v7 = vld [vmem:[#allocation7 + $0x18] sm:$0xff]   ;;  %v6232_v9 = vld [vmem:[#allocation7 + $0x20] sm:$0xff]   ;;  %v6233_v10 = vld [vmem:[#allocation7 + $0x68] sm:$0xff]   ;;  %s7089_s26 = scalar_lea.vmem %s9536_s0, 32  ;;  %s7182_s25 = smov [#allocation11]  }
  0xc2   : > { %v6241_v11 = vld [vmem:[%s7465_s30 + $0x4] ss:$8 sps:$4 sm:$0xff]   ;;  %v6235_v13 = vld [vmem:[#allocation7 + $0x70] sm:$0xff]   ;;  %v6237_v15 = vld [vmem:[#allocation7 + $0x78] sm:$0xff]   ;;  %p7090_p2 = scmp.ne.s32.totalorder %s9536_s0, %s7089_s26  ;;  %s7093_s17 = sshll.u32 %s7182_s25, 4  ;;  %s7094_s17 = int_to_ptr.vmem [resolvable:$false] %s7093_s17 }
  0xc3   : > { %v6234_v12 = vld [vmem:[#allocation7 + $0x28] sm:$0xff]   ;;  %880 = vmatprep.mubr.bf16.mxu0 %v6241_v11  ;;  %v6236_v14 = vld [vmem:[#allocation7 + $0x30] sm:$0xff]   ;;  %v6238_v16 = vld [vmem:[#allocation7 + $0x38] sm:$0xff]   ;;  %s7095_s19 = scalar_lea.vmem %s7094_s17, 64  ;;  %p7096_p8 = scmp.lt.s32.totalorder %s9536_s0, %s7094_s17 }
  0xc4   : > { %5525 = vmatpush3.bf16.msra.mxu0 %v6226_v3  ;;  %v6266_v17 = vld [vmem:[#allocation7 + $0x140] sm:$0xff]   ;;  %v6242_v19 = vld [vmem:[%s7465_s30 + $0x14] ss:$8 sps:$4 sm:$0xff]   ;;  %v6274_v21 = vld [vmem:[#allocation7 + $0x148] sm:$0xff]   ;;  %p7091_p4 = pnand %p7090_p2, %p7369_p5  ;;  %p7097_p6 = scmp.lt.s32.totalorder %s7095_s19, %s7089_s26 }
  0xc5   : > { %5526 = vmatprep.subr.bf16.mxu0 %v6227_v4  ;;  %v6239_v18 = vld [vmem:[%s7465_s30] ss:$8 sps:$4 sm:$0xff]   ;;  %v6244_v23 = vld [vmem:[%s7465_s30 + $0x10] ss:$8 sps:$4 sm:$0xff]   ;;  %v6245_v26 = vld [vmem:[%s7465_s30 + $0x24] ss:$8 sps:$4 sm:$0xff]  }
  0xc6   : > { %v6267_v20 = vld [vmem:[#allocation7 + $0x100] sm:$0xff]   ;;  %v6275_v22 = vld [vmem:[#allocation7 + $0x108] sm:$0xff]   ;;  %v6286_v29 = vld [vmem:[#allocation7 + $0x150] sm:$0xff]   ;;  %p7092_p0 = pneg %p7091_p4  ;;  %p7098_p10 = por %p7097_p6, %p7096_p8 }
  0xc7   : > { %v6279_v24 = vld [vmem:[#allocation7 + $0xc0] sm:$0xff]   ;;  %v6283_v27 = vld [vmem:[#allocation7 + $0xc8] sm:$0xff]   ;;  %v6287_v30 = vld [vmem:[#allocation7 + $0x110] sm:$0xff]  }
  0xc8   : > { %5527 = vmatpush3.bf16.msra.mxu0 %v6228_v5  ;;  %v6280_v25 = vld [vmem:[#allocation7 + $0x80] sm:$0xff]   ;;  %5634 = vmatprep.subr.bf16.mxu1 %v6279_v24  ;;  %v6285_v28 = vld [vmem:[#allocation7 + $0x88] sm:$0xff]   ;;  %v6288_v31 = vld [vmem:[#allocation7 + $0xd0] sm:$0xff]   ;;  %p7099_p3 = pnand %p7098_p10, %p7092_p0 }
  0xc9   : > { %5528 = vmatprep.subr.bf16.mxu0 %v6229_v6  ;;  %5635 = vmatpush3.bf16.msra.mxu1 %v6280_v25  ;;  %v6289_v32 = vld [vmem:[#allocation7 + $0x90] sm:$0xff]   ;;  %v6247_v33 = vld [vmem:[%s7465_s30 + $0x20] ss:$8 sps:$4 sm:$0xff]   ;;  %v6292_v35 = vld [vmem:[#allocation7 + $0xd8] sm:$0xff]  }
  0xca   : > { %5636 = vmatprep.subr.bf16.mxu1 %v6283_v27  ;;  %v6248_v34 = vld [vmem:[%s7465_s30 + $0x34] ss:$8 sps:$4 sm:$0xff]   ;;  %v6295_v37 = vld [vmem:[#allocation7 + $0xe0] sm:$0xff]   ;;  %v6250_v41 = vld [vmem:[%s7465_s30 + $0x30] ss:$8 sps:$4 sm:$0xff]  }
  0xcb   : > { %v6294_v36 = vld [vmem:[#allocation7 + $0x98] sm:$0xff]   ;;  %v6296_v38 = vld [vmem:[#allocation7 + $0xa0] sm:$0xff]   ;;  %v6301_v43 = vld [vmem:[#allocation7 + $0xe8] sm:$0xff]  }
  0xcc   : > { %5529 = vmatpush3.bf16.msra.mxu0 %v6230_v7  ;;  %v6297_v39 = vld [vmem:[#allocation7 + $0x158] sm:$0xff]   ;;  %v6251_v42 = vld [vmem:[%s7465_s30 + $0x44] ss:$8 sps:$4 sm:$0xff]   ;;  %v6306_v47 = vld [vmem:[#allocation7 + $0xf0] sm:$0xff]  }
  0xcd   : > { %5530 = vmatprep.subr.bf16.mxu0 %v6231_v8  ;;  %5637 = vmatpush3.bf16.msra.mxu1 %v6285_v28  ;;  %v6298_v40 = vld [vmem:[#allocation7 + $0x118] sm:$0xff]   ;;  %v6303_v44 = vld [vmem:[#allocation7 + $0xa8] sm:$0xff]   ;;  %v6304_v45 = vld [vmem:[#allocation7 + $0x160] sm:$0xff]  }
  0xce   : > { %5638 = vmatprep.subr.bf16.mxu1 %v6288_v31  ;;  %v6305_v46 = vld [vmem:[#allocation7 + $0x120] sm:$0xff]   ;;  %v6307_v48 = vld [vmem:[#allocation7 + $0xb0] sm:$0xff]   ;;  %v6308_v50 = vld [vmem:[#allocation7 + $0x168] sm:$0xff]  }
  0xcf   : > { %v6253_v49 = vld [vmem:[%s7465_s30 + $0x40] ss:$8 sps:$4 sm:$0xff]   ;;  %v6254_v52 = vld [vmem:[%s7465_s30 + $0x54] ss:$8 sps:$4 sm:$0xff]   ;;  %v6256_v57 = vld [vmem:[%s7465_s30 + $0x50] ss:$8 sps:$4 sm:$0xff]  }
  0xd0   : > { %5531 = vmatpush3.bf16.msra.mxu0 %v6232_v9  ;;  %v6309_v51 = vld [vmem:[#allocation7 + $0x128] sm:$0xff]   ;;  %v6312_v53 = vld [vmem:[#allocation7 + $0xf8] sm:$0xff]   ;;  %v6315_v55 = vld [vmem:[#allocation7 + $0x170] sm:$0xff]  }
  0xd1   : > { %5532 = vmatprep.subr.bf16.mxu0 %v6233_v10  ;;  %5639 = vmatpush3.bf16.msra.mxu1 %v6289_v32  ;;  %v6314_v54 = vld [vmem:[#allocation7 + $0xb8] sm:$0xff]   ;;  %v6316_v56 = vld [vmem:[#allocation7 + $0x130] sm:$0xff]   ;;  %v6257_v62 = vld [vmem:[%s7465_s30 + $0x64] ss:$8 sps:$4 sm:$0xff]  }
  0xd2   : > { %5640 = vmatprep.subr.bf16.mxu1 %v6292_v35  ;;  %v6317_v58 = vld [vmem:[%s7473_s13] ss:$16 sps:$4 sm:$0xff]   ;;  %v6319_v59 = vld [vmem:[%s7473_s13 + $0x4] ss:$16 sps:$4 sm:$0xff]   ;;  %v6320_v60 = vld [vmem:[#allocation7 + $0x178] sm:$0xff]  }
  0xd3   : > { %1905 = vmatprep.mubr.bf16.mxu1 %v6319_v59  ;;  %v6321_v61 = vld [vmem:[#allocation7 + $0x138] sm:$0xff]   ;;  %v6325_v63 = vld [vmem:[%s7473_s13 + $0x24] ss:$16 sps:$4 sm:$0xff]   ;;  %v6327_v0 = vld [vmem:[%s7473_s13 + $0x20] ss:$16 sps:$4 sm:$0xff]  }
  0xd4   : > { %5533 = vmatpush3.bf16.msra.mxu0 %v6234_v12  ;;  %v6331_v1 = vld [vmem:[%s7473_s13 + $0x44] ss:$16 sps:$4 sm:$0xff]   ;;  %v6259_v2 = vld [vmem:[%s7465_s30 + $0x60] ss:$8 sps:$4 sm:$0xff]   ;;  %v6262_v6 = vld [vmem:[%s7465_s30 + $0x70] ss:$8 sps:$4 sm:$0xff]  }
  0xd5   : > { %5534 = vmatprep.subr.bf16.mxu0 %v6235_v13  ;;  %5641 = vmatpush3.bf16.msra.mxu1 %v6294_v36  ;;  %v6260_v3 = vld [vmem:[%s7465_s30 + $0x74] ss:$8 sps:$4 sm:$0xff]   ;;  %v6333_v4 = vld [vmem:[%s7473_s13 + $0x40] ss:$16 sps:$4 sm:$0xff]   ;;  %v6263_v7 = vld [vmem:[%s7465_s30 + $0x84] ss:$8 sps:$4 sm:$0xff]  }
  0xd6   : > { %5642 = vmatprep.subr.bf16.mxu1 %v6295_v37  ;;  %v6337_v5 = vld [vmem:[%s7473_s13 + $0x64] ss:$16 sps:$4 sm:$0xff]   ;;  %v6339_v8 = vld [vmem:[%s7473_s13 + $0x60] ss:$16 sps:$4 sm:$0xff]   ;;  %v6354_v59 = vld [vmem:[%s7473_s13 + $0xa8] ss:$16 sps:$4 sm:$0xff]  }
  0xd7   : > { %v6265_v9 = vld [vmem:[%s7465_s30 + $0x80] ss:$8 sps:$4 sm:$0xff]   ;;  %v6343_v10 = vld [vmem:[%s7473_s13 + $0x84] ss:$16 sps:$4 sm:$0xff]  }
  0xd8   : > { %5535 = vmatpush3.bf16.msra.mxu0 %v6236_v14  ;;  %v6268_v11 = vld [vmem:[%s7465_s30 + $0x94] ss:$8 sps:$4 sm:$0xff]   ;;  %v6345_v12 = vld [vmem:[%s7473_s13 + $0x80] ss:$16 sps:$4 sm:$0xff]   ;;  %v6299_v31 = vld [vmem:[%s7465_s30 + $0xe4] ss:$8 sps:$4 sm:$0xff]  }
  0xd9   : > { %5536 = vmatprep.subr.bf16.mxu0 %v6237_v15  ;;  %5643 = vmatpush3.bf16.msra.mxu1 %v6296_v38  ;;  %v6349_v13 = vld [vmem:[%s7473_s13 + $0xa4] ss:$16 sps:$4 sm:$0xff]   ;;  %v6270_v14 = vld [vmem:[%s7465_s30 + $0x90] ss:$8 sps:$4 sm:$0xff]  }
  0xda   : > { %5644 = vmatprep.subr.bf16.mxu1 %v6301_v43  ;;  %v6271_v15 = vld [vmem:[%s7465_s30 + $0xa4] ss:$8 sps:$4 sm:$0xff]   ;;  %v6363_v24 = vld [vmem:[%s7473_s13 + $0xe0] ss:$16 sps:$4 sm:$0xff]   ;;  %v6290_v27 = vld [vmem:[%s7465_s30 + $0xd4] ss:$8 sps:$4 sm:$0xff]  }
  0xdb   : > { %v6367_v25 = vld [vmem:[%s7473_s13 + $0x104] ss:$16 sps:$4 sm:$0xff]   ;;  %v6369_v28 = vld [vmem:[%s7473_s13 + $0x100] ss:$16 sps:$4 sm:$0xff]   ;;  %v6328_v43 = vld [vmem:[%s7473_s13 + $0x2c] ss:$16 sps:$4 sm:$0xff]  }
  0xdc   : > { %5537 = vmatpush3.bf16.msra.mxu0 %v6238_v16  ;;  %v6351_v16 = vld [vmem:[%s7473_s13 + $0xa0] ss:$16 sps:$4 sm:$0xff]   ;;  %v6310_v35 = vld [vmem:[%s7465_s30 + $0xf4] ss:$8 sps:$4 sm:$0xff]  }
  0xdd   : > { %5746 = vmatprep.subr.bf16.mxu0 %v6266_v17  ;;  %5645 = vmatpush3.bf16.msra.mxu1 %v6303_v44  ;;  %v6355_v17 = vld [vmem:[%s7473_s13 + $0xc4] ss:$16 sps:$4 sm:$0xff]   ;;  %v6375_v32 = vld [vmem:[%s7473_s13 + $0x120] ss:$16 sps:$4 sm:$0xff]  }
  0xde   : > { %5646 = vmatprep.subr.bf16.mxu1 %v6306_v47  ;;  %v6381_v36 = vld [vmem:[%s7473_s13 + $0x140] ss:$16 sps:$4 sm:$0xff]   ;;  %v6385_v37 = vld [vmem:[%s7473_s13 + $0x164] ss:$16 sps:$4 sm:$0xff]   ;;  %v6334_v47 = vld [vmem:[%s7473_s13 + $0x4c] ss:$16 sps:$4 sm:$0xff]  }
  0xdf   : > { %881 = vmatmul.mubr.bf16.vlgmr.msra.gmra.mrb[0].mxu0 %v6239_v18  ;;  %v6273_v18 = vld [vmem:[%s7465_s30 + $0xa0] ss:$8 sps:$4 sm:$0xff]   ;;  %v6313_v38 = vld [vmem:[%s7465_s30 + $0xf0] ss:$8 sps:$4 sm:$0xff]  }
  0xe0   : > { %888 = vmatprep.mubr.bf16.mxu0 %v6242_v19  ;;  %5747 = vmatpush3.bf16.msra.mxu0 %v6267_v20  ;;  %v6276_v19 = vld [vmem:[%s7465_s30 + $0xb4] ss:$8 sps:$4 sm:$0xff]   ;;  %v6357_v20 = vld [vmem:[%s7473_s13 + $0xc0] ss:$16 sps:$4 sm:$0xff]  }
  0xe1   : > { %5748 = vmatprep.subr.bf16.mxu0 %v6274_v21  ;;  %5647 = vmatpush3.bf16.msra.mxu1 %v6307_v48  ;;  %v6361_v21 = vld [vmem:[%s7473_s13 + $0xe4] ss:$16 sps:$4 sm:$0xff]   ;;  %v6393_v44 = vld [vmem:[%s7473_s13 + $0x180] ss:$16 sps:$4 sm:$0xff]  }
  0xe2   : > { %5648 = vmatprep.subr.bf16.mxu1 %v6312_v53  ;;  %v6399_v48 = vld [vmem:[%s7473_s13 + $0x1a0] ss:$16 sps:$4 sm:$0xff]   ;;  %v6409_v53 = vld [vmem:[%s7473_s13 + $0x1e4] ss:$16 sps:$4 sm:$0xff]  }
  0xe4   : > { %5749 = vmatpush3.bf16.msra.mxu0 %v6275_v22  ;;  %v6278_v22 = vld [vmem:[%s7465_s30 + $0xb0] ss:$8 sps:$4 sm:$0xff]  }
  0xe5   : > { %5750 = vmatprep.subr.bf16.mxu0 %v6286_v29  ;;  %5649 = vmatpush3.bf16.msra.mxu1 %v6314_v54  ;;  %v6373_v29 = vld [vmem:[%s7473_s13 + $0x124] ss:$16 sps:$4 sm:$0xff]   ;;  %v6342_v54 = vld [vmem:[%s7473_s13 + $0x68] ss:$16 sps:$4 sm:$0xff]  }
  0xe7   : > { %889 = vmatmul.mubr.bf16.gmra.mrb[4].mxu0 %v6244_v23  ;;  %v6281_v23 = vld [vmem:[%s7465_s30 + $0xc4] ss:$8 sps:$4 sm:$0xff]  }
  0xe8   : > { %896 = vmatprep.mubr.bf16.mxu0 %v6245_v26  ;;  %5751 = vmatpush3.bf16.msra.mxu0 %v6287_v30  ;;  %v6284_v26 = vld [vmem:[%s7465_s30 + $0xc0] ss:$8 sps:$4 sm:$0xff]   ;;  %v6293_v30 = vld [vmem:[%s7465_s30 + $0xd0] ss:$8 sps:$4 sm:$0xff]  }
  0xe9   : > { %5752 = vmatprep.subr.bf16.mxu0 %v6297_v39  ;;  %1906 = vmatmul.mubr.bf16.vlgmr.msra.gmra.mrb[0].mxu1 %v6317_v58  ;;  %v6324_v39 = vld [vmem:[%s7473_s13 + $0xc] ss:$16 sps:$4 sm:$0xff]  }
  0xea   : > { %1913 = vmatprep.mubr.bf16.mxu1 %v6325_v63  ;;  %v6352_v58 = vld [vmem:[%s7473_s13 + $0xac] ss:$16 sps:$4 sm:$0xff]   ;;  %v6366_v63 = vld [vmem:[%s7473_s13 + $0xe8] ss:$16 sps:$4 sm:$0xff]  }
  0xec   : > { %5753 = vmatpush3.bf16.msra.mxu0 %v6298_v40  ;;  %v6387_v40 = vld [vmem:[%s7473_s13 + $0x160] ss:$16 sps:$4 sm:$0xff]  }
  0xed   : > { %5754 = vmatprep.subr.bf16.mxu0 %v6304_v45  ;;  %v6397_v45 = vld [vmem:[%s7473_s13 + $0x1a4] ss:$16 sps:$4 sm:$0xff]  }
  0xef   : > { %897 = vmatmul.mubr.bf16.gmra.mrb[8].mxu0 %v6247_v33  ;;  %v6379_v33 = vld [vmem:[%s7473_s13 + $0x144] ss:$16 sps:$4 sm:$0xff]  }
  0xf0   : > { %904 = vmatprep.mubr.bf16.mxu0 %v6248_v34  ;;  %5755 = vmatpush3.bf16.msra.mxu0 %v6305_v46  ;;  %v6302_v34 = vld [vmem:[%s7465_s30 + $0xe0] ss:$8 sps:$4 sm:$0xff]  }
  0xf1   : > { %5756 = vmatprep.subr.bf16.mxu0 %v6308_v50  ;;  %1914 = vmatmul.mubr.bf16.gmra.mrb[4].mxu1 %v6327_v0  ;;  %v6330_v46 = vld [vmem:[%s7473_s13 + $0x28] ss:$16 sps:$4 sm:$0xff]   ;;  %v6370_v0 = vld [vmem:[%s7473_s13 + $0x10c] ss:$16 sps:$4 sm:$0xff]  }
  0xf2   : > { %1921 = vmatprep.mubr.bf16.mxu1 %v6331_v1  ;;  %v6336_v50 = vld [vmem:[%s7473_s13 + $0x48] ss:$16 sps:$4 sm:$0xff]   ;;  %v6417_v1 = vld [vmem:[#allocation8 + $0x4] ss:$8 sps:$4 sm:$0xff]  }
  0xf3   : > { %2686 = vmatprep.subr.bf16.mxu1 %v6417_v1 }
  0xf4   : > { %5757 = vmatpush3.bf16.msra.mxu0 %v6309_v51  ;;  %v6340_v51 = vld [vmem:[%s7473_s13 + $0x6c] ss:$16 sps:$4 sm:$0xff]  }
  0xf5   : > { %5758 = vmatprep.subr.bf16.mxu0 %v6315_v55  ;;  %v6346_v55 = vld [vmem:[%s7473_s13 + $0x8c] ss:$16 sps:$4 sm:$0xff]  }
  0xf7   : > { %905 = vmatmul.mubr.bf16.gmra.mrb[12].mxu0 %v6250_v41  ;;  %v6391_v41 = vld [vmem:[%s7473_s13 + $0x184] ss:$16 sps:$4 sm:$0xff]  }
  0xf8   : > { %912 = vmatprep.mubr.bf16.mxu0 %v6251_v42  ;;  %5759 = vmatpush3.bf16.msra.mxu0 %v6316_v56  ;;  %v6322_v42 = vld [vmem:[%s7473_s13 + $0x8] ss:$16 sps:$4 sm:$0xff]   ;;  %v6411_v56 = vld [vmem:[%s7473_s13 + $0x1e0] ss:$16 sps:$4 sm:$0xff]  }
  0xf9   : > { %5760 = vmatprep.subr.bf16.mxu0 %v6320_v60  ;;  %1922 = vmatmul.mubr.bf16.gmra.mrb[8].mxu1 %v6333_v4  ;;  %v6358_v60 = vld [vmem:[%s7473_s13 + $0xcc] ss:$16 sps:$4 sm:$0xff]   ;;  %v6418_v4 = vld [vmem:[#allocation8 + $0x10] ss:$8 sps:$4 sm:$0xff]  }
  0xfa   : > { %1929 = vmatprep.mubr.bf16.mxu1 %v6337_v5  ;;  %v6372_v5 = vld [vmem:[%s7473_s13 + $0x108] ss:$16 sps:$4 sm:$0xff]  }
  0xfc   : > { %5761 = vmatpush3.bf16.msra.mxu0 %v6321_v61  ;;  %v6360_v61 = vld [vmem:[%s7473_s13 + $0xc8] ss:$16 sps:$4 sm:$0xff]  }
  0xff   : > { %913 = vmatmul.mubr.bf16.gmra.mrb[16].mxu0 %v6253_v49  ;;  %v6403_v49 = vld [vmem:[%s7473_s13 + $0x1c4] ss:$16 sps:$4 sm:$0xff]  }
 0x100   : > { %920 = vmatprep.mubr.bf16.mxu0 %v6254_v52  ;;  %v6405_v52 = vld [vmem:[%s7473_s13 + $0x1c0] ss:$16 sps:$4 sm:$0xff]  }
 0x101   : > { %1930 = vmatmul.mubr.bf16.gmra.mrb[12].mxu1 %v6339_v8  ;;  %v6421_v8 = vld [vmem:[#allocation8 + $0x20] ss:$8 sps:$4 sm:$0xff]  }
 0x102   : > { %1937 = vmatprep.mubr.bf16.mxu1 %v6343_v10  ;;  %v6424_v10 = vld [vmem:[#allocation8 + $0x30] ss:$8 sps:$4 sm:$0xff]  }
 0x107   : > { %921 = vmatmul.mubr.bf16.gmra.mrb[20].mxu0 %v6256_v57  ;;  %v6348_v57 = vld [vmem:[%s7473_s13 + $0x88] ss:$16 sps:$4 sm:$0xff]  }
 0x108   : > { %928 = vmatprep.mubr.bf16.mxu0 %v6257_v62  ;;  %v6364_v62 = vld [vmem:[%s7473_s13 + $0xec] ss:$16 sps:$4 sm:$0xff]  }
 0x109   : > { %1938 = vmatmul.mubr.bf16.gmra.mrb[16].mxu1 %v6345_v12  ;;  %v6382_v12 = vld [vmem:[%s7473_s13 + $0x14c] ss:$16 sps:$4 sm:$0xff]  }
 0x10a   : > { %1945 = vmatprep.mubr.bf16.mxu1 %v6349_v13  ;;  %v6429_v13 = vld [vmem:[#allocation8 + $0x44] ss:$8 sps:$4 sm:$0xff]  }
 0x10f   : > { %929 = vmatmul.mubr.bf16.gmra.mrb[24].mxu0 %v6259_v2  ;;  %v6415_v2 = vld [vmem:[#allocation8] ss:$8 sps:$4 sm:$0xff]  }
 0x110   : > { %936 = vmatprep.mubr.bf16.mxu0 %v6260_v3  ;;  %2687 = vmatpush1.bf16.msra.mxu1 %v6415_v2  ;;  %v6420_v3 = vld [vmem:[#allocation8 + $0x14] ss:$8 sps:$4 sm:$0xff]  }
 0x111   : > { %1946 = vmatmul.mubr.bf16.gmra.mrb[20].mxu1 %v6351_v16  ;;  %2688 = vmatprep.subr.bf16.mxu1 %v6420_v3  ;;  %v6430_v16 = vld [vmem:[#allocation8 + $0x50] ss:$8 sps:$4 sm:$0xff]  }
 0x112   : > { %1953 = vmatprep.mubr.bf16.mxu1 %v6355_v17  ;;  %v6384_v17 = vld [vmem:[%s7473_s13 + $0x148] ss:$16 sps:$4 sm:$0xff]  }
 0x113   : > { %v6402_v3 = vld [vmem:[%s7473_s13 + $0x1a8] ss:$16 sps:$4 sm:$0xff]  }
 0x114   : > { %2689 = vmatpush1.bf16.msra.mxu1 %v6418_v4 }
 0x117   : > { %937 = vmatmul.mubr.bf16.gmra.mrb[28].mxu0 %v6262_v6  ;;  %v6376_v6 = vld [vmem:[%s7473_s13 + $0x12c] ss:$16 sps:$4 sm:$0xff]  }
 0x118   : > { %944 = vmatprep.mubr.bf16.mxu0 %v6263_v7  ;;  %v6423_v7 = vld [vmem:[#allocation8 + $0x24] ss:$8 sps:$4 sm:$0xff]  }
 0x119   : > { %1954 = vmatmul.mubr.bf16.gmra.mrb[24].mxu1 %v6357_v20  ;;  %2690 = vmatprep.subr.bf16.mxu1 %v6423_v7  ;;  %v6433_v20 = vld [vmem:[#allocation8 + $0x60] ss:$8 sps:$4 sm:$0xff]   ;;  %v6406_v7 = vld [vmem:[%s7473_s13 + $0x1cc] ss:$16 sps:$4 sm:$0xff]  }
 0x11a   : > { %1961 = vmatprep.mubr.bf16.mxu1 %v6361_v21  ;;  %2691 = vmatpush1.bf16.msra.mxu1 %v6421_v8  ;;  %v6438_v21 = vld [vmem:[#allocation8 + $0x74] ss:$8 sps:$4 sm:$0xff]   ;;  %v6453_v8 = vld [vmem:[#allocation8 + $0xc4] ss:$8 sps:$4 sm:$0xff]  }
 0x11f   : > { %945 = vmatmul.mubr.bf16.gmra.mrb[32].mxu0 %v6265_v9  ;;  %v6426_v9 = vld [vmem:[#allocation8 + $0x34] ss:$8 sps:$4 sm:$0xff]  }
 0x120   : > { %952 = vmatprep.mubr.bf16.mxu0 %v6268_v11  ;;  %2692 = vmatprep.subr.bf16.mxu1 %v6426_v9  ;;  %v6378_v11 = vld [vmem:[%s7473_s13 + $0x128] ss:$16 sps:$4 sm:$0xff]  }
 0x121   : > { %1962 = vmatmul.mubr.bf16.gmra.mrb[28].mxu1 %v6363_v24  ;;  %v7577_v24 = vld [vmem:[%s9583_s5] ss:$0 sm:$0xff] }
 0x122   : > { %1969 = vmatprep.mubr.bf16.mxu1 %v6367_v25  ;;  %2693 = vmatpush1.bf16.msra.mxu1 %v6424_v10 }
 0x123   : > { %2694 = vmatprep.subr.bf16.mxu1 %v6429_v13 }
 0x127   : > { %953 = vmatmul.mubr.bf16.gmra.mrb[36].mxu0 %v6270_v14  ;;  %v6427_v14 = vld [vmem:[#allocation8 + $0x40] ss:$8 sps:$4 sm:$0xff]  }
 0x128   : > { %960 = vmatprep.mubr.bf16.mxu0 %v6271_v15  ;;  %2695 = vmatpush1.bf16.msra.mxu1 %v6427_v14  ;;  %v6432_v15 = vld [vmem:[#allocation8 + $0x54] ss:$8 sps:$4 sm:$0xff]  }
 0x129   : > { %1970 = vmatmul.mubr.bf16.gmra.mrb[32].mxu1 %v6369_v28  ;;  %2696 = vmatprep.subr.bf16.mxu1 %v6432_v15 }
 0x12a   : > { %1977 = vmatprep.mubr.bf16.mxu1 %v6373_v29  ;;  %v6394_v29 = vld [vmem:[%s7473_s13 + $0x18c] ss:$16 sps:$4 sm:$0xff]  }
 0x12c   : > { %2697 = vmatpush1.bf16.msra.mxu1 %v6430_v16 }
 0x12f   : > { %961 = vmatmul.mubr.bf16.gmra.mrb[40].mxu0 %v6273_v18  ;;  %v6388_v18 = vld [vmem:[%s7473_s13 + $0x16c] ss:$16 sps:$4 sm:$0xff]  }
 0x130   : > { %968 = vmatprep.mubr.bf16.mxu0 %v6276_v19  ;;  %v6435_v19 = vld [vmem:[#allocation8 + $0x64] ss:$8 sps:$4 sm:$0xff]  }
 0x131   : > { %1978 = vmatmul.mubr.bf16.gmra.mrb[36].mxu1 %v6375_v32  ;;  %2698 = vmatprep.subr.bf16.mxu1 %v6435_v19  ;;  %v6439_v32 = vld [vmem:[#allocation8 + $0x80] ss:$8 sps:$4 sm:$0xff]  }
 0x132   : > { %1985 = vmatprep.mubr.bf16.mxu1 %v6379_v33  ;;  %2699 = vmatpush1.bf16.msra.mxu1 %v6433_v20 }
 0x133   : > { %2700 = vmatprep.subr.bf16.mxu1 %v6438_v21  ;;  %v6454_v21 = vld [vmem:[#allocation8 + $0xd0] ss:$8 sps:$4 sm:$0xff]  }
 0x137   : > { %969 = vmatmul.mubr.bf16.gmra.mrb[44].mxu0 %v6278_v22  ;;  %v6436_v22 = vld [vmem:[#allocation8 + $0x70] ss:$8 sps:$4 sm:$0xff]  }
 0x138   : > { %976 = vmatprep.mubr.bf16.mxu0 %v6281_v23  ;;  %2701 = vmatpush1.bf16.msra.mxu1 %v6436_v22 }
 0x139   : > { %1986 = vmatmul.mubr.bf16.gmra.mrb[40].mxu1 %v6381_v36 }
 0x13a   : > { %1993 = vmatprep.mubr.bf16.mxu1 %v6385_v37  ;;  %v6444_v37 = vld [vmem:[#allocation8 + $0x94] ss:$8 sps:$4 sm:$0xff]  }
 0x13f   : > { %977 = vmatmul.mubr.bf16.gmra.mrb[48].mxu0 %v6284_v26  ;;  %v6390_v26 = vld [vmem:[%s7473_s13 + $0x168] ss:$16 sps:$4 sm:$0xff]  }
 0x140   : > { %984 = vmatprep.mubr.bf16.mxu0 %v6290_v27 }
 0x141   : > { %1994 = vmatmul.mubr.bf16.gmra.mrb[44].mxu1 %v6387_v40 }
 0x142   : > { %2001 = vmatprep.mubr.bf16.mxu1 %v6391_v41 }
 0x147   : > { %985 = vmatmul.mubr.bf16.gmra.mrb[52].mxu0 %v6293_v30  ;;  %v6441_v30 = vld [vmem:[#allocation8 + $0x84] ss:$8 sps:$4 sm:$0xff]  }
 0x148   : > { %992 = vmatprep.mubr.bf16.mxu0 %v6299_v31  ;;  %2702 = vmatprep.subr.bf16.mxu1 %v6441_v30 }
 0x149   : > { %2002 = vmatmul.mubr.bf16.gmra.mrb[48].mxu1 %v6393_v44 }
 0x14a   : > { %2009 = vmatprep.mubr.bf16.mxu1 %v6397_v45  ;;  %2703 = vmatpush1.bf16.msra.mxu1 %v6439_v32 }
 0x14b   : > { %2704 = vmatprep.subr.bf16.mxu1 %v6444_v37 }
 0x14f   : > { %993 = vmatmul.mubr.bf16.gmra.mrb[56].mxu0 %v6302_v34 }
 0x150   : > { %1000 = vmatprep.mubr.bf16.mxu0 %v6310_v35 }
 0x151   : > { %2010 = vmatmul.mubr.bf16.gmra.mrb[52].mxu1 %v6399_v48  ;;  %v6400_v48 = vld [vmem:[%s7473_s13 + $0x1ac] ss:$16 sps:$4 sm:$0xff]  }
 0x152   : > { %2017 = vmatprep.mubr.bf16.mxu1 %v6403_v49  ;;  %v6447_v49 = vld [vmem:[#allocation8 + $0xa4] ss:$8 sps:$4 sm:$0xff]  }
 0x157   : > { %1001 = vmatmul.mubr.bf16.gmra.mrb[60].mxu0 %v6313_v38  ;;  %v6442_v38 = vld [vmem:[#allocation8 + $0x90] ss:$8 sps:$4 sm:$0xff]  }
 0x158   : > { %2066 = vmatprep.mubr.bf16.mxu0 %v6324_v39  ;;  %2705 = vmatpush1.bf16.msra.mxu1 %v6442_v38 }
 0x159   : > { %2018 = vmatmul.mubr.bf16.gmra.mrb[56].mxu1 %v6405_v52  ;;  %2706 = vmatprep.subr.bf16.mxu1 %v6447_v49 }
 0x15a   : > { %2025 = vmatprep.mubr.bf16.mxu1 %v6409_v53 }
 0x15f   : > { %2067 = vmatmul.mubr.bf16.vlgmr.msra.gmra.mrb[64].mxu0 %v6322_v42 }
 0x160   : > { %2074 = vmatprep.mubr.bf16.mxu0 %v6328_v43  ;;  %v6396_v43 = vld [vmem:[%s7473_s13 + $0x188] ss:$16 sps:$4 sm:$0xff]  }
 0x161   : > { %2026 = vmatmul.mubr.bf16.gmra.mrb[60].mxu1 %v6411_v56 }
 0x167   : > { %2075 = vmatmul.mubr.bf16.gmra.mrb[68].mxu0 %v6330_v46 }
 0x168   : > { %2082 = vmatprep.mubr.bf16.mxu0 %v6334_v47 }
 0x16f   : > { %2083 = vmatmul.mubr.bf16.gmra.mrb[72].mxu0 %v6336_v50 }
 0x170   : > { %2090 = vmatprep.mubr.bf16.mxu0 %v6340_v51  ;;  %v6445_v51 = vld [vmem:[#allocation8 + $0xa0] ss:$8 sps:$4 sm:$0xff]  }
 0x171   : > { %2707 = vmatpush1.bf16.msra.mxu1 %v6445_v51  ;;  %v6462_v51 = vld [vmem:[#allocation8 + $0xf4] ss:$8 sps:$4 sm:$0xff]  }
 0x177   : > { %2091 = vmatmul.mubr.bf16.gmra.mrb[76].mxu0 %v6342_v54 }
 0x178   : > { %2098 = vmatprep.mubr.bf16.mxu0 %v6346_v55 }
 0x17f   : > { %2099 = vmatmul.mubr.bf16.gmra.mrb[80].mxu0 %v6348_v57 }
 0x180   : > { %2106 = vmatprep.mubr.bf16.mxu0 %v6352_v58 }
 0x187   : > { %2107 = vmatmul.mubr.bf16.gmra.mrb[84].mxu0 %v6354_v59 }
 0x188   : > { %2114 = vmatprep.mubr.bf16.mxu0 %v6358_v60  ;;  %v6450_v60 = vld [vmem:[#allocation8 + $0xb4] ss:$8 sps:$4 sm:$0xff]  }
 0x189   : > { %2708 = vmatprep.subr.bf16.mxu1 %v6450_v60 }
 0x18f   : > { %2115 = vmatmul.mubr.bf16.gmra.mrb[88].mxu0 %v6360_v61  ;;  %v6448_v61 = vld [vmem:[#allocation8 + $0xb0] ss:$8 sps:$4 sm:$0xff]  }
 0x190   : > { %2122 = vmatprep.mubr.bf16.mxu0 %v6364_v62  ;;  %2709 = vmatpush1.bf16.msra.mxu1 %v6448_v61 }
 0x191   : > { %2710 = vmatprep.subr.bf16.mxu1 %v6453_v8 }
 0x197   : > { %2123 = vmatmul.mubr.bf16.gmra.mrb[92].mxu0 %v6366_v63 }
 0x198   : > { %2130 = vmatprep.mubr.bf16.mxu0 %v6370_v0 }
 0x19f   : > { %2131 = vmatmul.mubr.bf16.gmra.mrb[96].mxu0 %v6372_v5 }
 0x1a0   : > { %2138 = vmatprep.mubr.bf16.mxu0 %v6376_v6 }
 0x1a7   : > { %2139 = vmatmul.mubr.bf16.gmra.mrb[100].mxu0 %v6378_v11  ;;  %v6451_v11 = vld [vmem:[#allocation8 + $0xc0] ss:$8 sps:$4 sm:$0xff]  }
 0x1a8   : > { %2146 = vmatprep.mubr.bf16.mxu0 %v6382_v12  ;;  %2711 = vmatpush1.bf16.msra.mxu1 %v6451_v11 }
 0x1af   : > { %2147 = vmatmul.mubr.bf16.gmra.mrb[104].mxu0 %v6384_v17 }
 0x1b0   : > { %2154 = vmatprep.mubr.bf16.mxu0 %v6388_v18  ;;  %v6456_v18 = vld [vmem:[#allocation8 + $0xd4] ss:$8 sps:$4 sm:$0xff]  }
 0x1b1   : > { %2712 = vmatprep.subr.bf16.mxu1 %v6456_v18 }
 0x1b2   : > { %v5538_v23 = vpop.f32.mrb[0].mxu0  ;;  %2713 = vmatpush1.bf16.msra.mxu1 %v6454_v21 }
 0x1b3   : > { %v5539_v25 = vpop.f32.mrb[1].mxu0 }
 0x1b4   : > { %v5540_v27 = vadd.f32 %v5539_v25, %v5538_v23  ;;  %v5541_v28 = vpop.f32.mrb[2].mxu0 }
 0x1b5   : > { %v5542_v31 = vpop.f32.mrb[3].mxu0 }
 0x1b6   : > { %v7582_v33 = vadd.f32 %v5540_v27, %v7577_v24  ;;  %v5543_v34 = vadd.f32 %v5542_v31, %v5541_v28  ;;  %v6408_v28 = vld [vmem:[%s7473_s13 + $0x1c8] ss:$16 sps:$4 sm:$0xff]  }
 0x1b7   : > { %2155 = vmatmul.mubr.bf16.gmra.mrb[108].mxu0 %v6390_v26 }
 0x1b8   : > { %v1041_v35 = vmul.f32 0.044715, %v7582_v33  ;;  %v7586_v36 = vadd.f32 %v5543_v34, %v7577_v24  ;;  %2162 = vmatprep.mubr.bf16.mxu0 %v6394_v29  ;;  %v6412_v34 = vld [vmem:[%s7473_s13 + $0x1ec] ss:$16 sps:$4 sm:$0xff]  }
 0x1ba   : > { %v1073_v39 = vmul.f32 %v1041_v35, %v7582_v33  ;;  %v1042_v40 = vmul.f32 0.044715, %v7586_v36  ;;  %v5544_v41 = vpop.f32.mrb[4].mxu0  ;;  %v6459_v35 = vld [vmem:[#allocation8 + $0xe4] ss:$8 sps:$4 sm:$0xff]  }
 0x1bb   : > { %v5545_v42 = vpop.f32.mrb[5].mxu0  ;;  %2714 = vmatprep.subr.bf16.mxu1 %v6459_v35 }
 0x1bc   : > { %v1105_v44 = vmul.f32 %v1073_v39, %v7582_v33  ;;  %v1074_v45 = vmul.f32 %v1042_v40, %v7586_v36  ;;  %v5546_v46 = vadd.f32 %v5545_v42, %v5544_v41  ;;  %v5547_v47 = vpop.f32.mrb[6].mxu0  ;;  %v6457_v39 = vld [vmem:[#allocation8 + $0xe0] ss:$8 sps:$4 sm:$0xff]  }
 0x1bd   : > { %v5548_v50 = vpop.f32.mrb[7].mxu0  ;;  %2715 = vmatpush1.bf16.msra.mxu1 %v6457_v39 }
 0x1be   : > { %v1137_v52 = vadd.f32 %v1105_v44, %v7582_v33  ;;  %v1106_v53 = vmul.f32 %v1074_v45, %v7586_v36  ;;  %v7597_v54 = vadd.f32 %v5546_v46, %v7577_v24  ;;  %v5549_v55 = vadd.f32 %v5548_v50, %v5547_v47  ;;  %2716 = vmatprep.subr.bf16.mxu1 %v6462_v51 }
 0x1bf   : > { %2163 = vmatmul.mubr.bf16.gmra.mrb[112].mxu0 %v6396_v43  ;;  %v1009_v46 = vmul.f32 0.5, %v7582_v33  ;;  %v1010_v47 = vmul.f32 0.5, %v7586_v36 }
 0x1c0   : > { %v1169_v56 = vmul.f32 0.7978846, %v1137_v52  ;;  %v1138_v57 = vadd.f32 %v1106_v53, %v7586_v36  ;;  %v1043_v58 = vmul.f32 0.044715, %v7597_v54  ;;  %v7602_v59 = vadd.f32 %v5549_v55, %v7577_v24  ;;  %2170 = vmatprep.mubr.bf16.mxu0 %v6400_v48  ;;  %v6460_v55 = vld [vmem:[#allocation8 + $0xf0] ss:$8 sps:$4 sm:$0xff]  }
 0x1c1   : > { %2717 = vmatpush1.bf16.msra.mxu1 %v6460_v55 }
 0x1c2   : > { %6495 = vtanh.f32 %v1169_v56  ;;  %v1170_v62 = vmul.f32 0.7978846, %v1138_v57  ;;  %v1075_v63 = vmul.f32 %v1043_v58, %v7597_v54  ;;  %v1044_v0 = vmul.f32 0.044715, %v7602_v59  ;;  %v5550_v1 = vpop.f32.mrb[8].mxu0 }
 0x1c3   : > { %v5551_v2 = vpop.f32.mrb[9].mxu0 }
 0x1c4   : > { %6497 = vtanh.f32 %v1170_v62  ;;  %v1076_v4 = vmul.f32 %v1044_v0, %v7602_v59  ;;  %v5552_v5 = vadd.f32 %v5551_v2, %v5550_v1  ;;  %v5553_v6 = vpop.f32.mrb[10].mxu0  ;;  %v1107_v9 = vmul.f32 %v1075_v63, %v7597_v54  ;;  %v6414_v62 = vld [vmem:[%s7473_s13 + $0x1e8] ss:$16 sps:$4 sm:$0xff]  }
 0x1c5   : > { %v5554_v10 = vpop.f32.mrb[11].mxu0 }
 0x1c6   : > { %v7611_v12 = vadd.f32 %v5552_v5, %v7577_v24  ;;  %v5555_v13 = vadd.f32 %v5554_v10, %v5553_v6  ;;  %v1108_v14 = vmul.f32 %v1076_v4, %v7602_v59  ;;  %v1139_v15 = vadd.f32 %v1107_v9, %v7597_v54 }
 0x1c7   : > { %2171 = vmatmul.mubr.bf16.gmra.mrb[116].mxu0 %v6402_v3 }
 0x1c8   : > { %v1045_v16 = vmul.f32 0.044715, %v7611_v12  ;;  %v7617_v17 = vadd.f32 %v5555_v13, %v7577_v24  ;;  %2178 = vmatprep.mubr.bf16.mxu0 %v6406_v7  ;;  %v1140_v19 = vadd.f32 %v1108_v14, %v7602_v59  ;;  %v1171_v20 = vmul.f32 0.7978846, %v1139_v15  ;;  %v5650_v13 = vpop.f32.mrb[0].mxu1 }
 0x1c9   : > { %v1011_v14 = vmul.f32 0.5, %v7597_v54  ;;  %v1012_v15 = vmul.f32 0.5, %v7602_v59  ;;  %v1013_v51 = vmul.f32 0.5, %v7611_v12 }
 0x1ca   : > { %v1077_v22 = vmul.f32 %v1045_v16, %v7611_v12  ;;  %v1046_v23 = vmul.f32 0.044715, %v7617_v17  ;;  %v5556_v25 = vpop.f32.mrb[12].mxu0  ;;  %v1172_v26 = vmul.f32 0.7978846, %v1140_v19  ;;  %6499 = vtanh.f32 %v1171_v20  ;;  %v5651_v20 = vpop.f32.mrb[1].mxu1 }
 0x1cb   : > { %v5557_v27 = vpop.f32.mrb[13].mxu0 }
 0x1cc   : > { %v6496_v29 = vpop.eup %6495  ;;  %v1078_v30 = vmul.f32 %v1046_v23, %v7617_v17  ;;  %v5558_v31 = vadd.f32 %v5557_v27, %v5556_v25  ;;  %v5559_v32 = vpop.f32.mrb[14].mxu0  ;;  %6501 = vtanh.f32 %v1172_v26  ;;  %v1109_v37 = vmul.f32 %v1077_v22, %v7611_v12 }
 0x1cd   : > { %v5560_v38 = vpop.f32.mrb[15].mxu0  ;;  %v1233_v40 = vadd.f32 1.0, %v6496_v29  ;;  %v7661_v23 = vadd.f32 %v5651_v20, %v5650_v13  ;;  %v5653_v25 = vpop.f32.mrb[2].mxu1 }
 0x1ce   : > { %v6498_v41 = vpop.eup %6497  ;;  %v7627_v42 = vadd.f32 %v5558_v31, %v7577_v24  ;;  %v5561_v43 = vadd.f32 %v5560_v38, %v5559_v32  ;;  %v1110_v44 = vmul.f32 %v1078_v30, %v7617_v17  ;;  %v1141_v45 = vadd.f32 %v1109_v37, %v7611_v12  ;;  %v5654_v29 = vpop.f32.mrb[3].mxu1 }
 0x1cf   : > { %2179 = vmatmul.mubr.bf16.gmra.mrb[120].mxu0 %v6408_v28  ;;  %v1234_v48 = vadd.f32 1.0, %v6498_v41  ;;  %v7638_v56 = vmul.f32 %v1233_v40, %v1009_v46  ;;  %v7669_v32 = vadd.f32 %v5654_v29, %v5653_v25 }
 0x1d0   : > { %v1047_v49 = vmul.f32 0.044715, %v7627_v42  ;;  %v7635_v50 = vadd.f32 %v5561_v43, %v7577_v24  ;;  %2186 = vmatprep.mubr.bf16.mxu0 %v6412_v34  ;;  %v1142_v52 = vadd.f32 %v1110_v44, %v7617_v17  ;;  %v1173_v53 = vmul.f32 0.7978846, %v1141_v45 }
 0x1d1   : > { %v7640_v33 = vmul.f32 %v1234_v48, %v1010_v47 }
 0x1d2   : > { %v1079_v36 = vmul.f32 %v1047_v49, %v7627_v42  ;;  %v1048_v57 = vmul.f32 0.044715, %v7635_v50  ;;  %v5562_v58 = vpop.f32.mrb[16].mxu0  ;;  %v1174_v60 = vmul.f32 0.7978846, %v1142_v52  ;;  %6503 = vtanh.f32 %v1173_v53  ;;  %v5656_v49 = vpop.f32.mrb[4].mxu1 }
 0x1d3   : > { %v5563_v61 = vpop.f32.mrb[17].mxu0  ;;  %v1014_v52 = vmul.f32 0.5, %v7617_v17 }
 0x1d4   : > { %v6500_v0 = vpop.eup %6499  ;;  %v1080_v1 = vmul.f32 %v1048_v57, %v7635_v50  ;;  %v5564_v2 = vadd.f32 %v5563_v61, %v5562_v58  ;;  %v5565_v3 = vpop.f32.mrb[18].mxu0  ;;  %6505 = vtanh.f32 %v1174_v60  ;;  %v1111_v4 = vmul.f32 %v1079_v36, %v7627_v42 }
 0x1d5   : > { %v5566_v5 = vpop.f32.mrb[19].mxu0  ;;  %v1235_v6 = vadd.f32 1.0, %v6500_v0  ;;  %v5657_v57 = vpop.f32.mrb[5].mxu1 }
 0x1d6   : > { %v6502_v7 = vpop.eup %6501  ;;  %v7650_v8 = vadd.f32 %v5564_v2, %v7577_v24  ;;  %v5567_v9 = vadd.f32 %v5566_v5, %v5565_v3  ;;  %v1112_v10 = vmul.f32 %v1080_v1, %v7635_v50  ;;  %v1143_v11 = vadd.f32 %v1111_v4, %v7627_v42 }
 0x1d7   : > { %2187 = vmatmul.mubr.bf16.gmra.mrb[124].mxu0 %v6414_v62  ;;  %v1236_v16 = vadd.f32 1.0, %v6502_v7  ;;  %v7663_v26 = vmul.f32 %v1235_v6, %v1011_v14  ;;  %v7687_v61 = vadd.f32 %v5657_v57, %v5656_v49  ;;  %v5659_v62 = vpop.f32.mrb[6].mxu1 }
 0x1d8   : > { %v1049_v18 = vmul.f32 0.044715, %v7650_v8  ;;  %v7658_v19 = vadd.f32 %v5567_v9, %v7577_v24  ;;  %v1144_v21 = vadd.f32 %v1112_v10, %v7635_v50  ;;  %v1175_v22 = vmul.f32 0.7978846, %v1143_v11  ;;  %v5660_v3 = vpop.f32.mrb[7].mxu1 }
 0x1d9   : > { %v7665_v27 = vmul.f32 %v1236_v16, %v1012_v15  ;;  %v7695_v6 = vadd.f32 %v5660_v3, %v5659_v62 }
 0x1da   : > { %v1081_v54 = vmul.f32 %v1049_v18, %v7650_v8  ;;  %v1050_v59 = vmul.f32 0.044715, %v7658_v19  ;;  %v5568_v28 = vpop.f32.mrb[20].mxu0  ;;  %v1176_v30 = vmul.f32 0.7978846, %v1144_v21  ;;  %6507 = vtanh.f32 %v1175_v22 }
 0x1db   : > { %v5569_v31 = vpop.f32.mrb[21].mxu0 }
 0x1dc   : > { %v6504_v35 = vpop.eup %6503  ;;  %v1082_v37 = vmul.f32 %v1050_v59, %v7658_v19  ;;  %v5570_v38 = vadd.f32 %v5569_v31, %v5568_v28  ;;  %v5571_v39 = vpop.f32.mrb[22].mxu0  ;;  %6509 = vtanh.f32 %v1176_v30  ;;  %v1113_v40 = vmul.f32 %v1081_v54, %v7650_v8 }
 0x1dd   : > { %v5572_v41 = vpop.f32.mrb[23].mxu0  ;;  %v1237_v43 = vadd.f32 1.0, %v6504_v35  ;;  %v5662_v54 = vpop.f32.mrb[8].mxu1  ;;  %v1015_v59 = vmul.f32 0.5, %v7627_v42  ;;  %v1016_v28 = vmul.f32 0.5, %v7635_v50 }
 0x1de   : > { %v6506_v44 = vpop.eup %6505  ;;  %v7676_v45 = vadd.f32 %v5570_v38, %v7577_v24  ;;  %v5573_v46 = vadd.f32 %v5572_v41, %v5571_v39  ;;  %v1114_v47 = vmul.f32 %v1082_v37, %v7658_v19  ;;  %v1145_v48 = vadd.f32 %v1113_v40, %v7650_v8  ;;  %v5663_v35 = vpop.f32.mrb[9].mxu1 }
 0x1df   : > { %v1238_v53 = vadd.f32 1.0, %v6506_v44  ;;  %v7689_v0 = vmul.f32 %v1237_v43, %v1013_v51  ;;  %v7713_v39 = vadd.f32 %v5663_v35, %v5662_v54  ;;  %v5665_v40 = vpop.f32.mrb[10].mxu1 }
 0x1e0   : > { %v1051_v55 = vmul.f32 0.044715, %v7676_v45  ;;  %v7684_v36 = vadd.f32 %v5573_v46, %v7577_v24  ;;  %v1146_v58 = vadd.f32 %v1114_v47, %v7658_v19  ;;  %v1177_v60 = vmul.f32 0.7978846, %v1145_v48  ;;  %v5666_v46 = vpop.f32.mrb[11].mxu1 }
 0x1e1   : > { %v7691_v1 = vmul.f32 %v1238_v53, %v1014_v52  ;;  %v7721_v49 = vadd.f32 %v5666_v46, %v5665_v40 }
 0x1e2   : > { %v1083_v12 = vmul.f32 %v1051_v55, %v7676_v45  ;;  %v1052_v17 = vmul.f32 0.044715, %v7684_v36  ;;  %v5574_v2 = vpop.f32.mrb[24].mxu0  ;;  %v1178_v4 = vmul.f32 0.7978846, %v1146_v58  ;;  %6511 = vtanh.f32 %v1177_v60 }
 0x1e3   : > { %v5575_v5 = vpop.f32.mrb[25].mxu0 }
 0x1e4   : > { %v6508_v9 = vpop.eup %6507  ;;  %v1084_v10 = vmul.f32 %v1052_v17, %v7684_v36  ;;  %v5576_v11 = vadd.f32 %v5575_v5, %v5574_v2  ;;  %v5577_v13 = vpop.f32.mrb[26].mxu0  ;;  %6513 = vtanh.f32 %v1178_v4  ;;  %v1115_v14 = vmul.f32 %v1083_v12, %v7676_v45 }
 0x1e5   : > { %v5578_v15 = vpop.f32.mrb[27].mxu0  ;;  %v1239_v16 = vadd.f32 1.0, %v6508_v9  ;;  %v5668_v5 = vpop.f32.mrb[12].mxu1  ;;  %v1017_v9 = vmul.f32 0.5, %v7650_v8 }
 0x1e6   : > { %v6510_v18 = vpop.eup %6509  ;;  %v7702_v20 = vadd.f32 %v5576_v11, %v7577_v24  ;;  %v5579_v21 = vadd.f32 %v5578_v15, %v5577_v13  ;;  %v1116_v22 = vmul.f32 %v1084_v10, %v7684_v36  ;;  %v1147_v25 = vadd.f32 %v1115_v14, %v7676_v45  ;;  %v5669_v15 = vpop.f32.mrb[13].mxu1 }
 0x1e7   : > { %v1240_v29 = vadd.f32 1.0, %v6510_v18  ;;  %v7715_v41 = vmul.f32 %v1239_v16, %v1015_v59  ;;  %v1018_v10 = vmul.f32 0.5, %v7658_v19 }
 0x1e8   : > { %v1053_v30 = vmul.f32 0.044715, %v7702_v20  ;;  %v7710_v31 = vadd.f32 %v5579_v21, %v7577_v24  ;;  %v1148_v37 = vadd.f32 %v1116_v22, %v7684_v36  ;;  %v1179_v38 = vmul.f32 0.7978846, %v1147_v25  ;;  %v5671_v22 = vpop.f32.mrb[14].mxu1 }
 0x1e9   : > { %v7717_v43 = vmul.f32 %v1240_v29, %v1016_v28  ;;  %v7739_v21 = vadd.f32 %v5669_v15, %v5668_v5  ;;  %v5672_v28 = vpop.f32.mrb[15].mxu1 }
 0x1ea   : > { %v1085_v42 = vmul.f32 %v1053_v30, %v7702_v20  ;;  %v1054_v50 = vmul.f32 0.044715, %v7710_v31  ;;  %v5580_v44 = vpop.f32.mrb[28].mxu0  ;;  %v1180_v47 = vmul.f32 0.7978846, %v1148_v37  ;;  %6515 = vtanh.f32 %v1179_v38 }
 0x1eb   : > { %v5581_v48 = vpop.f32.mrb[29].mxu0  ;;  %v7747_v35 = vadd.f32 %v5672_v28, %v5671_v22 }
 0x1ec   : > { %v6512_v52 = vpop.eup %6511  ;;  %v1086_v53 = vmul.f32 %v1054_v50, %v7710_v31  ;;  %v5582_v55 = vadd.f32 %v5581_v48, %v5580_v44  ;;  %v5583_v57 = vpop.f32.mrb[30].mxu0  ;;  %6517 = vtanh.f32 %v1180_v47  ;;  %v1117_v58 = vmul.f32 %v1085_v42, %v7702_v20 }
 0x1ed   : > { %v5584_v60 = vpop.f32.mrb[31].mxu0  ;;  %v1241_v62 = vadd.f32 1.0, %v6512_v52 }
 0x1ee   : > { %v6514_v12 = vpop.eup %6513  ;;  %v7728_v17 = vadd.f32 %v5582_v55, %v7577_v24  ;;  %v5585_v2 = vadd.f32 %v5584_v60, %v5583_v57  ;;  %v1118_v3 = vmul.f32 %v1086_v53, %v7710_v31  ;;  %v1149_v4 = vadd.f32 %v1117_v58, %v7702_v20  ;;  %v5674_v58 = vpop.f32.mrb[16].mxu1 }
 0x1ef   : > { %v1242_v11 = vadd.f32 1.0, %v6514_v12  ;;  %v7741_v25 = vmul.f32 %v1241_v62, %v1017_v9  ;;  %v1019_v60 = vmul.f32 0.5, %v7676_v45  ;;  %v1020_v62 = vmul.f32 0.5, %v7684_v36 }
 0x1f0   : > { %v1055_v13 = vmul.f32 0.044715, %v7728_v17  ;;  %v7736_v14 = vadd.f32 %v5585_v2, %v7577_v24  ;;  %v1150_v16 = vadd.f32 %v1118_v3, %v7710_v31  ;;  %v1181_v18 = vmul.f32 0.7978846, %v1149_v4  ;;  %v5675_v4 = vpop.f32.mrb[17].mxu1 }
 0x1f1   : > { %v7743_v54 = vmul.f32 %v1242_v11, %v1018_v10  ;;  %v7765_v10 = vadd.f32 %v5675_v4, %v5674_v58  ;;  %v5677_v11 = vpop.f32.mrb[18].mxu1  ;;  %v1022_v58 = vmul.f32 0.5, %v7710_v31 }
 0x1f2   : > { %v1087_v8 = vmul.f32 %v1055_v13, %v7728_v17  ;;  %v1056_v19 = vmul.f32 0.044715, %v7736_v14  ;;  %v5586_v59 = vpop.f32.mrb[32].mxu0  ;;  %v1182_v29 = vmul.f32 0.7978846, %v1150_v16  ;;  %6519 = vtanh.f32 %v1181_v18  ;;  %v5678_v18 = vpop.f32.mrb[19].mxu1 }
 0x1f3   : > { %v5587_v30 = vpop.f32.mrb[33].mxu0 }
 0x1f4   : > { %v6516_v38 = vpop.eup %6515  ;;  %v1088_v40 = vmul.f32 %v1056_v19, %v7736_v14  ;;  %v5588_v42 = vadd.f32 %v5587_v30, %v5586_v59  ;;  %v5589_v50 = vpop.f32.mrb[34].mxu0  ;;  %6521 = vtanh.f32 %v1182_v29  ;;  %v1119_v44 = vmul.f32 %v1087_v8, %v7728_v17 }
 0x1f5   : > { %v5590_v46 = vpop.f32.mrb[35].mxu0  ;;  %v1243_v47 = vadd.f32 1.0, %v6516_v38  ;;  %v7773_v19 = vadd.f32 %v5678_v18, %v5677_v11 }
 0x1f6   : > { %v6518_v48 = vpop.eup %6517  ;;  %v7754_v52 = vadd.f32 %v5588_v42, %v7577_v24  ;;  %v5591_v53 = vadd.f32 %v5590_v46, %v5589_v50  ;;  %v1120_v55 = vmul.f32 %v1088_v40, %v7736_v14  ;;  %v1151_v57 = vadd.f32 %v1119_v44, %v7728_v17 }
 0x1f7   : > { %v1244_v12 = vadd.f32 1.0, %v6518_v48  ;;  %v7767_v13 = vmul.f32 %v1243_v47, %v1019_v60 }
 0x1f8   : > { %v1057_v2 = vmul.f32 0.044715, %v7754_v52  ;;  %v7762_v3 = vadd.f32 %v5591_v53, %v7577_v24  ;;  %v1152_v5 = vadd.f32 %v1120_v55, %v7736_v14  ;;  %v1183_v9 = vmul.f32 0.7978846, %v1151_v57  ;;  %v5680_v55 = vpop.f32.mrb[20].mxu1 }
 0x1f9   : > { %v7769_v15 = vmul.f32 %v1244_v12, %v1020_v62  ;;  %v1021_v57 = vmul.f32 0.5, %v7702_v20 }
 0x1fa   : > { %v1089_v45 = vmul.f32 %v1057_v2, %v7754_v52  ;;  %v1058_v36 = vmul.f32 0.044715, %v7762_v3  ;;  %v5592_v16 = vpop.f32.mrb[36].mxu0  ;;  %v1184_v22 = vmul.f32 0.7978846, %v1152_v5  ;;  %6523 = vtanh.f32 %v1183_v9  ;;  %v5681_v2 = vpop.f32.mrb[21].mxu1 }
 0x1fb   : > { %v5593_v8 = vpop.f32.mrb[37].mxu0  ;;  %v7791_v9 = vadd.f32 %v5681_v2, %v5680_v55  ;;  %v5683_v11 = vpop.f32.mrb[22].mxu1  ;;  %v1024_v2 = vmul.f32 0.5, %v7736_v14 }
 0x1fc   : > { %v6520_v28 = vpop.eup %6519  ;;  %v1090_v29 = vmul.f32 %v1058_v36, %v7762_v3  ;;  %v5594_v30 = vadd.f32 %v5593_v8, %v5592_v16  ;;  %v5595_v38 = vpop.f32.mrb[38].mxu0  ;;  %6525 = vtanh.f32 %v1184_v22  ;;  %v1121_v40 = vmul.f32 %v1089_v45, %v7754_v52 }
 0x1fd   : > { %v5596_v42 = vpop.f32.mrb[39].mxu0  ;;  %v1245_v50 = vadd.f32 1.0, %v6520_v28  ;;  %v5684_v18 = vpop.f32.mrb[23].mxu1 }
 0x1fe   : > { %v6522_v44 = vpop.eup %6521  ;;  %v7780_v46 = vadd.f32 %v5594_v30, %v7577_v24  ;;  %v5597_v47 = vadd.f32 %v5596_v42, %v5595_v38  ;;  %v1122_v48 = vmul.f32 %v1090_v29, %v7762_v3  ;;  %v1153_v53 = vadd.f32 %v1121_v40, %v7754_v52 }
 0x1ff   : > { %v1246_v60 = vadd.f32 1.0, %v6522_v44  ;;  %v7793_v45 = vmul.f32 %v1245_v50, %v1021_v57  ;;  %v7799_v28 = vadd.f32 %v5684_v18, %v5683_v11 }
 0x200   : > { %v1059_v62 = vmul.f32 0.044715, %v7780_v46  ;;  %v7788_v12 = vadd.f32 %v5597_v47, %v7577_v24  ;;  %v1154_v4 = vadd.f32 %v1122_v48, %v7762_v3  ;;  %v1185_v5 = vmul.f32 0.7978846, %v1153_v53 }
 0x201   : > { %v7795_v36 = vmul.f32 %v1246_v60, %v1022_v58  ;;  %v5686_v60 = vpop.f32.mrb[24].mxu1  ;;  %v1027_v37 = vmul.f32 0.5, %v7780_v46 }
 0x202   : > { %v1091_v20 = vmul.f32 %v1059_v62, %v7780_v46  ;;  %v1060_v31 = vmul.f32 0.044715, %v7788_v12  ;;  %v5598_v16 = vpop.f32.mrb[40].mxu0  ;;  %v1186_v22 = vmul.f32 0.7978846, %v1154_v4  ;;  %6527 = vtanh.f32 %v1185_v5 }
 0x203   : > { %v5599_v8 = vpop.f32.mrb[41].mxu0  ;;  %v1023_v62 = vmul.f32 0.5, %v7728_v17 }
 0x204   : > { %v6524_v30 = vpop.eup %6523  ;;  %v1092_v38 = vmul.f32 %v1060_v31, %v7788_v12  ;;  %v5600_v40 = vadd.f32 %v5599_v8, %v5598_v16  ;;  %v5601_v42 = vpop.f32.mrb[42].mxu0  ;;  %6529 = vtanh.f32 %v1186_v22  ;;  %v1123_v50 = vmul.f32 %v1091_v20, %v7780_v46 }
 0x205   : > { %v5602_v44 = vpop.f32.mrb[43].mxu0  ;;  %v1247_v47 = vadd.f32 1.0, %v6524_v30  ;;  %v5687_v20 = vpop.f32.mrb[25].mxu1 }
 0x206   : > { %v6526_v48 = vpop.eup %6525  ;;  %v7806_v53 = vadd.f32 %v5600_v40, %v7577_v24  ;;  %v5603_v55 = vadd.f32 %v5602_v44, %v5601_v42  ;;  %v1124_v57 = vmul.f32 %v1092_v38, %v7788_v12  ;;  %v1155_v58 = vadd.f32 %v1123_v50, %v7780_v46  ;;  %v5689_v22 = vpop.f32.mrb[26].mxu1 }
 0x207   : > { %v1248_v4 = vadd.f32 1.0, %v6526_v48  ;;  %v7817_v18 = vadd.f32 %v5687_v20, %v5686_v60  ;;  %v7819_v8 = vmul.f32 %v1247_v47, %v1023_v62  ;;  %v5690_v40 = vpop.f32.mrb[27].mxu1 }
 0x208   : > { %v1061_v5 = vmul.f32 0.044715, %v7806_v53  ;;  %v7814_v11 = vadd.f32 %v5603_v55, %v7577_v24  ;;  %v1156_v31 = vadd.f32 %v1124_v57, %v7788_v12  ;;  %v1187_v16 = vmul.f32 0.7978846, %v1155_v58 }
 0x209   : > { %9634 = vst [vmem:[#allocation17_spill] sm:$0xff] %v7819_v8  ;;  %v7821_v30 = vmul.f32 %v1248_v4, %v1024_v2  ;;  %v7825_v44 = vadd.f32 %v5690_v40, %v5689_v22  ;;  %v5692_v22 = vpop.f32.mrb[28].mxu1  ;;  %v1025_v40 = vmul.f32 0.5, %v7754_v52  ;;  %v1029_v63 = vmul.f32 0.5, %v7806_v53 }
 0x20a   : > { %v1093_v17 = vmul.f32 %v1061_v5, %v7806_v53  ;;  %v1062_v14 = vmul.f32 0.044715, %v7814_v11  ;;  %v5604_v38 = vpop.f32.mrb[44].mxu0  ;;  %v1188_v42 = vmul.f32 0.7978846, %v1156_v31  ;;  %6531 = vtanh.f32 %v1187_v16 }
 0x20b   : > { %9635 = vst [vmem:[#allocation18_spill] sm:$0xff] %v7821_v30  ;;  %v5605_v50 = vpop.f32.mrb[45].mxu0 }
 0x20c   : > { %v6528_v55 = vpop.eup %6527  ;;  %v1094_v47 = vmul.f32 %v1062_v14, %v7814_v11  ;;  %v5606_v57 = vadd.f32 %v5605_v50, %v5604_v38  ;;  %v5607_v58 = vpop.f32.mrb[46].mxu0  ;;  %6533 = vtanh.f32 %v1188_v42  ;;  %v1125_v60 = vmul.f32 %v1093_v17, %v7806_v53 }
 0x20d   : > { %v5608_v62 = vpop.f32.mrb[47].mxu0  ;;  %v1249_v2 = vadd.f32 1.0, %v6528_v55  ;;  %v1026_v14 = vmul.f32 0.5, %v7762_v3  ;;  %v5693_v50 = vpop.f32.mrb[29].mxu1 }
 0x20e   : > { %v6530_v4 = vpop.eup %6529  ;;  %v7832_v5 = vadd.f32 %v5606_v57, %v7577_v24  ;;  %v5609_v20 = vadd.f32 %v5608_v62, %v5607_v58  ;;  %v1126_v31 = vmul.f32 %v1094_v47, %v7814_v11  ;;  %v1157_v16 = vadd.f32 %v1125_v60, %v7806_v53  ;;  %v5695_v47 = vpop.f32.mrb[30].mxu1 }
 0x20f   : > { %v1250_v38 = vadd.f32 1.0, %v6530_v4  ;;  %v7843_v58 = vadd.f32 %v5693_v50, %v5692_v22  ;;  %v7845_v62 = vmul.f32 %v1249_v2, %v1025_v40  ;;  %v5696_v48 = vpop.f32.mrb[31].mxu1 }
 0x210   : > { %v1063_v42 = vmul.f32 0.044715, %v7832_v5  ;;  %v7840_v17 = vadd.f32 %v5609_v20, %v7577_v24  ;;  %v1158_v55 = vadd.f32 %v1126_v31, %v7814_v11  ;;  %v1189_v57 = vmul.f32 0.7978846, %v1157_v16  ;;  %v5698_v31 = vpop.f32.mrb[32].mxu1 }
 0x211   : > { %9636 = vst [vmem:[#allocation19_spill] sm:$0xff] %v7845_v62  ;;  %v7847_v60 = vmul.f32 %v1250_v38, %v1026_v14  ;;  %v7851_v59 = vadd.f32 %v5696_v48, %v5695_v47 }
 0x212   : > { %v1095_v52 = vmul.f32 %v1063_v42, %v7832_v5  ;;  %v1064_v3 = vmul.f32 0.044715, %v7840_v17  ;;  %v5610_v4 = vpop.f32.mrb[48].mxu0  ;;  %v1190_v29 = vmul.f32 0.7978846, %v1158_v55  ;;  %6535 = vtanh.f32 %v1189_v57 }
 0x213   : > { %9637 = vst [vmem:[#allocation20_spill] sm:$0xff] %v7847_v60  ;;  %v5611_v20 = vpop.f32.mrb[49].mxu0 }
 0x214   : > { %v6532_v16 = vpop.eup %6531  ;;  %v1096_v2 = vmul.f32 %v1064_v3, %v7840_v17  ;;  %v5612_v22 = vadd.f32 %v5611_v20, %v5610_v4  ;;  %v5613_v40 = vpop.f32.mrb[50].mxu0  ;;  %6537 = vtanh.f32 %v1190_v29  ;;  %v1127_v14 = vmul.f32 %v1095_v52, %v7832_v5 }
 0x215   : > { %v5614_v38 = vpop.f32.mrb[51].mxu0  ;;  %v1251_v42 = vadd.f32 1.0, %v6532_v16  ;;  %v1028_v3 = vmul.f32 0.5, %v7788_v12  ;;  %v5699_v20 = vpop.f32.mrb[33].mxu1 }
 0x216   : > { %v6534_v50 = vpop.eup %6533  ;;  %v7858_v55 = vadd.f32 %v5612_v22, %v7577_v24  ;;  %v5615_v57 = vadd.f32 %v5614_v38, %v5613_v40  ;;  %v1128_v48 = vmul.f32 %v1096_v2, %v7840_v17  ;;  %v1159_v47 = vadd.f32 %v1127_v14, %v7832_v5  ;;  %v5701_v2 = vpop.f32.mrb[34].mxu1 }
 0x217   : > { %v1252_v4 = vadd.f32 1.0, %v6534_v50  ;;  %v7869_v40 = vadd.f32 %v5699_v20, %v5698_v31  ;;  %v7871_v38 = vmul.f32 %v1251_v42, %v1027_v37  ;;  %v5702_v51 = vpop.f32.mrb[35].mxu1 }
 0x218   : > { %v1065_v29 = vmul.f32 0.044715, %v7858_v55  ;;  %v7866_v52 = vadd.f32 %v5615_v57, %v7577_v24  ;;  %v1160_v16 = vadd.f32 %v1128_v48, %v7840_v17  ;;  %v1191_v22 = vmul.f32 0.7978846, %v1159_v47  ;;  %v5704_v31 = vpop.f32.mrb[36].mxu1 }
 0x219   : > { %9638 = vst [vmem:[#allocation21_spill] sm:$0xff] %v7871_v38  ;;  %v7873_v14 = vmul.f32 %v1252_v4, %v1028_v3  ;;  %v7877_v34 = vadd.f32 %v5702_v51, %v5701_v2 }
 0x21a   : > { %v1097_v46 = vmul.f32 %v1065_v29, %v7858_v55  ;;  %v1066_v12 = vmul.f32 0.044715, %v7866_v52  ;;  %v5616_v50 = vpop.f32.mrb[52].mxu0  ;;  %v1192_v7 = vmul.f32 0.7978846, %v1160_v16  ;;  %6539 = vtanh.f32 %v1191_v22 }
 0x21b   : > { %9639 = vst [vmem:[#allocation22_spill] sm:$0xff] %v7873_v14  ;;  %v5617_v57 = vpop.f32.mrb[53].mxu0 }
 0x21c   : > { %v6536_v48 = vpop.eup %6535  ;;  %v1098_v37 = vmul.f32 %v1066_v12, %v7866_v52  ;;  %v5618_v42 = vadd.f32 %v5617_v57, %v5616_v50  ;;  %v5619_v47 = vpop.f32.mrb[54].mxu0  ;;  %6541 = vtanh.f32 %v1192_v7  ;;  %v1129_v3 = vmul.f32 %v1097_v46, %v7858_v55 }
 0x21d   : > { %v5620_v4 = vpop.f32.mrb[55].mxu0  ;;  %v1253_v29 = vadd.f32 1.0, %v6536_v48  ;;  %v1030_v12 = vmul.f32 0.5, %v7814_v11  ;;  %v5705_v57 = vpop.f32.mrb[37].mxu1 }
 0x21e   : > { %v6538_v20 = vpop.eup %6537  ;;  %v7884_v16 = vadd.f32 %v5618_v42, %v7577_v24  ;;  %v5621_v22 = vadd.f32 %v5620_v4, %v5619_v47  ;;  %v1130_v51 = vmul.f32 %v1098_v37, %v7866_v52  ;;  %v1161_v2 = vadd.f32 %v1129_v3, %v7858_v55  ;;  %v5707_v37 = vpop.f32.mrb[38].mxu1 }
 0x21f   : > { %v1254_v50 = vadd.f32 1.0, %v6538_v20  ;;  %v7895_v47 = vadd.f32 %v5705_v57, %v5704_v31  ;;  %v7897_v4 = vmul.f32 %v1253_v29, %v1029_v63  ;;  %v5708_v38 = vpop.f32.mrb[39].mxu1 }
 0x220   : > { %v1067_v7 = vmul.f32 0.044715, %v7884_v16  ;;  %v7892_v46 = vadd.f32 %v5621_v22, %v7577_v24  ;;  %v1162_v48 = vadd.f32 %v1130_v51, %v7866_v52  ;;  %v1193_v42 = vmul.f32 0.7978846, %v1161_v2  ;;  %v5710_v31 = vpop.f32.mrb[40].mxu1 }
 0x221   : > { %9640 = vst [vmem:[#allocation23_spill] sm:$0xff] %v7897_v4  ;;  %v7899_v3 = vmul.f32 %v1254_v50, %v1030_v12  ;;  %v7903_v62 = vadd.f32 %v5708_v38, %v5707_v37  ;;  %v1031_v4 = vmul.f32 0.5, %v7832_v5 }
 0x222   : > { %v1099_v53 = vmul.f32 %v1067_v7, %v7884_v16  ;;  %v1068_v11 = vmul.f32 0.044715, %v7892_v46  ;;  %v5622_v20 = vpop.f32.mrb[56].mxu0  ;;  %v1194_v14 = vmul.f32 0.7978846, %v1162_v48  ;;  %6543 = vtanh.f32 %v1193_v42 }
 0x223   : > { %9641 = vst [vmem:[#allocation24_spill] sm:$0xff] %v7899_v3  ;;  %v5623_v22 = vpop.f32.mrb[57].mxu0 }
 0x224   : > { %v6540_v51 = vpop.eup %6539  ;;  %v1100_v63 = vmul.f32 %v1068_v11, %v7892_v46  ;;  %v5624_v29 = vadd.f32 %v5623_v22, %v5622_v20  ;;  %v5625_v2 = vpop.f32.mrb[58].mxu0  ;;  %6545 = vtanh.f32 %v1194_v14  ;;  %v1131_v12 = vmul.f32 %v1099_v53, %v7884_v16 }
 0x225   : > { %v5626_v50 = vpop.f32.mrb[59].mxu0  ;;  %v1255_v7 = vadd.f32 1.0, %v6540_v51  ;;  %v1032_v11 = vmul.f32 0.5, %v7840_v17  ;;  %v5711_v22 = vpop.f32.mrb[41].mxu1 }
 0x226   : > { %v6542_v57 = vpop.eup %6541  ;;  %v7910_v48 = vadd.f32 %v5624_v29, %v7577_v24  ;;  %v5627_v42 = vadd.f32 %v5626_v50, %v5625_v2  ;;  %v1132_v38 = vmul.f32 %v1100_v63, %v7892_v46  ;;  %v1163_v37 = vadd.f32 %v1131_v12, %v7884_v16  ;;  %v5713_v63 = vpop.f32.mrb[42].mxu1 }
 0x227   : > { %v1256_v20 = vadd.f32 1.0, %v6542_v57  ;;  %v7921_v2 = vadd.f32 %v5711_v22, %v5710_v31  ;;  %v7923_v50 = vmul.f32 %v1255_v7, %v1031_v4  ;;  %v5714_v3 = vpop.f32.mrb[43].mxu1 }
 0x228   : > { %v1069_v14 = vmul.f32 0.044715, %v7910_v48  ;;  %v7918_v53 = vadd.f32 %v5627_v42, %v7577_v24  ;;  %v1164_v51 = vadd.f32 %v1132_v38, %v7892_v46  ;;  %v1195_v29 = vmul.f32 0.7978846, %v1163_v37 }
 0x229   : > { %9642 = vst [vmem:[#allocation25_spill] sm:$0xff] %v7923_v50  ;;  %v7925_v12 = vmul.f32 %v1256_v20, %v1032_v11  ;;  %v7929_v42 = vadd.f32 %v5714_v3, %v5713_v63  ;;  %v7943_v63 = vld [vmem:[%s9583_s5 + $0x8] ss:$0 sm:$0xff] }
 0x22a   : > { %v1101_v5 = vmul.f32 %v1069_v14, %v7910_v48  ;;  %v1070_v17 = vmul.f32 0.044715, %v7918_v53  ;;  %v5628_v57 = vpop.f32.mrb[60].mxu0  ;;  %v1196_v60 = vmul.f32 0.7978846, %v1164_v51  ;;  %6547 = vtanh.f32 %v1195_v29 }
 0x22b   : > { %9643 = vst [vmem:[#allocation26_spill] sm:$0xff] %v7925_v12  ;;  %v5629_v24 = vpop.f32.mrb[61].mxu0  ;;  %v6943_v51 = vld [vmem:[%s9583_s5] ss:$0 sm:$0xff]  ;;  %v1908_v12 = vadd.f32 %v7661_v23, %v7943_v63 }
 0x22c   : > { %v6544_v38 = vpop.eup %6543  ;;  %v1102_v4 = vmul.f32 %v1070_v17, %v7918_v53  ;;  %v5630_v7 = vadd.f32 %v5629_v24, %v5628_v57  ;;  %v5631_v37 = vpop.f32.mrb[62].mxu0  ;;  %6549 = vtanh.f32 %v1196_v60  ;;  %v1133_v11 = vmul.f32 %v1101_v5, %v7910_v48 }
 0x22d   : > { %v5632_v20 = vpop.f32.mrb[63].mxu0  ;;  %v1257_v14 = vadd.f32 1.0, %v6544_v38  ;;  %v5716_v5 = vpop.f32.mrb[44].mxu1  ;;  %v1033_v57 = vmul.f32 0.5, %v7858_v55  ;;  %v1034_v24 = vmul.f32 0.5, %v7866_v52 }
 0x22e   : > { %v6546_v22 = vpop.eup %6545  ;;  %v7938_v3 = vadd.f32 %v6943_v51, %v5630_v7  ;;  %v5633_v29 = vadd.f32 %v5632_v20, %v5631_v37  ;;  %v1134_v17 = vmul.f32 %v1102_v4, %v7918_v53  ;;  %v1165_v60 = vadd.f32 %v1133_v11, %v7910_v48  ;;  %v5717_v37 = vpop.f32.mrb[45].mxu1 }
 0x22f   : > { %v1258_v38 = vadd.f32 1.0, %v6546_v22  ;;  %v7955_v4 = vadd.f32 %v5717_v37, %v5716_v5  ;;  %v5719_v11 = vpop.f32.mrb[46].mxu1  ;;  %v7957_v8 = vmul.f32 %v1257_v14, %v1033_v57 }
 0x230   : > { %v1071_v31 = vmul.f32 0.044715, %v7938_v3  ;;  %v7950_v7 = vadd.f32 %v6943_v51, %v5633_v29  ;;  %v1166_v20 = vadd.f32 %v1134_v17, %v7918_v53  ;;  %v1197_v50 = vmul.f32 0.7978846, %v1165_v60  ;;  %v5720_v29 = vpop.f32.mrb[47].mxu1 }
 0x231   : > { %9644 = vst [vmem:[#allocation27_spill] sm:$0xff] %v7955_v4  ;;  %9645 = vst [vmem:[#allocation28_spill] sm:$0xff] %v7957_v8  ;;  %v7959_v55 = vmul.f32 %v1258_v38, %v1034_v24  ;;  %v7963_v60 = vadd.f32 %v5720_v29, %v5719_v11  ;;  %v1911_v38 = vadd.f32 %v7669_v32, %v7943_v63  ;;  %v5722_v8 = vpop.f32.mrb[48].mxu1 }
 0x232   : > { %v1103_v52 = vmul.f32 %v1071_v31, %v7938_v3  ;;  %v1072_v22 = vmul.f32 0.044715, %v7950_v7  ;;  %v5762_v51 = vpop.f32.mrb[64].mxu0  ;;  %v1198_v30 = vmul.f32 0.7978846, %v1166_v20  ;;  %6551 = vtanh.f32 %v1197_v50  ;;  %v5723_v32 = vpop.f32.mrb[49].mxu1 }
 0x233   : > { %9646 = vst [vmem:[#allocation29_spill] sm:$0xff] %v7959_v55  ;;  %v5763_v17 = vpop.f32.mrb[65].mxu0 }
 0x234   : > { %v6548_v5 = vpop.eup %6547  ;;  %v1104_v14 = vmul.f32 %v1072_v22, %v7950_v7  ;;  %v5764_v57 = vadd.f32 %v5763_v17, %v5762_v51  ;;  %v5765_v24 = vpop.f32.mrb[66].mxu0  ;;  %6553 = vtanh.f32 %v1198_v30  ;;  %v1135_v31 = vmul.f32 %v1103_v52, %v7938_v3 }
 0x235   : > { %v5766_v37 = vpop.f32.mrb[67].mxu0  ;;  %v1259_v20 = vadd.f32 1.0, %v6548_v5  ;;  %v1035_v22 = vmul.f32 0.5, %v7884_v16  ;;  %v1036_v30 = vmul.f32 0.5, %v7892_v46 }
 0x236   : > { %v6550_v50 = vpop.eup %6549  ;;  %v7971_v4 = vadd.f32 %v5764_v57, %v1908_v12  ;;  %v5767_v11 = vadd.f32 %v5766_v37, %v5765_v24  ;;  %v1136_v29 = vmul.f32 %v1104_v14, %v7950_v7  ;;  %v1167_v23 = vadd.f32 %v1135_v31, %v7938_v3  ;;  %v5725_v57 = vpop.f32.mrb[50].mxu1 }
 0x237   : > { %v1260_v51 = vadd.f32 1.0, %v6550_v50  ;;  %v7981_v12 = vadd.f32 %v5723_v32, %v5722_v8  ;;  %v7983_v24 = vmul.f32 %v1259_v20, %v1035_v22  ;;  %v1916_v37 = vadd.f32 %v7687_v61, %v7943_v63  ;;  %v5726_v50 = vpop.f32.mrb[51].mxu1 }
 0x238   : > { %v2227_v52 = vmul.f32 0.044715, %v7971_v4  ;;  %v7978_v17 = vadd.f32 %v5767_v11, %v1911_v38  ;;  %v1168_v5 = vadd.f32 %v1136_v29, %v7950_v7  ;;  %v1199_v31 = vmul.f32 0.7978846, %v1167_v23 }
 0x239   : > { %9647 = vst [vmem:[#allocation30_spill] sm:$0xff] %v7983_v24  ;;  %v7985_v14 = vmul.f32 %v1260_v51, %v1036_v30  ;;  %v7991_v55 = vadd.f32 %v5726_v50, %v5725_v57  ;;  %v1919_v61 = vadd.f32 %v7695_v6, %v7943_v63 }
 0x23a   : > { %v2259_v16 = vmul.f32 %v2227_v52, %v7971_v4  ;;  %v2228_v46 = vmul.f32 0.044715, %v7978_v17  ;;  %v5768_v38 = vpop.f32.mrb[68].mxu0  ;;  %v1200_v20 = vmul.f32 0.7978846, %v1168_v5  ;;  %6555 = vtanh.f32 %v1199_v31 }
 0x23b   : > { %9648 = vst [vmem:[#allocation31_spill] sm:$0xff] %v7985_v14  ;;  %v5769_v11 = vpop.f32.mrb[69].mxu0  ;;  %9649 = vst [vmem:[#allocation32_spill] sm:$0xff] %v7991_v55 }
 0x23c   : > { %v6552_v29 = vpop.eup %6551  ;;  %v2260_v22 = vmul.f32 %v2228_v46, %v7978_v17  ;;  %v5770_v23 = vadd.f32 %v5769_v11, %v5768_v38  ;;  %v5771_v30 = vpop.f32.mrb[70].mxu0  ;;  %v2291_v51 = vmul.f32 %v2259_v16, %v7971_v4  ;;  %6557 = vtanh.f32 %v1200_v20 }
 0x23d   : > { %v5772_v52 = vpop.f32.mrb[71].mxu0  ;;  %v1261_v32 = vadd.f32 1.0, %v6552_v29  ;;  %v5728_v46 = vpop.f32.mrb[52].mxu1  ;;  %v1037_v38 = vmul.f32 0.5, %v7910_v48  ;;  %v1038_v16 = vmul.f32 0.5, %v7918_v53 }
 0x23e   : > { %v6554_v57 = vpop.eup %6553  ;;  %v7999_v50 = vadd.f32 %v5770_v23, %v1916_v37  ;;  %v5773_v55 = vadd.f32 %v5772_v52, %v5771_v30  ;;  %v2292_v5 = vmul.f32 %v2260_v22, %v7978_v17  ;;  %v2323_v8 = vadd.f32 %v2291_v51, %v7971_v4  ;;  %v5729_v37 = vpop.f32.mrb[53].mxu1 }
 0x23f   : > { %v1262_v31 = vadd.f32 1.0, %v6554_v57  ;;  %v1924_v23 = vadd.f32 %v7713_v39, %v7943_v63  ;;  %v8011_v22 = vadd.f32 %v5729_v37, %v5728_v46  ;;  %v5731_v30 = vpop.f32.mrb[54].mxu1  ;;  %v8013_v51 = vmul.f32 %v1261_v32, %v1037_v38 }
 0x240   : > { %v2229_v11 = vmul.f32 0.044715, %v7999_v50  ;;  %v8006_v6 = vadd.f32 %v5773_v55, %v1919_v61  ;;  %v2324_v20 = vadd.f32 %v2292_v5, %v7978_v17  ;;  %v2355_v29 = vmul.f32 0.7978846, %v2323_v8  ;;  %v5732_v57 = vpop.f32.mrb[55].mxu1 }
 0x241   : > { %9650 = vst [vmem:[#allocation33_spill] sm:$0xff] %v8013_v51  ;;  %v8015_v48 = vmul.f32 %v1262_v31, %v1038_v16  ;;  %v8019_v5 = vadd.f32 %v5732_v57, %v5731_v30  ;;  %v1927_v31 = vadd.f32 %v7721_v49, %v7943_v63 }
 0x242   : > { %v2261_v53 = vmul.f32 %v2229_v11, %v7999_v50  ;;  %v2230_v52 = vmul.f32 0.044715, %v8006_v6  ;;  %v5774_v55 = vpop.f32.mrb[72].mxu0  ;;  %v2356_v61 = vmul.f32 0.7978846, %v2324_v20  ;;  %6559 = vtanh.f32 %v2355_v29 }
 0x243   : > { %9651 = vst [vmem:[#allocation34_spill] sm:$0xff] %v8015_v48  ;;  %v5775_v8 = vpop.f32.mrb[73].mxu0 }
 0x244   : > { %v2262_v46 = vmul.f32 %v2230_v52, %v8006_v6  ;;  %v5776_v32 = vadd.f32 %v5775_v8, %v5774_v55  ;;  %v5777_v38 = vpop.f32.mrb[74].mxu0  ;;  %6561 = vtanh.f32 %v2356_v61  ;;  %v2293_v16 = vmul.f32 %v2261_v53, %v7999_v50  ;;  %v6556_v20 = vpop.eup %6555 }
 0x245   : > { %v5778_v11 = vpop.f32.mrb[75].mxu0  ;;  %v1932_v52 = vadd.f32 %v7739_v21, %v7943_v63  ;;  %v5734_v55 = vpop.f32.mrb[56].mxu1  ;;  %v1263_v61 = vadd.f32 1.0, %v6556_v20 }
 0x246   : > { %v8027_v29 = vadd.f32 %v5776_v32, %v1924_v23  ;;  %v5779_v37 = vadd.f32 %v5778_v11, %v5777_v38  ;;  %v2294_v30 = vmul.f32 %v2262_v46, %v8006_v6  ;;  %v2325_v57 = vadd.f32 %v2293_v16, %v7999_v50  ;;  %v6558_v39 = vpop.eup %6557  ;;  %v5735_v23 = vpop.f32.mrb[57].mxu1 }
 0x247   : > { %v8037_v32 = vadd.f32 %v5735_v23, %v5734_v55  ;;  %v5737_v38 = vpop.f32.mrb[58].mxu1  ;;  %v1039_v46 = vmul.f32 0.5, %v7938_v3  ;;  %v1040_v16 = vmul.f32 0.5, %v7950_v7  ;;  %v1264_v11 = vadd.f32 1.0, %v6558_v39 }
 0x248   : > { %v2231_v53 = vmul.f32 0.044715, %v8027_v29  ;;  %v8034_v8 = vadd.f32 %v5779_v37, %v1927_v31  ;;  %v2326_v49 = vadd.f32 %v2294_v30, %v8006_v6  ;;  %v2357_v51 = vmul.f32 0.7978846, %v2325_v57  ;;  %v5738_v31 = vpop.f32.mrb[59].mxu1 }
 0x249   : > { %9652 = vst [vmem:[#allocation35_spill] sm:$0xff] %v8037_v32  ;;  %v8043_v30 = vadd.f32 %v5738_v31, %v5737_v38  ;;  %v8045_v57 = vmul.f32 %v1263_v61, %v1039_v46  ;;  %v8047_v55 = vmul.f32 %v1264_v11, %v1040_v16  ;;  %v6465_v31 = vld [vmem:[#allocation10 + $0x48] sm:$0xff]  }
 0x24a   : > { %v2263_v21 = vmul.f32 %v2231_v53, %v8027_v29  ;;  %v2232_v20 = vmul.f32 0.044715, %v8034_v8  ;;  %v5780_v48 = vpop.f32.mrb[76].mxu0  ;;  %v2358_v24 = vmul.f32 0.7978846, %v2326_v49  ;;  %6563 = vtanh.f32 %v2357_v51 }
 0x24b   : > { %v5781_v37 = vpop.f32.mrb[77].mxu0  ;;  %9653 = vst [vmem:[#allocation36_spill] sm:$0xff] %v8043_v30  ;;  %9654 = vst [vmem:[#allocation37_spill] sm:$0xff] %v8045_v57  ;;  %v1935_v49 = vadd.f32 %v7747_v35, %v7943_v63  ;;  %v2196_v35 = vmul.f32 0.5, %v7978_v17  ;;  %v6466_v17 = vld [vmem:[#allocation10 + $0x8] sm:$0xff]  }
 0x24c   : > { %9655 = vst [vmem:[#allocation38_spill] sm:$0xff] %v8047_v55  ;;  %v6560_v23 = vpop.eup %6559  ;;  %v2264_v3 = vmul.f32 %v2232_v20, %v8034_v8  ;;  %v5782_v7 = vadd.f32 %v5781_v37, %v5780_v48  ;;  %v5783_v39 = vpop.f32.mrb[78].mxu0  ;;  %6565 = vtanh.f32 %v2358_v24  ;;  %v2295_v53 = vmul.f32 %v2263_v21, %v8027_v29  ;;  %v6463_v20 = vld [vmem:[#allocation10 + $0x40] sm:$0xff]  }
 0x24d   : > { %v5784_v51 = vpop.f32.mrb[79].mxu0  ;;  %v2419_v14 = vadd.f32 1.0, %v6560_v23  ;;  %v6464_v24 = vld [vmem:[#allocation10] sm:$0xff]   ;;  %v2195_v21 = vmul.f32 0.5, %v7971_v4  ;;  %v5740_v23 = vpop.f32.mrb[60].mxu1  ;;  %5858 = vmatprep.subr.bf16.mxu0 %v6463_v20 }
 0x24e   : > { %v6562_v61 = vpop.eup %6561  ;;  %v8055_v46 = vadd.f32 %v5782_v7, %v1932_v52  ;;  %v5785_v16 = vadd.f32 %v5784_v51, %v5783_v39  ;;  %v2296_v11 = vmul.f32 %v2264_v3, %v8034_v8  ;;  %v2327_v48 = vadd.f32 %v2295_v53, %v8027_v29  ;;  %v5741_v39 = vpop.f32.mrb[61].mxu1  ;;  %5859 = vmatpush3.bf16.msra.mxu0 %v6464_v24 }
 0x24f   : > { %v2420_v37 = vadd.f32 1.0, %v6562_v61  ;;  %v1940_v3 = vadd.f32 %v7765_v10, %v7943_v63  ;;  %v2451_v53 = vmul.f32 %v2419_v14, %v2195_v21  ;;  %v8067_v57 = vadd.f32 %v5741_v39, %v5740_v23  ;;  %v5743_v4 = vpop.f32.mrb[62].mxu1  ;;  %5860 = vmatprep.subr.bf16.mxu0 %v6465_v31 }
 0x250   : > { %v2233_v30 = vmul.f32 0.044715, %v8055_v46  ;;  %v8062_v38 = vadd.f32 %v5785_v16, %v1935_v49  ;;  %v2328_v52 = vadd.f32 %v2296_v11, %v8034_v8  ;;  %v2359_v7 = vmul.f32 0.7978846, %v2327_v48  ;;  %v5744_v11 = vpop.f32.mrb[63].mxu1 }
 0x251   : > { %v2452_v51 = vmul.f32 %v2420_v37, %v2196_v35  ;;  %v8071_v32 = vadd.f32 %v5744_v11, %v5743_v4  ;;  %v9656_v39 = vpack.c.bf16 %v7640_v33, %v7638_v56  ;;  %v1948_v56 = vadd.f32 %v7791_v9, %v7943_v63 }
 0x252   : > { %v2265_v61 = vmul.f32 %v2233_v30, %v8055_v46  ;;  %v2234_v49 = vmul.f32 0.044715, %v8062_v38  ;;  %v5786_v16 = vpop.f32.mrb[80].mxu0  ;;  %v2360_v55 = vmul.f32 0.7978846, %v2328_v52  ;;  %6567 = vtanh.f32 %v2359_v7  ;;  %5861 = vmatpush3.bf16.msra.mxu0 %v6466_v17 }
 0x253   : > { %v5787_v48 = vpop.f32.mrb[81].mxu0  ;;  %v2499_v20 = vpack.c.bf16 %v2452_v51, %v2451_v53  ;;  %v1943_v30 = vadd.f32 %v7773_v19, %v7943_v63  ;;  %v2197_v51 = vmul.f32 0.5, %v7999_v50  ;;  %v2198_v19 = vmul.f32 0.5, %v8006_v6 }
 0x254   : > { %v6564_v10 = vpop.eup %6563  ;;  %v2266_v14 = vmul.f32 %v2234_v49, %v8062_v38  ;;  %v5788_v21 = vadd.f32 %v5787_v48, %v5786_v16  ;;  %v5789_v35 = vpop.f32.mrb[82].mxu0  ;;  %6569 = vtanh.f32 %v2360_v55  ;;  %v2297_v24 = vmul.f32 %v2265_v61, %v8055_v46 }
 0x255   : > { %v5790_v37 = vpop.f32.mrb[83].mxu0  ;;  %2718 = vmatprep.mubr.bf16.mxu1 %v2499_v20  ;;  %v2421_v23 = vadd.f32 1.0, %v6564_v10  ;;  %v1951_v9 = vadd.f32 %v7799_v28, %v7943_v63 }
 0x256   : > { %v6566_v31 = vpop.eup %6565  ;;  %v8077_v52 = vadd.f32 %v5788_v21, %v1940_v3  ;;  %v5791_v7 = vadd.f32 %v5790_v37, %v5789_v35  ;;  %2719 = vmatmul.mubr.bf16.vlgmr.msra.gmra.mrb[64].mxu1 %v9656_v39  ;;  %v2298_v53 = vmul.f32 %v2266_v14, %v8062_v38  ;;  %v2329_v55 = vadd.f32 %v2297_v24, %v8055_v46 }
 0x257   : > { %v2422_v4 = vadd.f32 1.0, %v6566_v31  ;;  %v2453_v33 = vmul.f32 %v2421_v23, %v2197_v51 }
 0x258   : > { %v2235_v61 = vmul.f32 0.044715, %v8077_v52  ;;  %v8087_v17 = vadd.f32 %v5791_v7, %v1943_v30  ;;  %v2330_v3 = vadd.f32 %v2298_v53, %v8062_v38  ;;  %v2361_v49 = vmul.f32 0.7978846, %v2329_v55 }
 0x259   : > { %v2454_v16 = vmul.f32 %v2422_v4, %v2198_v19  ;;  %v9657_v53 = vpack.c.bf16 %v7665_v27, %v7663_v26  ;;  %v2199_v19 = vmul.f32 0.5, %v8027_v29  ;;  %v2200_v4 = vmul.f32 0.5, %v8034_v8 }
 0x25a   : > { %v2267_v11 = vmul.f32 %v2235_v61, %v8077_v52  ;;  %v2236_v48 = vmul.f32 0.044715, %v8087_v17  ;;  %v5792_v50 = vpop.f32.mrb[84].mxu0  ;;  %v2362_v20 = vmul.f32 0.7978846, %v2330_v3  ;;  %6571 = vtanh.f32 %v2361_v49 }
 0x25b   : > { %v5793_v6 = vpop.f32.mrb[85].mxu0  ;;  %v2500_v10 = vpack.c.bf16 %v2454_v16, %v2453_v33  ;;  %v1956_v26 = vadd.f32 %v7817_v18, %v7943_v63  ;;  %v1959_v18 = vadd.f32 %v7825_v44, %v7943_v63 }
 0x25c   : > { %v6568_v14 = vpop.eup %6567  ;;  %v2268_v21 = vmul.f32 %v2236_v48, %v8087_v17  ;;  %v5794_v35 = vadd.f32 %v5793_v6, %v5792_v50  ;;  %v5795_v24 = vpop.f32.mrb[86].mxu0  ;;  %6573 = vtanh.f32 %v2362_v20  ;;  %v2299_v30 = vmul.f32 %v2267_v11, %v8077_v52 }
 0x25d   : > { %v5796_v37 = vpop.f32.mrb[87].mxu0  ;;  %2728 = vmatprep.mubr.bf16.mxu1 %v2500_v10  ;;  %v2423_v23 = vadd.f32 1.0, %v6568_v14 }
 0x25e   : > { %v6570_v31 = vpop.eup %6569  ;;  %v8098_v7 = vadd.f32 %v5794_v35, %v1948_v56  ;;  %v5797_v39 = vadd.f32 %v5796_v37, %v5795_v24  ;;  %2729 = vmatmul.mubr.bf16.gmra.mrb[68].mxu1 %v9657_v53  ;;  %v2300_v55 = vmul.f32 %v2268_v21, %v8087_v17  ;;  %v2331_v51 = vadd.f32 %v2299_v30, %v8077_v52 }
 0x25f   : > { %v2424_v28 = vadd.f32 1.0, %v6570_v31  ;;  %v2455_v27 = vmul.f32 %v2423_v23, %v2199_v19  ;;  %v9658_v23 = vpack.c.bf16 %v7691_v1, %v7689_v0  ;;  %v2201_v53 = vmul.f32 0.5, %v8055_v46 }
 0x260   : > { %v2237_v61 = vmul.f32 0.044715, %v8098_v7  ;;  %v8108_v3 = vadd.f32 %v5797_v39, %v1951_v9  ;;  %v2332_v49 = vadd.f32 %v2300_v55, %v8087_v17  ;;  %v2363_v56 = vmul.f32 0.7978846, %v2331_v51 }
 0x261   : > { %v2456_v33 = vmul.f32 %v2424_v28, %v2200_v4  ;;  %v2202_v55 = vmul.f32 0.5, %v8062_v38  ;;  %v1964_v0 = vadd.f32 %v7843_v58, %v7943_v63  ;;  %v1967_v58 = vadd.f32 %v7851_v59, %v7943_v63 }
 0x262   : > { %v2269_v16 = vmul.f32 %v2237_v61, %v8098_v7  ;;  %v2238_v11 = vmul.f32 0.044715, %v8108_v3  ;;  %v5798_v29 = vpop.f32.mrb[88].mxu0  ;;  %v2364_v48 = vmul.f32 0.7978846, %v2332_v49  ;;  %6575 = vtanh.f32 %v2363_v56 }
 0x263   : > { %v5799_v8 = vpop.f32.mrb[89].mxu0  ;;  %v2501_v50 = vpack.c.bf16 %v2456_v33, %v2455_v27 }
 0x264   : > { %v6572_v20 = vpop.eup %6571  ;;  %v2270_v6 = vmul.f32 %v2238_v11, %v8108_v3  ;;  %v5800_v10 = vadd.f32 %v5799_v8, %v5798_v29  ;;  %v5801_v14 = vpop.f32.mrb[90].mxu0  ;;  %6577 = vtanh.f32 %v2364_v48  ;;  %v2301_v21 = vmul.f32 %v2269_v16, %v8098_v7 }
 0x265   : > { %v5802_v35 = vpop.f32.mrb[91].mxu0  ;;  %2738 = vmatprep.mubr.bf16.mxu1 %v2501_v50  ;;  %v2425_v24 = vadd.f32 1.0, %v6572_v20 }
 0x266   : > { %v6574_v30 = vpop.eup %6573  ;;  %v8119_v9 = vadd.f32 %v5800_v10, %v1956_v26  ;;  %v5803_v37 = vadd.f32 %v5802_v35, %v5801_v14  ;;  %2739 = vmatmul.mubr.bf16.gmra.mrb[72].mxu1 %v9658_v23  ;;  %v2302_v31 = vmul.f32 %v2270_v6, %v8108_v3  ;;  %v2333_v39 = vadd.f32 %v2301_v21, %v8098_v7 }
 0x267   : > { %v2426_v44 = vadd.f32 1.0, %v6574_v30  ;;  %v2457_v1 = vmul.f32 %v2425_v24, %v2201_v53  ;;  %v9659_v14 = vpack.c.bf16 %v7717_v43, %v7715_v41  ;;  %v2203_v35 = vmul.f32 0.5, %v8077_v52 }
 0x268   : > { %v2239_v51 = vmul.f32 0.044715, %v8119_v9  ;;  %v8129_v19 = vadd.f32 %v5803_v37, %v1959_v18  ;;  %v2334_v4 = vadd.f32 %v2302_v31, %v8108_v3  ;;  %v2365_v28 = vmul.f32 0.7978846, %v2333_v39 }
 0x269   : > { %v2458_v61 = vmul.f32 %v2426_v44, %v2202_v55  ;;  %v2204_v24 = vmul.f32 0.5, %v8087_v17  ;;  %v1972_v41 = vadd.f32 %v7869_v40, %v7943_v63  ;;  %v1975_v40 = vadd.f32 %v7877_v34, %v7943_v63 }
 0x26a   : > { %v2271_v49 = vmul.f32 %v2239_v51, %v8119_v9  ;;  %v2240_v56 = vmul.f32 0.044715, %v8129_v19  ;;  %v5804_v46 = vpop.f32.mrb[92].mxu0  ;;  %v2366_v26 = vmul.f32 0.7978846, %v2334_v4  ;;  %6579 = vtanh.f32 %v2365_v28 }
 0x26b   : > { %v5805_v38 = vpop.f32.mrb[93].mxu0  ;;  %v2502_v27 = vpack.c.bf16 %v2458_v61, %v2457_v1 }
 0x26c   : > { %v6576_v33 = vpop.eup %6575  ;;  %v2272_v16 = vmul.f32 %v2240_v56, %v8129_v19  ;;  %v5806_v11 = vadd.f32 %v5805_v38, %v5804_v46  ;;  %v5807_v29 = vpop.f32.mrb[94].mxu0  ;;  %6581 = vtanh.f32 %v2366_v26  ;;  %v2303_v48 = vmul.f32 %v2271_v49, %v8119_v9 }
 0x26d   : > { %v5808_v8 = vpop.f32.mrb[95].mxu0  ;;  %2748 = vmatprep.mubr.bf16.mxu1 %v2502_v27  ;;  %v2427_v50 = vadd.f32 1.0, %v6576_v33  ;;  %v9660_v27 = vpack.c.bf16 %v7743_v54, %v7741_v25  ;;  %v1980_v25 = vadd.f32 %v7895_v47, %v7943_v63  ;;  %v1983_v47 = vadd.f32 %v7903_v62, %v7943_v63 }
 0x26e   : > { %v6578_v20 = vpop.eup %6577  ;;  %v8140_v6 = vadd.f32 %v5806_v11, %v1964_v0  ;;  %v5809_v10 = vadd.f32 %v5808_v8, %v5807_v29  ;;  %2749 = vmatmul.mubr.bf16.gmra.mrb[76].mxu1 %v9659_v14  ;;  %v2304_v21 = vmul.f32 %v2272_v16, %v8129_v19  ;;  %v2335_v18 = vadd.f32 %v2303_v48, %v8119_v9 }
 0x26f   : > { %v2428_v59 = vadd.f32 1.0, %v6578_v20  ;;  %v2459_v43 = vmul.f32 %v2427_v50, %v2203_v35  ;;  %v2205_v11 = vmul.f32 0.5, %v8098_v7  ;;  %v2206_v29 = vmul.f32 0.5, %v8108_v3 }
 0x270   : > { %v2241_v30 = vmul.f32 0.044715, %v8140_v6  ;;  %v8150_v37 = vadd.f32 %v5809_v10, %v1967_v58  ;;  %v2336_v23 = vadd.f32 %v2304_v21, %v8129_v19  ;;  %v2367_v31 = vmul.f32 0.7978846, %v2335_v18 }
 0x271   : > { %v2460_v39 = vmul.f32 %v2428_v59, %v2204_v24 }
 0x272   : > { %v2273_v53 = vmul.f32 %v2241_v30, %v8140_v6  ;;  %v2242_v55 = vmul.f32 0.044715, %v8150_v37  ;;  %v5810_v52 = vpop.f32.mrb[96].mxu0  ;;  %v2368_v44 = vmul.f32 0.7978846, %v2336_v23  ;;  %6583 = vtanh.f32 %v2367_v31 }
 0x273   : > { %v5811_v17 = vpop.f32.mrb[97].mxu0  ;;  %v2503_v51 = vpack.c.bf16 %v2460_v39, %v2459_v43 }
 0x274   : > { %v6580_v4 = vpop.eup %6579  ;;  %v2274_v28 = vmul.f32 %v2242_v55, %v8150_v37  ;;  %v5812_v0 = vadd.f32 %v5811_v17, %v5810_v52  ;;  %v5813_v1 = vpop.f32.mrb[98].mxu0  ;;  %6585 = vtanh.f32 %v2368_v44  ;;  %v2305_v61 = vmul.f32 %v2273_v53, %v8140_v6 }
 0x275   : > { %v5814_v49 = vpop.f32.mrb[99].mxu0  ;;  %2758 = vmatprep.mubr.bf16.mxu1 %v2503_v51  ;;  %v2429_v56 = vadd.f32 1.0, %v6580_v4  ;;  %v9661_v55 = vpack.c.bf16 %v7769_v15, %v7767_v13  ;;  %v2207_v17 = vmul.f32 0.5, %v8119_v9  ;;  %v2208_v51 = vmul.f32 0.5, %v8129_v19 }
 0x276   : > { %v6582_v46 = vpop.eup %6581  ;;  %v8161_v26 = vadd.f32 %v5812_v0, %v1972_v41  ;;  %v5815_v38 = vadd.f32 %v5814_v49, %v5813_v1  ;;  %2759 = vmatmul.mubr.bf16.gmra.mrb[80].mxu1 %v9660_v27  ;;  %v2306_v33 = vmul.f32 %v2274_v28, %v8150_v37  ;;  %v2337_v16 = vadd.f32 %v2305_v61, %v8140_v6 }
 0x277   : > { %v2430_v34 = vadd.f32 1.0, %v6582_v46  ;;  %v2461_v54 = vmul.f32 %v2429_v56, %v2205_v11  ;;  %v1988_v13 = vadd.f32 %v7921_v2, %v7943_v63  ;;  %v1991_v2 = vadd.f32 %v7929_v42, %v7943_v63 }
 0x278   : > { %v2243_v48 = vmul.f32 0.044715, %v8161_v26  ;;  %v8171_v58 = vadd.f32 %v5815_v38, %v1975_v40  ;;  %v2338_v8 = vadd.f32 %v2306_v33, %v8150_v37  ;;  %v2369_v50 = vmul.f32 0.7978846, %v2337_v16 }
 0x279   : > { %v2462_v20 = vmul.f32 %v2430_v34, %v2206_v29 }
 0x27a   : > { %v2275_v10 = vmul.f32 %v2243_v48, %v8161_v26  ;;  %v2244_v14 = vmul.f32 0.044715, %v8171_v58  ;;  %v5816_v7 = vpop.f32.mrb[100].mxu0  ;;  %v2370_v21 = vmul.f32 0.7978846, %v2338_v8  ;;  %6587 = vtanh.f32 %v2369_v50 }
 0x27b   : > { %v5817_v3 = vpop.f32.mrb[101].mxu0  ;;  %v2504_v18 = vpack.c.bf16 %v2462_v20, %v2461_v54 }
 0x27c   : > { %v6584_v35 = vpop.eup %6583  ;;  %v2276_v24 = vmul.f32 %v2244_v14, %v8171_v58  ;;  %v5818_v59 = vadd.f32 %v5817_v3, %v5816_v7  ;;  %v5819_v30 = vpop.f32.mrb[102].mxu0  ;;  %6589 = vtanh.f32 %v2370_v21  ;;  %v2307_v23 = vmul.f32 %v2275_v10, %v8161_v26 }
 0x27d   : > { %v5820_v31 = vpop.f32.mrb[103].mxu0  ;;  %2768 = vmatprep.mubr.bf16.mxu1 %v2504_v18  ;;  %v2431_v41 = vadd.f32 1.0, %v6584_v35  ;;  %v2209_v10 = vmul.f32 0.5, %v8140_v6  ;;  %v2210_v14 = vmul.f32 0.5, %v8150_v37  ;;  %v9663_v35 = vld [vmem:[#allocation27_spill] sm:$0xff] }
 0x27e   : > { %v6586_v43 = vpop.eup %6585  ;;  %v8182_v39 = vadd.f32 %v5818_v59, %v1980_v25  ;;  %v5821_v53 = vadd.f32 %v5820_v31, %v5819_v30  ;;  %2769 = vmatmul.mubr.bf16.gmra.mrb[84].mxu1 %v9661_v55  ;;  %v2308_v52 = vmul.f32 %v2276_v24, %v8171_v58  ;;  %v2339_v44 = vadd.f32 %v2307_v23, %v8161_v26 }
 0x27f   : > { %v2432_v62 = vadd.f32 1.0, %v6586_v43  ;;  %v2463_v15 = vmul.f32 %v2431_v41, %v2207_v17  ;;  %v9662_v25 = vpack.c.bf16 %v7795_v36, %v7793_v45  ;;  %v1996_v45 = vadd.f32 %v9663_v35, %v7943_v63  ;;  %v9669_v35 = vld [vmem:[#allocation19_spill] sm:$0xff] }
 0x280   : > { %v2245_v4 = vmul.f32 0.044715, %v8182_v39  ;;  %v8192_v28 = vadd.f32 %v5821_v53, %v1983_v47  ;;  %v2340_v0 = vadd.f32 %v2308_v52, %v8171_v58  ;;  %v2371_v1 = vmul.f32 0.7978846, %v2339_v44 }
 0x281   : > { %v2464_v61 = vmul.f32 %v2432_v62, %v2208_v51  ;;  %v1999_v52 = vadd.f32 %v7963_v60, %v7943_v63 }
 0x282   : > { %v2277_v40 = vmul.f32 %v2245_v4, %v8182_v39  ;;  %v2246_v49 = vmul.f32 0.044715, %v8192_v28  ;;  %v5822_v9 = vpop.f32.mrb[104].mxu0  ;;  %v2372_v56 = vmul.f32 0.7978846, %v2340_v0  ;;  %6591 = vtanh.f32 %v2371_v1  ;;  %v9664_v0 = vld [vmem:[#allocation18_spill] sm:$0xff] }
 0x283   : > { %v5823_v19 = vpop.f32.mrb[105].mxu0  ;;  %v2505_v46 = vpack.c.bf16 %v2464_v61, %v2463_v15  ;;  %v9665_v1 = vld [vmem:[#allocation17_spill] sm:$0xff] }
 0x284   : > { %v6588_v38 = vpop.eup %6587  ;;  %v2278_v27 = vmul.f32 %v2246_v49, %v8192_v28  ;;  %v5824_v33 = vadd.f32 %v5823_v19, %v5822_v9  ;;  %v5825_v16 = vpop.f32.mrb[106].mxu0  ;;  %6593 = vtanh.f32 %v2372_v56  ;;  %v2309_v11 = vmul.f32 %v2277_v40, %v8182_v39 }
 0x285   : > { %v5826_v29 = vpop.f32.mrb[107].mxu0  ;;  %2778 = vmatprep.mubr.bf16.mxu1 %v2505_v46  ;;  %v2433_v34 = vadd.f32 1.0, %v6588_v38  ;;  %v2211_v40 = vmul.f32 0.5, %v8161_v26  ;;  %v2212_v49 = vmul.f32 0.5, %v8171_v58  ;;  %v2004_v38 = vadd.f32 %v7981_v12, %v7943_v63  ;;  %v9667_v12 = vld [vmem:[#allocation32_spill] sm:$0xff] }
 0x286   : > { %v6590_v48 = vpop.eup %6589  ;;  %v8203_v8 = vadd.f32 %v5824_v33, %v1988_v13  ;;  %v5827_v50 = vadd.f32 %v5826_v29, %v5825_v16  ;;  %2779 = vmatmul.mubr.bf16.gmra.mrb[88].mxu1 %v9662_v25  ;;  %v2310_v54 = vmul.f32 %v2278_v27, %v8192_v28  ;;  %v2341_v20 = vadd.f32 %v2309_v11, %v8182_v39 }
 0x287   : > { %v2434_v42 = vadd.f32 1.0, %v6590_v48  ;;  %v2465_v36 = vmul.f32 %v2433_v34, %v2209_v10  ;;  %v9666_v13 = vpack.c.bf16 %v9664_v0, %v9665_v1 }
 0x288   : > { %v2247_v7 = vmul.f32 0.044715, %v8203_v8  ;;  %v8213_v21 = vadd.f32 %v5827_v50, %v1991_v2  ;;  %v2342_v3 = vadd.f32 %v2310_v54, %v8192_v28  ;;  %v2373_v18 = vmul.f32 0.7978846, %v2341_v20 }
 0x289   : > { %v2466_v24 = vmul.f32 %v2434_v42, %v2210_v14  ;;  %v2007_v20 = vadd.f32 %v9667_v12, %v7943_v63 }
 0x28a   : > { %v2279_v59 = vmul.f32 %v2247_v7, %v8203_v8  ;;  %v2248_v30 = vmul.f32 0.044715, %v8213_v21  ;;  %v5828_v6 = vpop.f32.mrb[108].mxu0  ;;  %v2374_v23 = vmul.f32 0.7978846, %v2342_v3  ;;  %6595 = vtanh.f32 %v2373_v18  ;;  %v9668_v18 = vld [vmem:[#allocation20_spill] sm:$0xff] }
 0x28b   : > { %v5829_v37 = vpop.f32.mrb[109].mxu0  ;;  %v2506_v47 = vpack.c.bf16 %v2466_v24, %v2465_v36 }
 0x28c   : > { %v6592_v31 = vpop.eup %6591  ;;  %v2280_v41 = vmul.f32 %v2248_v30, %v8213_v21  ;;  %v5830_v43 = vadd.f32 %v5829_v37, %v5828_v6  ;;  %v5831_v53 = vpop.f32.mrb[110].mxu0  ;;  %6597 = vtanh.f32 %v2374_v23  ;;  %v2311_v55 = vmul.f32 %v2279_v59, %v8203_v8 }
 0x28d   : > { %v5832_v44 = vpop.f32.mrb[111].mxu0  ;;  %2788 = vmatprep.mubr.bf16.mxu1 %v2506_v47  ;;  %v2435_v17 = vadd.f32 1.0, %v6592_v31  ;;  %v2213_v59 = vmul.f32 0.5, %v8182_v39  ;;  %v2214_v30 = vmul.f32 0.5, %v8192_v28 }
 0x28e   : > { %v6594_v51 = vpop.eup %6593  ;;  %v8224_v62 = vadd.f32 %v5830_v43, %v1996_v45  ;;  %v5833_v4 = vadd.f32 %v5832_v44, %v5831_v53  ;;  %2789 = vmatmul.mubr.bf16.gmra.mrb[92].mxu1 %v9666_v13  ;;  %v2312_v15 = vmul.f32 %v2280_v41, %v8213_v21  ;;  %v2343_v61 = vadd.f32 %v2311_v55, %v8203_v8 }
 0x28f   : > { %v2436_v60 = vadd.f32 1.0, %v6594_v51  ;;  %v2467_v27 = vmul.f32 %v2435_v17, %v2211_v40  ;;  %v9670_v45 = vpack.c.bf16 %v9668_v18, %v9669_v35  ;;  %v2012_v41 = vadd.f32 %v8011_v22, %v7943_v63  ;;  %v9675_v35 = vld [vmem:[#allocation36_spill] sm:$0xff] }
 0x290   : > { %v2249_v9 = vmul.f32 0.044715, %v8224_v62  ;;  %v8234_v56 = vadd.f32 %v5833_v4, %v1999_v52  ;;  %v2344_v19 = vadd.f32 %v2312_v15, %v8213_v21  ;;  %v2375_v46 = vmul.f32 0.7978846, %v2343_v61 }
 0x291   : > { %v2468_v33 = vmul.f32 %v2436_v60, %v2212_v49  ;;  %v2015_v22 = vadd.f32 %v8019_v5, %v7943_v63 }
 0x292   : > { %v2281_v16 = vmul.f32 %v2249_v9, %v8224_v62  ;;  %v2250_v11 = vmul.f32 0.044715, %v8234_v56  ;;  %v5834_v26 = vpop.f32.mrb[112].mxu0  ;;  %v2376_v2 = vmul.f32 0.7978846, %v2344_v19  ;;  %6599 = vtanh.f32 %v2375_v46  ;;  %v9671_v9 = vld [vmem:[#allocation22_spill] sm:$0xff] }
 0x293   : > { %v5835_v58 = vpop.f32.mrb[113].mxu0  ;;  %v2507_v29 = vpack.c.bf16 %v2468_v33, %v2467_v27  ;;  %v9672_v19 = vld [vmem:[#allocation21_spill] sm:$0xff]  ;;  %v2215_v33 = vmul.f32 0.5, %v8203_v8 }
 0x294   : > { %v6596_v34 = vpop.eup %6595  ;;  %v2282_v48 = vmul.f32 %v2250_v11, %v8234_v56  ;;  %v5836_v50 = vadd.f32 %v5835_v58, %v5834_v26  ;;  %v5837_v25 = vpop.f32.mrb[114].mxu0  ;;  %6601 = vtanh.f32 %v2376_v2  ;;  %v2313_v54 = vmul.f32 %v2281_v16, %v8224_v62 }
 0x295   : > { %v5838_v10 = vpop.f32.mrb[115].mxu0  ;;  %2798 = vmatprep.mubr.bf16.mxu1 %v2507_v29  ;;  %v2437_v14 = vadd.f32 1.0, %v6596_v34  ;;  %v9673_v46 = vpack.c.bf16 %v9671_v9, %v9672_v19  ;;  %v2216_v16 = vmul.f32 0.5, %v8213_v21  ;;  %v9674_v29 = vld [vmem:[#allocation35_spill] sm:$0xff] }
 0x296   : > { %v6598_v42 = vpop.eup %6597  ;;  %v8245_v7 = vadd.f32 %v5836_v50, %v2004_v38  ;;  %v5839_v3 = vadd.f32 %v5838_v10, %v5837_v25  ;;  %2799 = vmatmul.mubr.bf16.gmra.mrb[96].mxu1 %v9670_v45  ;;  %v2314_v36 = vmul.f32 %v2282_v48, %v8234_v56  ;;  %v2345_v24 = vadd.f32 %v2313_v54, %v8224_v62 }
 0x297   : > { %v2438_v6 = vadd.f32 1.0, %v6598_v42  ;;  %v2469_v43 = vmul.f32 %v2437_v14, %v2213_v59  ;;  %v2020_v34 = vadd.f32 %v9674_v29, %v7943_v63  ;;  %v6944_v63 = vld [vmem:[%s9583_s5 + $0x8] ss:$0 sm:$0xff] }
 0x298   : > { %v2251_v23 = vmul.f32 0.044715, %v8245_v7  ;;  %v8255_v37 = vadd.f32 %v5839_v3, %v2007_v20  ;;  %v2346_v47 = vadd.f32 %v2314_v36, %v8234_v56  ;;  %v2377_v31 = vmul.f32 0.7978846, %v2345_v24 }
 0x299   : > { %v2470_v53 = vmul.f32 %v2438_v6, %v2214_v30  ;;  %v2023_v45 = vadd.f32 %v6944_v63, %v9675_v35 }
 0x29a   : > { %v2283_v55 = vmul.f32 %v2251_v23, %v8245_v7  ;;  %v2252_v52 = vmul.f32 0.044715, %v8255_v37  ;;  %v5840_v39 = vpop.f32.mrb[116].mxu0  ;;  %v2378_v44 = vmul.f32 0.7978846, %v2346_v47  ;;  %6603 = vtanh.f32 %v2377_v31  ;;  %v9676_v23 = vld [vmem:[#allocation24_spill] sm:$0xff] }
 0x29b   : > { %v5841_v28 = vpop.f32.mrb[117].mxu0  ;;  %v2508_v17 = vpack.c.bf16 %v2470_v53, %v2469_v43  ;;  %v9677_v47 = vld [vmem:[#allocation23_spill] sm:$0xff]  ;;  %v2217_v53 = vmul.f32 0.5, %v8224_v62 }
 0x29c   : > { %v6600_v51 = vpop.eup %6599  ;;  %v2284_v4 = vmul.f32 %v2252_v52, %v8255_v37  ;;  %v5842_v0 = vadd.f32 %v5841_v28, %v5840_v39  ;;  %v5843_v1 = vpop.f32.mrb[118].mxu0  ;;  %6605 = vtanh.f32 %v2378_v44  ;;  %v2315_v13 = vmul.f32 %v2283_v55, %v8245_v7 }
 0x29d   : > { %v5844_v15 = vpop.f32.mrb[119].mxu0  ;;  %2808 = vmatprep.mubr.bf16.mxu1 %v2508_v17  ;;  %v2439_v61 = vadd.f32 1.0, %v6600_v51  ;;  %v9678_v31 = vpack.c.bf16 %v9676_v23, %v9677_v47  ;;  %v2218_v55 = vmul.f32 0.5, %v8234_v56  ;;  %v2028_v51 = vadd.f32 %v6944_v63, %v8067_v57 }
 0x29e   : > { %v6602_v40 = vpop.eup %6601  ;;  %v8266_v49 = vadd.f32 %v5842_v0, %v2012_v41  ;;  %v5845_v60 = vadd.f32 %v5844_v15, %v5843_v1  ;;  %2809 = vmatmul.mubr.bf16.gmra.mrb[100].mxu1 %v9673_v46  ;;  %v2316_v38 = vmul.f32 %v2284_v4, %v8255_v37  ;;  %v2347_v27 = vadd.f32 %v2315_v13, %v8245_v7 }
 0x29f   : > { %v2440_v5 = vadd.f32 1.0, %v6602_v40  ;;  %v2471_v48 = vmul.f32 %v2439_v61, %v2215_v33  ;;  %v2031_v57 = vadd.f32 %v6944_v63, %v8071_v32  ;;  %v6468_v63 = vld [vmem:[#allocation10 + $0x10] sm:$0xff]  }
 0x2a0   : > { %v2253_v11 = vmul.f32 0.044715, %v8266_v49  ;;  %v8276_v26 = vadd.f32 %v5845_v60, %v2015_v22  ;;  %v2348_v2 = vadd.f32 %v2316_v38, %v8255_v37  ;;  %v2379_v58 = vmul.f32 0.7978846, %v2347_v27 }
 0x2a1   : > { %v2472_v50 = vmul.f32 %v2440_v5, %v2216_v16  ;;  %v9679_v5 = vld [vmem:[#allocation26_spill] sm:$0xff]  ;;  %v2221_v47 = vmul.f32 0.5, %v8266_v49 }
 0x2a2   : > { %v2285_v25 = vmul.f32 %v2253_v11, %v8266_v49  ;;  %v2254_v54 = vmul.f32 0.044715, %v8276_v26  ;;  %v5846_v8 = vpop.f32.mrb[120].mxu0  ;;  %v2380_v12 = vmul.f32 0.7978846, %v2348_v2  ;;  %6607 = vtanh.f32 %v2379_v58  ;;  %v9680_v11 = vld [vmem:[#allocation25_spill] sm:$0xff] }
 0x2a3   : > { %v5847_v21 = vpop.f32.mrb[121].mxu0  ;;  %v2509_v20 = vpack.c.bf16 %v2472_v50, %v2471_v48  ;;  %v9681_v2 = vpack.c.bf16 %v9679_v5, %v9680_v11  ;;  %v2220_v48 = vmul.f32 0.5, %v8255_v37  ;;  %v9688_v11 = vld [vmem:[#allocation34_spill] sm:$0xff] }
 0x2a4   : > { %v6604_v10 = vpop.eup %6603  ;;  %v2286_v14 = vmul.f32 %v2254_v54, %v8276_v26  ;;  %v5848_v42 = vadd.f32 %v5847_v21, %v5846_v8  ;;  %v5849_v3 = vpop.f32.mrb[122].mxu0  ;;  %6609 = vtanh.f32 %v2380_v12  ;;  %v2317_v18 = vmul.f32 %v2285_v25, %v8266_v49 }
 0x2a5   : > { %v5850_v36 = vpop.f32.mrb[123].mxu0  ;;  %2818 = vmatprep.mubr.bf16.mxu1 %v2509_v20  ;;  %v2441_v24 = vadd.f32 1.0, %v6604_v10 }
 0x2a6   : > { %v6606_v59 = vpop.eup %6605  ;;  %v8289_v30 = vadd.f32 %v5848_v42, %v2020_v34  ;;  %v5851_v6 = vadd.f32 %v5850_v36, %v5849_v3  ;;  %2819 = vmatmul.mubr.bf16.gmra.mrb[104].mxu1 %v9678_v31  ;;  %v2318_v41 = vmul.f32 %v2286_v14, %v8276_v26  ;;  %v2349_v43 = vadd.f32 %v2317_v18, %v8266_v49  ;;  %v9682_v36 = vld [vmem:[#allocation29_spill] sm:$0xff] }
 0x2a7   : > { %v2442_v52 = vadd.f32 1.0, %v6606_v59  ;;  %v2473_v4 = vmul.f32 %v2441_v24, %v2217_v53  ;;  %v2219_v34 = vmul.f32 0.5, %v8245_v7  ;;  %v6467_v7 = vld [vmem:[#allocation10 + $0x50] sm:$0xff]   ;;  %v9683_v24 = vld [vmem:[#allocation28_spill] sm:$0xff]  ;;  %v2222_v31 = vmul.f32 0.5, %v8276_v26 }
 0x2a8   : > { %v2255_v39 = vmul.f32 0.044715, %v8289_v30  ;;  %v8299_v44 = vadd.f32 %v5851_v6, %v2023_v45  ;;  %v2350_v28 = vadd.f32 %v2318_v41, %v8276_v26  ;;  %v2381_v17 = vmul.f32 0.7978846, %v2349_v43  ;;  %5862 = vmatprep.subr.bf16.mxu0 %v6467_v7  ;;  %v6469_v43 = vld [vmem:[#allocation10 + $0x58] sm:$0xff]  }
 0x2a9   : > { %v2474_v0 = vmul.f32 %v2442_v52, %v2218_v55  ;;  %v9684_v59 = vpack.c.bf16 %v9682_v36, %v9683_v24  ;;  %5863 = vmatpush3.bf16.msra.mxu0 %v6468_v63  ;;  %v6470_v52 = vld [vmem:[#allocation10 + $0x18] sm:$0xff]  }
 0x2aa   : > { %v2287_v1 = vmul.f32 %v2255_v39, %v8289_v30  ;;  %v2256_v13 = vmul.f32 0.044715, %v8299_v44  ;;  %v5852_v22 = vpop.f32.mrb[124].mxu0  ;;  %v2382_v62 = vmul.f32 0.7978846, %v2350_v28  ;;  %6611 = vtanh.f32 %v2381_v17  ;;  %5864 = vmatprep.subr.bf16.mxu0 %v6469_v43 }
 0x2ab   : > { %v5853_v56 = vpop.f32.mrb[125].mxu0  ;;  %v2510_v15 = vpack.c.bf16 %v2474_v0, %v2473_v4  ;;  %v6471_v4 = vld [vmem:[#allocation10 + $0x60] sm:$0xff]  }
 0x2ac   : > { %v6608_v61 = vpop.eup %6607  ;;  %v2288_v40 = vmul.f32 %v2256_v13, %v8299_v44  ;;  %v5854_v60 = vadd.f32 %v5853_v56, %v5852_v22  ;;  %v5855_v9 = vpop.f32.mrb[126].mxu0  ;;  %6613 = vtanh.f32 %v2382_v62  ;;  %v2319_v19 = vmul.f32 %v2287_v1, %v8289_v30  ;;  %v6472_v1 = vld [vmem:[#allocation10 + $0x20] sm:$0xff]   ;;  %v9685_v13 = vld [vmem:[#allocation31_spill] sm:$0xff]  ;;  %v9686_v22 = vld [vmem:[#allocation30_spill] sm:$0xff] }
 0x2ad   : > { %v5856_v46 = vpop.f32.mrb[127].mxu0  ;;  %2828 = vmatprep.mubr.bf16.mxu1 %v2510_v15  ;;  %v2443_v38 = vadd.f32 1.0, %v6608_v61  ;;  %5865 = vmatpush3.bf16.msra.mxu0 %v6470_v52  ;;  %v9687_v62 = vpack.c.bf16 %v9685_v13, %v9686_v22  ;;  %v2223_v56 = vmul.f32 0.5, %v8289_v30  ;;  %v2224_v15 = vmul.f32 0.5, %v8299_v44 }
 0x2ae   : > { %v6610_v27 = vpop.eup %6609  ;;  %v8308_v33 = vadd.f32 %v5854_v60, %v2028_v51  ;;  %v5857_v16 = vadd.f32 %v5856_v46, %v5855_v9  ;;  %2829 = vmatmul.mubr.bf16.gmra.mrb[108].mxu1 %v9681_v2  ;;  %v2320_v58 = vmul.f32 %v2288_v40, %v8299_v44  ;;  %v2351_v29 = vadd.f32 %v2319_v19, %v8289_v30  ;;  %v6473_v40 = vld [vmem:[#allocation10 + $0x68] sm:$0xff]   ;;  %v6475_v46 = vld [vmem:[#allocation10 + $0x70] sm:$0xff]  }
 0x2af   : > { %v2444_v32 = vadd.f32 1.0, %v6610_v27  ;;  %v2475_v12 = vmul.f32 %v2443_v38, %v2219_v34  ;;  %5866 = vmatprep.subr.bf16.mxu0 %v6471_v4  ;;  %v6474_v60 = vld [vmem:[#allocation10 + $0x28] sm:$0xff]   ;;  %v6476_v27 = vld [vmem:[#allocation10 + $0x30] sm:$0xff]   ;;  %v6477_v34 = vld [vmem:[#allocation10 + $0x78] sm:$0xff]  }
 0x2b0   : > { %v2257_v50 = vmul.f32 0.044715, %v8308_v33  ;;  %v8318_v25 = vadd.f32 %v5857_v16, %v2031_v57  ;;  %v2352_v54 = vadd.f32 %v2320_v58, %v8299_v44  ;;  %v2383_v8 = vmul.f32 0.7978846, %v2351_v29  ;;  %v9689_v2 = vld [vmem:[#allocation33_spill] sm:$0xff] }
 0x2b1   : > { %v2476_v21 = vmul.f32 %v2444_v32, %v2220_v48  ;;  %5867 = vmatpush3.bf16.msra.mxu0 %v6472_v1  ;;  %v9690_v30 = vpack.c.bf16 %v9688_v11, %v9689_v2  ;;  %v2225_v44 = vmul.f32 0.5, %v8308_v33  ;;  %v6478_v48 = vld [vmem:[#allocation10 + $0x38] sm:$0xff]  }
 0x2b2   : > { %v2289_v20 = vmul.f32 %v2257_v50, %v8308_v33  ;;  %v2258_v10 = vmul.f32 0.044715, %v8318_v25  ;;  %v2384_v14 = vmul.f32 0.7978846, %v2352_v54  ;;  %6615 = vtanh.f32 %v2383_v8  ;;  %5868 = vmatprep.subr.bf16.mxu0 %v6473_v40  ;;  %v9691_v8 = vld [vmem:[#allocation38_spill] sm:$0xff] }
 0x2b3   : > { %v2511_v42 = vpack.c.bf16 %v2476_v21, %v2475_v12  ;;  %v2226_v58 = vmul.f32 0.5, %v8318_v25  ;;  %v9692_v12 = vld [vmem:[#allocation37_spill] sm:$0xff] }
 0x2b4   : > { %v6612_v3 = vpop.eup %6611  ;;  %v2290_v37 = vmul.f32 %v2258_v10, %v8318_v25  ;;  %6617 = vtanh.f32 %v2384_v14  ;;  %v2321_v18 = vmul.f32 %v2289_v20, %v8308_v33  ;;  %v9693_v21 = vpack.c.bf16 %v9691_v8, %v9692_v12 }
 0x2b5   : > { %2838 = vmatprep.mubr.bf16.mxu1 %v2511_v42  ;;  %v2445_v35 = vadd.f32 1.0, %v6612_v3  ;;  %5869 = vmatpush3.bf16.msra.mxu0 %v6474_v60  ;;  %v9608_v20 = vlaneseq }
 0x2b6   : > { %v6614_v45 = vpop.eup %6613  ;;  %2839 = vmatmul.mubr.bf16.gmra.mrb[112].mxu1 %v9684_v59  ;;  %v2322_v6 = vmul.f32 %v2290_v37, %v8318_v25  ;;  %v2353_v23 = vadd.f32 %v2321_v18, %v8308_v33  ;;  %5870 = vmatprep.subr.bf16.mxu0 %v6475_v46 }
 0x2b7   : > { %v2446_v41 = vadd.f32 1.0, %v6614_v45  ;;  %v2477_v39 = vmul.f32 %v2445_v35, %v2221_v47  ;;  %v8347_v10 = vshrl.u32 %v9608_v20, 7 }
 0x2b8   : > { %v2354_v53 = vadd.f32 %v2322_v6, %v8318_v25  ;;  %v2385_v55 = vmul.f32 0.7978846, %v2353_v23  ;;  %v5303_v25 = vld [vmem:[%s9583_s5 + $0x1] ss:$8 sm:$0x3] }
 0x2b9   : > { %v2478_v28 = vmul.f32 %v2446_v41, %v2222_v31  ;;  %5871 = vmatpush3.bf16.msra.mxu0 %v6476_v27  ;;  %v2518_v33 = vsub.s32 0, %v8347_v10  ;;  %v2522_v14 = vsub.s32 1, %v8347_v10 }
 0x2ba   : > { %v2386_v17 = vmul.f32 0.7978846, %v2354_v53  ;;  %6619 = vtanh.f32 %v2385_v55  ;;  %5872 = vmatprep.subr.bf16.mxu0 %v6477_v34 }
 0x2bb   : > { %v2512_v51 = vpack.c.bf16 %v2478_v28, %v2477_v39  ;;  %v8354_v42 = vrot.slane %v5303_v25, %v2518_v33  ;;  %v8356_v7 = vrot.slane %v5303_v25, %v2522_v14 }
 0x2bc   : > { %v6616_v0 = vpop.eup %6615  ;;  %6621 = vtanh.f32 %v2386_v17 }
 0x2bd   : > { %2848 = vmatprep.mubr.bf16.mxu1 %v2512_v51  ;;  %v2447_v49 = vadd.f32 1.0, %v6616_v0  ;;  %5873 = vmatpush3.bf16.msra.mxu0 %v6478_v48 }
 0x2be   : > { %v6618_v26 = vpop.eup %6617  ;;  %2849 = vmatmul.mubr.bf16.gmra.mrb[116].mxu1 %v9687_v62 }
 0x2bf   : > { %v2448_v61 = vadd.f32 1.0, %v6618_v26  ;;  %v2479_v9 = vmul.f32 %v2447_v49, %v2223_v56 }
 0x2c1   : > { %v2480_v19 = vmul.f32 %v2448_v61, %v2224_v15 }
 0x2c3   : > { %v2513_v57 = vpack.c.bf16 %v2480_v19, %v2479_v9 }
 0x2c4   : > { %v6620_v38 = vpop.eup %6619 }
 0x2c5   : > { %2858 = vmatprep.mubr.bf16.mxu1 %v2513_v57  ;;  %v2449_v16 = vadd.f32 1.0, %v6620_v38 }
 0x2c6   : > { %v6622_v5 = vpop.eup %6621  ;;  %2859 = vmatmul.mubr.bf16.gmra.mrb[120].mxu1 %v9690_v30 }
 0x2c7   : > { %v2450_v29 = vadd.f32 1.0, %v6622_v5  ;;  %v2481_v32 = vmul.f32 %v2449_v16, %v2225_v44 }
 0x2c9   : > { %v2482_v50 = vmul.f32 %v2450_v29, %v2226_v58 }
 0x2cb   : > { %v2514_v54 = vpack.c.bf16 %v2482_v50, %v2481_v32 }
 0x2cd   : > { %2868 = vmatprep.mubr.bf16.mxu1 %v2514_v54 }
 0x2ce   : > { %2869 = vmatmul.mubr.bf16.gmra.mrb[124].mxu1 %v9693_v21 }
 0x329   : > { %v2720_v3 = vpop.f32.mrb[64].mxu1 }
 0x32a   : > { %v2721_v37 = vadd.f32 %v2720_v3, %v8354_v42  ;;  %v2722_v18 = vpop.f32.mrb[65].mxu1 }
 0x32b   : > { %v2723_v63 = vadd.f32 %v2722_v18, %v8356_v7  ;;  %v2724_v35 = vpop.f32.mrb[66].mxu1 }
 0x32c   : > { %v2943_v45 = vmul.f32 0.044715, %v2721_v37  ;;  %v8361_v36 = vadd.f32 %v2724_v35, %v8354_v42  ;;  %v2726_v24 = vpop.f32.mrb[67].mxu1  ;;  %v2879_v12 = vmul.f32 0.5, %v2721_v37 }
 0x32d   : > { %v2944_v59 = vmul.f32 0.044715, %v2723_v63  ;;  %v8364_v6 = vadd.f32 %v2726_v24, %v8356_v7  ;;  %v2880_v25 = vmul.f32 0.5, %v2723_v63 }
 0x32e   : > { %v3007_v23 = vmul.f32 %v2943_v45, %v2721_v37  ;;  %v2945_v47 = vmul.f32 0.044715, %v8361_v36 }
 0x32f   : > { %v3008_v31 = vmul.f32 %v2944_v59, %v2723_v63  ;;  %v2946_v41 = vmul.f32 0.044715, %v8364_v6 }
 0x330   : > { %v3071_v43 = vmul.f32 %v3007_v23, %v2721_v37  ;;  %v3009_v53 = vmul.f32 %v2945_v47, %v8361_v36 }
 0x331   : > { %v3072_v55 = vmul.f32 %v3008_v31, %v2723_v63  ;;  %v3010_v52 = vmul.f32 %v2946_v41, %v8364_v6  ;;  %v2730_v39 = vpop.f32.mrb[68].mxu1  ;;  %v2881_v41 = vmul.f32 0.5, %v8361_v36 }
 0x332   : > { %v3135_v28 = vadd.f32 %v3071_v43, %v2721_v37  ;;  %v3073_v17 = vmul.f32 %v3009_v53, %v8361_v36  ;;  %v8372_v51 = vadd.f32 %v2730_v39, %v8354_v42  ;;  %v2732_v4 = vpop.f32.mrb[69].mxu1  ;;  %v2882_v43 = vmul.f32 0.5, %v8364_v6 }
 0x333   : > { %v3074_v0 = vmul.f32 %v3010_v52, %v8364_v6  ;;  %v2733_v1 = vadd.f32 %v2732_v4, %v8356_v7  ;;  %v2734_v49 = vpop.f32.mrb[70].mxu1  ;;  %v3136_v26 = vadd.f32 %v3072_v55, %v2723_v63 }
 0x334   : > { %v3199_v13 = vmul.f32 0.7978846, %v3135_v28  ;;  %v3137_v22 = vadd.f32 %v3073_v17, %v8361_v36  ;;  %v2947_v62 = vmul.f32 0.044715, %v8372_v51  ;;  %v8379_v56 = vadd.f32 %v2734_v49, %v8354_v42  ;;  %v2736_v15 = vpop.f32.mrb[71].mxu1 }
 0x335   : > { %v2948_v61 = vmul.f32 0.044715, %v2733_v1  ;;  %v2737_v40 = vadd.f32 %v2736_v15, %v8356_v7  ;;  %v3138_v60 = vadd.f32 %v3074_v0, %v8364_v6  ;;  %v3200_v9 = vmul.f32 0.7978846, %v3136_v26 }
 0x336   : > { %6623 = vtanh.f32 %v3199_v13  ;;  %v3201_v19 = vmul.f32 0.7978846, %v3137_v22  ;;  %v3011_v57 = vmul.f32 %v2947_v62, %v8372_v51  ;;  %v2949_v46 = vmul.f32 0.044715, %v8379_v56 }
 0x337   : > { %v3012_v38 = vmul.f32 %v2948_v61, %v2733_v1  ;;  %v2950_v27 = vmul.f32 0.044715, %v2737_v40  ;;  %v3202_v16 = vmul.f32 0.7978846, %v3138_v60  ;;  %6625 = vtanh.f32 %v3200_v9 }
 0x338   : > { %6627 = vtanh.f32 %v3201_v19  ;;  %v3075_v5 = vmul.f32 %v3011_v57, %v8372_v51  ;;  %v3013_v11 = vmul.f32 %v2949_v46, %v8379_v56  ;;  %v8408_v53 = vmul.f32 0.5, %v2733_v1 }
 0x339   : > { %v3076_v2 = vmul.f32 %v3012_v38, %v2733_v1  ;;  %v3014_v30 = vmul.f32 %v2950_v27, %v2737_v40  ;;  %v2740_v44 = vpop.f32.mrb[72].mxu1  ;;  %6629 = vtanh.f32 %v3202_v16  ;;  %v2886_v13 = vmul.f32 0.5, %v2737_v40 }
 0x33a   : > { %v3077_v58 = vmul.f32 %v3013_v11, %v8379_v56  ;;  %v8389_v29 = vadd.f32 %v2740_v44, %v8354_v42  ;;  %v2742_v34 = vpop.f32.mrb[73].mxu1  ;;  %v3139_v8 = vadd.f32 %v3075_v5, %v8372_v51  ;;  %v2883_v19 = vmul.f32 0.5, %v8372_v51 }
 0x33b   : > { %v3078_v48 = vmul.f32 %v3014_v30, %v2737_v40  ;;  %v8392_v32 = vadd.f32 %v2742_v34, %v8356_v7  ;;  %v2744_v50 = vpop.f32.mrb[74].mxu1  ;;  %v3140_v54 = vadd.f32 %v3076_v2, %v2733_v1 }
 0x33c   : > { %v8396_v21 = vadd.f32 %v2744_v50, %v8354_v42  ;;  %v2746_v33 = vpop.f32.mrb[75].mxu1  ;;  %v3141_v14 = vadd.f32 %v3077_v58, %v8379_v56  ;;  %v2951_v24 = vmul.f32 0.044715, %v8389_v29  ;;  %v3203_v59 = vmul.f32 0.7978846, %v3139_v8 }
 0x33d   : > { %v2952_v3 = vmul.f32 0.044715, %v8392_v32  ;;  %v8401_v18 = vadd.f32 %v2746_v33, %v8356_v7  ;;  %v3142_v35 = vadd.f32 %v3078_v48, %v2737_v40  ;;  %v3204_v45 = vmul.f32 0.7978846, %v3140_v54 }
 0x33e   : > { %v3205_v23 = vmul.f32 0.7978846, %v3141_v14  ;;  %v2953_v52 = vmul.f32 0.044715, %v8396_v21  ;;  %v3015_v6 = vmul.f32 %v2951_v24, %v8389_v29  ;;  %v2885_v40 = vmul.f32 0.5, %v8379_v56 }
 0x33f   : > { %v3016_v37 = vmul.f32 %v2952_v3, %v8392_v32  ;;  %v2954_v47 = vmul.f32 0.044715, %v8401_v18  ;;  %v3206_v31 = vmul.f32 0.7978846, %v3142_v35  ;;  %6631 = vtanh.f32 %v3204_v45 }
 0x340   : > { %v6624_v63 = vpop.eup %6623  ;;  %6633 = vtanh.f32 %v3203_v59  ;;  %v3017_v57 = vmul.f32 %v2953_v52, %v8396_v21  ;;  %v8429_v2 = vmul.f32 0.5, %v8389_v29  ;;  %v3079_v30 = vmul.f32 %v3015_v6, %v8389_v29 }
 0x341   : > { %v6626_v55 = vpop.eup %6625  ;;  %v3018_v39 = vmul.f32 %v2954_v47, %v8401_v18  ;;  %v2750_v28 = vpop.f32.mrb[76].mxu1  ;;  %v3327_v17 = vadd.f32 1.0, %v6624_v63  ;;  %6635 = vtanh.f32 %v3206_v31  ;;  %v3080_v0 = vmul.f32 %v3016_v37, %v8392_v32 }
 0x342   : > { %v6628_v4 = vpop.eup %6627  ;;  %v2752_v49 = vpop.f32.mrb[77].mxu1  ;;  %v3328_v26 = vadd.f32 1.0, %v6626_v55  ;;  %6637 = vtanh.f32 %v3205_v23  ;;  %v8416_v22 = vadd.f32 %v2750_v28, %v8354_v42  ;;  %v3081_v8 = vmul.f32 %v3017_v57, %v8396_v21 }
 0x343   : > { %v6630_v36 = vpop.eup %6629  ;;  %v3082_v1 = vmul.f32 %v3018_v39, %v8401_v18  ;;  %v2754_v62 = vpop.f32.mrb[78].mxu1  ;;  %v3329_v15 = vadd.f32 1.0, %v6628_v4  ;;  %v8419_v61 = vadd.f32 %v2752_v49, %v8356_v7  ;;  %v3391_v38 = vmul.f32 %v3327_v17, %v2879_v12 }
 0x344   : > { %v2756_v60 = vpop.f32.mrb[79].mxu1  ;;  %v3330_v9 = vadd.f32 1.0, %v6630_v36  ;;  %v3392_v16 = vmul.f32 %v3328_v26, %v2880_v25  ;;  %v3144_v11 = vadd.f32 %v3080_v0, %v8392_v32  ;;  %v2955_v51 = vmul.f32 0.044715, %v8416_v22 }
 0x345   : > { %v8425_v46 = vadd.f32 %v2756_v60, %v8356_v7  ;;  %v3393_v27 = vmul.f32 %v3329_v15, %v2881_v41  ;;  %v3146_v56 = vadd.f32 %v3082_v1, %v8401_v18  ;;  %v2956_v58 = vmul.f32 0.044715, %v8419_v61 }
 0x346   : > { %v3394_v5 = vmul.f32 %v3330_v9, %v2882_v43  ;;  %v3208_v50 = vmul.f32 0.7978846, %v3144_v11  ;;  %v8438_v12 = vadd.f32 %v2754_v62, %v8354_v42  ;;  %v8441_v25 = vmul.f32 0.5, %v8392_v32 }
 0x347   : > { %v3455_v44 = vpack.c.bf16 %v3393_v27, %v3391_v38  ;;  %v2958_v34 = vmul.f32 0.044715, %v8425_v46  ;;  %v3210_v14 = vmul.f32 0.7978846, %v3146_v56  ;;  %v8447_v59 = vmul.f32 0.5, %v8401_v18 }
 0x348   : > { %v3456_v48 = vpack.c.bf16 %v3394_v5, %v3392_v16  ;;  %6639 = vtanh.f32 %v3208_v50  ;;  %v3019_v37 = vmul.f32 %v2955_v51, %v8416_v22  ;;  %v3020_v41 = vmul.f32 %v2956_v58, %v8419_v61 }
 0x349   : > { %v6632_v54 = vpop.eup %6631  ;;  %v2760_v33 = vpop.f32.mrb[80].mxu1  ;;  %6641 = vtanh.f32 %v3210_v14  ;;  %v3022_v43 = vmul.f32 %v2958_v34, %v8425_v46  ;;  %v2957_v39 = vmul.f32 0.044715, %v8438_v12  ;;  %v3143_v36 = vadd.f32 %v3079_v30, %v8389_v29 }
 0x34a   : > { %v6634_v3 = vpop.eup %6633  ;;  %v8444_v35 = vadd.f32 %v2760_v33, %v8354_v42  ;;  %v2762_v45 = vpop.f32.mrb[81].mxu1  ;;  %3615 = vmatprep.mubr.bf16.mxu0 %v3456_v48  ;;  %v3332_v24 = vadd.f32 1.0, %v6632_v54  ;;  %v3145_v15 = vadd.f32 %v3081_v8, %v8396_v21  ;;  %v3084_v60 = vmul.f32 %v3020_v41, %v8419_v61 }
 0x34b   : > { %v6636_v23 = vpop.eup %6635  ;;  %v8451_v47 = vadd.f32 %v2762_v45, %v8356_v7  ;;  %v2764_v32 = vpop.f32.mrb[82].mxu1  ;;  %3616 = vmatmul.mubr.bf16.vlgmr.msra.gmra.mrb[128].mxu0 %v3455_v44  ;;  %v3331_v31 = vadd.f32 1.0, %v6634_v3  ;;  %v3086_v9 = vmul.f32 %v3022_v43, %v8425_v46  ;;  %v3207_v38 = vmul.f32 0.7978846, %v3143_v36 }
 0x34c   : > { %v6638_v63 = vpop.eup %6637  ;;  %v8456_v55 = vadd.f32 %v2764_v32, %v8354_v42  ;;  %v2766_v18 = vpop.f32.mrb[83].mxu1  ;;  %v3334_v52 = vadd.f32 1.0, %v6636_v23  ;;  %v2959_v28 = vmul.f32 0.044715, %v8444_v35  ;;  %v3396_v49 = vmul.f32 %v3332_v24, %v8408_v53 }
 0x34d   : > { %v8461_v17 = vadd.f32 %v2766_v18, %v8356_v7  ;;  %v3333_v4 = vadd.f32 1.0, %v6638_v63  ;;  %v2960_v0 = vmul.f32 0.044715, %v8451_v47  ;;  %v3395_v1 = vmul.f32 %v3331_v31, %v2883_v19 }
 0x34e   : > { %v3398_v26 = vmul.f32 %v3334_v52, %v2886_v13  ;;  %v2961_v6 = vmul.f32 0.044715, %v8456_v55  ;;  %v3021_v27 = vmul.f32 %v2957_v39, %v8438_v12  ;;  %v3209_v5 = vmul.f32 0.7978846, %v3145_v15 }
 0x34f   : > { %v3397_v62 = vmul.f32 %v3333_v4, %v2885_v40  ;;  %v2962_v16 = vmul.f32 0.044715, %v8461_v17  ;;  %v3083_v29 = vmul.f32 %v3019_v37, %v8416_v22  ;;  %v3023_v19 = vmul.f32 %v2959_v28, %v8444_v35 }
 0x350   : > { %v3458_v57 = vpack.c.bf16 %v3398_v26, %v3396_v49  ;;  %6643 = vtanh.f32 %v3207_v38  ;;  %v3024_v30 = vmul.f32 %v2960_v0, %v8451_v47  ;;  %v3025_v51 = vmul.f32 %v2961_v6, %v8456_v55 }
 0x351   : > { %v2770_v53 = vpop.f32.mrb[84].mxu1  ;;  %v3457_v13 = vpack.c.bf16 %v3397_v62, %v3395_v1  ;;  %6645 = vtanh.f32 %v3209_v5  ;;  %v2889_v50 = vmul.f32 0.5, %v8396_v21  ;;  %v3148_v54 = vadd.f32 %v3084_v60, %v8419_v61 }
 0x352   : > { %v8475_v40 = vadd.f32 %v2770_v53, %v8354_v42  ;;  %v2772_v11 = vpop.f32.mrb[85].mxu1  ;;  %3623 = vmatprep.mubr.bf16.mxu0 %v3458_v57  ;;  %v6640_v58 = vpop.eup %6639  ;;  %v3150_v8 = vadd.f32 %v3086_v9, %v8425_v46  ;;  %v3085_v14 = vmul.f32 %v3021_v27, %v8438_v12  ;;  %v3026_v3 = vmul.f32 %v2962_v16, %v8461_v17 }
 0x353   : > { %v8480_v44 = vadd.f32 %v2772_v11, %v8356_v7  ;;  %v2774_v56 = vpop.f32.mrb[86].mxu1  ;;  %3624 = vmatmul.mubr.bf16.gmra.mrb[132].mxu0 %v3457_v13  ;;  %v6642_v33 = vpop.eup %6641  ;;  %v3336_v24 = vadd.f32 1.0, %v6640_v58  ;;  %v8494_v23 = vmul.f32 %v3023_v19, %v8444_v35  ;;  %v3212_v21 = vmul.f32 0.7978846, %v3148_v54 }
 0x354   : > { %v8483_v34 = vadd.f32 %v2774_v56, %v8354_v42  ;;  %v2776_v48 = vpop.f32.mrb[87].mxu1  ;;  %v2963_v37 = vmul.f32 0.044715, %v8475_v40  ;;  %v3338_v32 = vadd.f32 1.0, %v6642_v33  ;;  %v3088_v31 = vmul.f32 %v3024_v30, %v8451_v47 }
 0x355   : > { %v8491_v45 = vadd.f32 %v2776_v48, %v8356_v7  ;;  %v8499_v63 = vmul.f32 %v3025_v51, %v8456_v55  ;;  %v2964_v41 = vmul.f32 0.044715, %v8480_v44  ;;  %v3214_v43 = vmul.f32 0.7978846, %v3150_v8 }
 0x356   : > { %v2965_v18 = vmul.f32 0.044715, %v8483_v34  ;;  %v3400_v52 = vmul.f32 %v3336_v24, %v8441_v25  ;;  %v3402_v39 = vmul.f32 %v3338_v32, %v8447_v59  ;;  %6647 = vtanh.f32 %v3212_v21 }
 0x357   : > { %v3090_v28 = vmul.f32 %v3026_v3, %v8461_v17  ;;  %v2966_v4 = vmul.f32 0.044715, %v8491_v45  ;;  %v8508_v49 = vmul.f32 0.5, %v8419_v61  ;;  %6649 = vtanh.f32 %v3214_v43 }
 0x358   : > { %v3027_v26 = vmul.f32 %v2963_v37, %v8475_v40  ;;  %v3460_v1 = vpack.c.bf16 %v3402_v39, %v3400_v52  ;;  %v3147_v25 = vadd.f32 %v3083_v29, %v8416_v22  ;;  %v3028_v59 = vmul.f32 %v2964_v41, %v8480_v44 }
 0x359   : > { %v2780_v0 = vpop.f32.mrb[88].mxu1  ;;  %v2894_v60 = vmul.f32 0.5, %v8425_v46  ;;  %v3149_v61 = vadd.f32 %v3085_v14, %v8438_v12  ;;  %v3029_v57 = vmul.f32 %v2965_v18, %v8483_v34  ;;  %v8526_v16 = vmul.f32 0.5, %v8416_v22 }
 0x35a   : > { %v8512_v36 = vadd.f32 %v2780_v0, %v8354_v42  ;;  %v2782_v6 = vpop.f32.mrb[89].mxu1  ;;  %v6644_v9 = vpop.eup %6643  ;;  %3631 = vmatprep.mubr.bf16.mxu0 %v3460_v1  ;;  %v3211_v53 = vmul.f32 0.7978846, %v3147_v25  ;;  %v3030_v5 = vmul.f32 %v2966_v4, %v8491_v45  ;;  %v8533_v11 = vmul.f32 %v3027_v26, %v8475_v40 }
 0x35b   : > { %v8517_v62 = vadd.f32 %v2782_v6, %v8356_v7  ;;  %v2784_v15 = vpop.f32.mrb[90].mxu1  ;;  %v6646_v13 = vpop.eup %6645  ;;  %v3335_v29 = vadd.f32 1.0, %v6644_v9  ;;  %v3213_v19 = vmul.f32 0.7978846, %v3149_v61  ;;  %v8537_v56 = vmul.f32 %v3028_v59, %v8480_v44 }
 0x35c   : > { %v8523_v38 = vadd.f32 %v2784_v15, %v8354_v42  ;;  %v2786_v27 = vpop.f32.mrb[91].mxu1  ;;  %v2967_v30 = vmul.f32 0.044715, %v8512_v36  ;;  %v3337_v51 = vadd.f32 1.0, %v6646_v13  ;;  %6651 = vtanh.f32 %v3211_v53 }
 0x35d   : > { %v8530_v46 = vadd.f32 %v2786_v27, %v8356_v7  ;;  %v2968_v22 = vmul.f32 0.044715, %v8517_v62  ;;  %6653 = vtanh.f32 %v3213_v19  ;;  %v3399_v48 = vmul.f32 %v3335_v29, %v8429_v2 }
 0x35e   : > { %v2969_v58 = vmul.f32 0.044715, %v8523_v38  ;;  %v3401_v54 = vmul.f32 %v3337_v51, %v2889_v50  ;;  %v3152_v33 = vadd.f32 %v3088_v31, %v8451_v47  ;;  %v8545_v14 = vmul.f32 %v3029_v57, %v8483_v34 }
 0x35f   : > { %v2970_v8 = vmul.f32 0.044715, %v8530_v46  ;;  %v8548_v3 = vmul.f32 %v3030_v5, %v8491_v45  ;;  %v2893_v37 = vmul.f32 0.5, %v8438_v12  ;;  %v3154_v32 = vadd.f32 %v3090_v28, %v8461_v17 }
 0x360   : > { %v6648_v21 = vpop.eup %6647  ;;  %v3031_v41 = vmul.f32 %v2967_v30, %v8512_v36  ;;  %v3459_v2 = vpack.c.bf16 %v3401_v54, %v3399_v48  ;;  %v3216_v31 = vmul.f32 0.7978846, %v3152_v33  ;;  %v3032_v52 = vmul.f32 %v2968_v22, %v8517_v62 }
 0x361   : > { %v2790_v24 = vpop.f32.mrb[92].mxu1  ;;  %v6650_v18 = vpop.eup %6649  ;;  %v3340_v4 = vadd.f32 1.0, %v6648_v21  ;;  %v3218_v12 = vmul.f32 0.7978846, %v3154_v32  ;;  %v3033_v28 = vmul.f32 %v2969_v58, %v8523_v38  ;;  %v3034_v26 = vmul.f32 %v2970_v8, %v8530_v46 }
 0x362   : > { %v8554_v50 = vadd.f32 %v2790_v24, %v8354_v42  ;;  %v2792_v43 = vpop.f32.mrb[93].mxu1  ;;  %3632 = vmatmul.mubr.bf16.gmra.mrb[136].mxu0 %v3459_v2  ;;  %v3342_v6 = vadd.f32 1.0, %v6650_v18  ;;  %6655 = vtanh.f32 %v3216_v31  ;;  %v2896_v59 = vmul.f32 0.5, %v8451_v47 }
 0x363   : > { %v8558_v39 = vadd.f32 %v2792_v43, %v8356_v7  ;;  %v2794_v0 = vpop.f32.mrb[94].mxu1  ;;  %v2898_v15 = vmul.f32 0.5, %v8461_v17  ;;  %6657 = vtanh.f32 %v3218_v12  ;;  %v8566_v61 = vmul.f32 %v3031_v41, %v8512_v36 }
 0x364   : > { %v2796_v1 = vpop.f32.mrb[95].mxu1  ;;  %v2971_v25 = vmul.f32 0.044715, %v8554_v50  ;;  %v3404_v9 = vmul.f32 %v3340_v4, %v8508_v49  ;;  %v3406_v57 = vmul.f32 %v3342_v6, %v2894_v60  ;;  %v8570_v27 = vadd.f32 %v2794_v0, %v8354_v42 }
 0x365   : > { %v8573_v53 = vmul.f32 %v3032_v52, %v8517_v62  ;;  %v2972_v13 = vmul.f32 0.044715, %v8558_v39  ;;  %v3151_v47 = vadd.f32 %v8494_v23, %v8444_v35  ;;  %v3153_v17 = vadd.f32 %v8499_v63, %v8456_v55 }
 0x366   : > { %v6652_v5 = vpop.eup %6651  ;;  %v8581_v29 = vmul.f32 %v3033_v28, %v8523_v38  ;;  %v8584_v49 = vmul.f32 %v3034_v26, %v8530_v46  ;;  %v3462_v60 = vpack.c.bf16 %v3406_v57, %v3404_v9  ;;  %v8587_v19 = vmul.f32 0.5, %v8444_v35 }
 0x367   : > { %v6654_v30 = vpop.eup %6653  ;;  %v3035_v51 = vmul.f32 %v2971_v25, %v8554_v50  ;;  %v3339_v22 = vadd.f32 1.0, %v6652_v5  ;;  %v8591_v23 = vadd.f32 %v2796_v1, %v8356_v7  ;;  %v3215_v63 = vmul.f32 0.7978846, %v3151_v47 }
 0x368   : > { %3639 = vmatprep.mubr.bf16.mxu0 %v3462_v60  ;;  %v2973_v48 = vmul.f32 0.044715, %v8570_v27  ;;  %v3341_v54 = vadd.f32 1.0, %v6654_v30  ;;  %v3217_v24 = vmul.f32 0.7978846, %v3153_v17  ;;  %v3036_v35 = vmul.f32 %v2972_v13, %v8558_v39 }
 0x369   : > { %v2800_v58 = vpop.f32.mrb[96].mxu1  ;;  %v8602_v41 = vmul.f32 0.5, %v8456_v55  ;;  %6659 = vtanh.f32 %v3215_v63  ;;  %v3403_v2 = vmul.f32 %v3339_v22, %v8526_v16  ;;  %v2974_v52 = vmul.f32 0.044715, %v8591_v23 }
 0x36a   : > { %v8595_v8 = vadd.f32 %v2800_v58, %v8354_v42  ;;  %v2802_v33 = vpop.f32.mrb[97].mxu1  ;;  %v3405_v43 = vmul.f32 %v3341_v54, %v2893_v37  ;;  %6661 = vtanh.f32 %v3217_v24  ;;  %v3156_v55 = vadd.f32 %v8537_v56, %v8480_v44 }
 0x36b   : > { %v8599_v32 = vadd.f32 %v2802_v33, %v8356_v7  ;;  %v2804_v21 = vpop.f32.mrb[98].mxu1  ;;  %v3158_v26 = vadd.f32 %v8548_v3, %v8491_v45  ;;  %v3037_v1 = vmul.f32 %v2973_v48, %v8570_v27  ;;  %v8622_v13 = vmul.f32 %v3035_v51, %v8554_v50 }
 0x36c   : > { %v8606_v31 = vadd.f32 %v2804_v21, %v8354_v42  ;;  %v2806_v18 = vpop.f32.mrb[99].mxu1  ;;  %v2975_v4 = vmul.f32 0.044715, %v8595_v8  ;;  %v6656_v12 = vpop.eup %6655  ;;  %v3461_v28 = vpack.c.bf16 %v3405_v43, %v3403_v2  ;;  %v3220_v57 = vmul.f32 0.7978846, %v3156_v55 }
 0x36d   : > { %v8611_v0 = vadd.f32 %v2806_v18, %v8356_v7  ;;  %v2976_v16 = vmul.f32 0.044715, %v8599_v32  ;;  %v6658_v6 = vpop.eup %6657  ;;  %v3344_v25 = vadd.f32 1.0, %v6656_v12  ;;  %v8625_v47 = vmul.f32 0.5, %v8480_v44 }
 0x36e   : > { %v2977_v37 = vmul.f32 0.044715, %v8606_v31  ;;  %3640 = vmatmul.mubr.bf16.gmra.mrb[140].mxu0 %v3461_v28  ;;  %v3346_v56 = vadd.f32 1.0, %v6658_v6  ;;  %v3222_v17 = vmul.f32 0.7978846, %v3158_v26  ;;  %v8628_v5 = vmul.f32 %v3036_v35, %v8558_v39 }
 0x36f   : > { %v2978_v9 = vmul.f32 0.044715, %v8611_v0  ;;  %v3038_v3 = vmul.f32 %v2974_v52, %v8591_v23  ;;  %v3039_v60 = vmul.f32 %v2975_v4, %v8595_v8  ;;  %6663 = vtanh.f32 %v3220_v57 }
 0x370   : > { %v3408_v22 = vmul.f32 %v3344_v25, %v2896_v59  ;;  %v3410_v58 = vmul.f32 %v3346_v56, %v2898_v15  ;;  %6665 = vtanh.f32 %v3222_v17  ;;  %v8636_v44 = vmul.f32 %v3037_v1, %v8570_v27 }
 0x371   : > { %v2810_v30 = vpop.f32.mrb[100].mxu1  ;;  %v3040_v48 = vmul.f32 %v2976_v16, %v8599_v32  ;;  %v3041_v54 = vmul.f32 %v2977_v37, %v8606_v31  ;;  %v3042_v33 = vmul.f32 %v2978_v9, %v8611_v0  ;;  %v3155_v15 = vadd.f32 %v8533_v11, %v8475_v40 }
 0x372   : > { %v8633_v51 = vadd.f32 %v2810_v30, %v8354_v42  ;;  %v2812_v63 = vpop.f32.mrb[101].mxu1  ;;  %v3464_v35 = vpack.c.bf16 %v3410_v58, %v3408_v22  ;;  %v8650_v18 = vmul.f32 %v3038_v3, %v8591_v23  ;;  %v2902_v52 = vmul.f32 0.5, %v8491_v45 }
 0x373   : > { %v2814_v24 = vpop.f32.mrb[102].mxu1  ;;  %v8642_v21 = vadd.f32 %v2812_v63, %v8356_v7  ;;  %v6660_v43 = vpop.eup %6659  ;;  %v3157_v4 = vadd.f32 %v8545_v14, %v8483_v34  ;;  %v8659_v28 = vmul.f32 %v3039_v60, %v8595_v8  ;;  %v3219_v37 = vmul.f32 0.7978846, %v3155_v15 }
 0x374   : > { %v8645_v59 = vadd.f32 %v2814_v24, %v8354_v42  ;;  %v2816_v2 = vpop.f32.mrb[103].mxu1  ;;  %v6662_v12 = vpop.eup %6661  ;;  %3647 = vmatprep.mubr.bf16.mxu0 %v3464_v35  ;;  %v3343_v16 = vadd.f32 1.0, %v6660_v43  ;;  %v2979_v11 = vmul.f32 0.044715, %v8633_v51  ;;  %v8663_v26 = vmul.f32 %v3040_v48, %v8599_v32 }
 0x375   : > { %v8656_v55 = vadd.f32 %v2816_v2, %v8356_v7  ;;  %v8666_v45 = vmul.f32 %v3041_v54, %v8606_v31  ;;  %v3345_v6 = vadd.f32 1.0, %v6662_v12  ;;  %v3221_v14 = vmul.f32 0.7978846, %v3157_v4 }
 0x376   : > { %v8669_v1 = vmul.f32 %v3042_v33, %v8611_v0  ;;  %v2980_v25 = vmul.f32 0.044715, %v8642_v21  ;;  %v2981_v9 = vmul.f32 0.044715, %v8645_v59  ;;  %6667 = vtanh.f32 %v3219_v37 }
 0x377   : > { %v3407_v57 = vmul.f32 %v3343_v16, %v8587_v19  ;;  %v3409_v56 = vmul.f32 %v3345_v6, %v8602_v41  ;;  %6669 = vtanh.f32 %v3221_v14  ;;  %v2982_v17 = vmul.f32 0.044715, %v8656_v55 }
 0x378   : > { %v3043_v60 = vmul.f32 %v2979_v11, %v8633_v51  ;;  %v2899_v30 = vmul.f32 0.5, %v8475_v40  ;;  %v3160_v63 = vadd.f32 %v8573_v53, %v8517_v62  ;;  %v2901_v19 = vmul.f32 0.5, %v8483_v34 }
 0x379   : > { %v2820_v3 = vpop.f32.mrb[104].mxu1  ;;  %v6664_v48 = vpop.eup %6663  ;;  %v3463_v54 = vpack.c.bf16 %v3409_v56, %v3407_v57  ;;  %v3162_v33 = vadd.f32 %v8584_v49, %v8530_v46  ;;  %v3044_v40 = vmul.f32 %v2980_v25, %v8642_v21  ;;  %v3045_v2 = vmul.f32 %v2981_v9, %v8645_v59 }
 0x37a   : > { %v8679_v22 = vadd.f32 %v2820_v3, %v8354_v42  ;;  %v2822_v58 = vpop.f32.mrb[105].mxu1  ;;  %v6666_v35 = vpop.eup %6665  ;;  %v3348_v15 = vadd.f32 1.0, %v6664_v48  ;;  %v3224_v43 = vmul.f32 0.7978846, %v3160_v63  ;;  %v3046_v12 = vmul.f32 %v2982_v17, %v8656_v55 }
 0x37b   : > { %v8685_v41 = vadd.f32 %v2822_v58, %v8356_v7  ;;  %v2824_v24 = vpop.f32.mrb[106].mxu1  ;;  %3648 = vmatmul.mubr.bf16.gmra.mrb[144].mxu0 %v3463_v54  ;;  %v3350_v53 = vadd.f32 1.0, %v6666_v35  ;;  %v8693_v34 = vmul.f32 0.5, %v8517_v62  ;;  %v3226_v16 = vmul.f32 0.7978846, %v3162_v33 }
 0x37c   : > { %v2826_v4 = vpop.f32.mrb[107].mxu1  ;;  %v8696_v11 = vmul.f32 %v3043_v60, %v8633_v51  ;;  %v2983_v49 = vmul.f32 0.044715, %v8679_v22  ;;  %6671 = vtanh.f32 %v3224_v43  ;;  %v8700_v37 = vadd.f32 %v2824_v24, %v8354_v42 }
 0x37d   : > { %v3412_v6 = vmul.f32 %v3348_v15, %v8625_v47  ;;  %v3414_v14 = vmul.f32 %v3350_v53, %v2902_v52  ;;  %v2984_v25 = vmul.f32 0.044715, %v8685_v41  ;;  %6673 = vtanh.f32 %v3226_v16 }
 0x37e   : > { %v8705_v9 = vmul.f32 %v3044_v40, %v8642_v21  ;;  %v8708_v62 = vmul.f32 %v3045_v2, %v8645_v59  ;;  %v3159_v57 = vadd.f32 %v8566_v61, %v8512_v36  ;;  %v3161_v56 = vadd.f32 %v8581_v29, %v8523_v38 }
 0x37f   : > { %v3466_v17 = vpack.c.bf16 %v3414_v14, %v3412_v6  ;;  %v8715_v3 = vmul.f32 %v3046_v12, %v8656_v55  ;;  %v2906_v47 = vmul.f32 0.5, %v8530_v46  ;;  %v8719_v52 = vadd.f32 %v2826_v4, %v8356_v7 }
 0x380   : > { %v6668_v58 = vpop.eup %6667  ;;  %v3047_v63 = vmul.f32 %v2983_v49, %v8679_v22  ;;  %v3223_v48 = vmul.f32 0.7978846, %v3159_v57  ;;  %v3225_v54 = vmul.f32 0.7978846, %v3161_v56  ;;  %v3048_v35 = vmul.f32 %v2984_v25, %v8685_v41 }
 0x381   : > { %v2830_v60 = vpop.f32.mrb[108].mxu1  ;;  %v6670_v29 = vpop.eup %6669  ;;  %3655 = vmatprep.mubr.bf16.mxu0 %v3466_v17  ;;  %v3347_v24 = vadd.f32 1.0, %v6668_v58  ;;  %v2985_v46 = vmul.f32 0.044715, %v8700_v37  ;;  %v8731_v43 = vmul.f32 0.5, %v8512_v36  ;;  %v3164_v4 = vadd.f32 %v8628_v5, %v8558_v39 }
 0x382   : > { %v8723_v61 = vadd.f32 %v2830_v60, %v8354_v42  ;;  %v2832_v33 = vpop.f32.mrb[109].mxu1  ;;  %v3349_v2 = vadd.f32 1.0, %v6670_v29  ;;  %6675 = vtanh.f32 %v3223_v48  ;;  %v8736_v12 = vmul.f32 0.5, %v8523_v38 }
 0x383   : > { %v8728_v40 = vadd.f32 %v2832_v33, %v8356_v7  ;;  %v2834_v15 = vpop.f32.mrb[110].mxu1  ;;  %6677 = vtanh.f32 %v3225_v54  ;;  %v2986_v16 = vmul.f32 0.044715, %v8719_v52  ;;  %v3411_v6 = vmul.f32 %v3347_v24, %v2899_v30 }
 0x384   : > { %v2836_v53 = vpop.f32.mrb[111].mxu1  ;;  %v2987_v49 = vmul.f32 0.044715, %v8723_v61  ;;  %v3413_v14 = vmul.f32 %v3349_v2, %v2901_v19  ;;  %v3166_v25 = vadd.f32 %v8650_v18, %v8591_v23  ;;  %v3228_v36 = vmul.f32 0.7978846, %v3164_v4 }
 0x385   : > { %v8743_v57 = vmul.f32 %v3047_v63, %v8679_v22  ;;  %v8746_v5 = vmul.f32 %v3048_v35, %v8685_v41  ;;  %v3049_v38 = vmul.f32 %v2985_v46, %v8700_v37  ;;  %v2988_v56 = vmul.f32 0.044715, %v8728_v40 }
 0x386   : > { %v6672_v17 = vpop.eup %6671  ;;  %v3465_v60 = vpack.c.bf16 %v3413_v14, %v3411_v6  ;;  %v8751_v58 = vmul.f32 0.5, %v8558_v39  ;;  %v3230_v30 = vmul.f32 0.7978846, %v3166_v25  ;;  %6679 = vtanh.f32 %v3228_v36 }
 0x387   : > { %v6674_v19 = vpop.eup %6673  ;;  %v3352_v18 = vadd.f32 1.0, %v6672_v17  ;;  %v3050_v48 = vmul.f32 %v2986_v16, %v8719_v52  ;;  %v3051_v63 = vmul.f32 %v2987_v49, %v8723_v61  ;;  %v8756_v54 = vadd.f32 %v2834_v15, %v8354_v42 }
 0x388   : > { %3656 = vmatmul.mubr.bf16.gmra.mrb[148].mxu0 %v3465_v60  ;;  %v3354_v29 = vadd.f32 1.0, %v6674_v19  ;;  %6681 = vtanh.f32 %v3230_v30  ;;  %v3163_v24 = vadd.f32 %v8622_v13, %v8554_v50  ;;  %v3165_v39 = vadd.f32 %v8636_v44, %v8570_v27 }
 0x389   : > { %v2840_v33 = vpop.f32.mrb[112].mxu1  ;;  %v8763_v46 = vmul.f32 %v3049_v38, %v8700_v37  ;;  %v3052_v2 = vmul.f32 %v2988_v56, %v8728_v40  ;;  %v8767_v4 = vadd.f32 %v2836_v53, %v8356_v7  ;;  %v3416_v49 = vmul.f32 %v3352_v18, %v8693_v34 }
 0x38a   : > { %v2842_v35 = vpop.f32.mrb[113].mxu1  ;;  %v8770_v15 = vadd.f32 %v2840_v33, %v8354_v42  ;;  %v3418_v6 = vmul.f32 %v3354_v29, %v2906_v47  ;;  %v3227_v13 = vmul.f32 0.7978846, %v3163_v24  ;;  %v3229_v14 = vmul.f32 0.7978846, %v3165_v39 }
 0x38b   : > { %v2844_v16 = vpop.f32.mrb[114].mxu1  ;;  %v8774_v44 = vmul.f32 %v3050_v48, %v8719_v52  ;;  %v2910_v36 = vmul.f32 0.5, %v8591_v23  ;;  %v2989_v38 = vmul.f32 0.044715, %v8756_v54  ;;  %v8779_v53 = vadd.f32 %v2842_v35, %v8356_v7 }
 0x38c   : > { %v2846_v25 = vpop.f32.mrb[115].mxu1  ;;  %v6676_v56 = vpop.eup %6675  ;;  %v3468_v17 = vpack.c.bf16 %v3418_v6, %v3416_v49  ;;  %v8782_v60 = vmul.f32 %v3051_v63, %v8723_v61  ;;  %v8785_v34 = vmul.f32 0.5, %v8554_v50  ;;  %6683 = vtanh.f32 %v3227_v13 }
 0x38d   : > { %v6678_v47 = vpop.eup %6677  ;;  %v3351_v30 = vadd.f32 1.0, %v6676_v56  ;;  %6685 = vtanh.f32 %v3229_v14  ;;  %v2990_v19 = vmul.f32 0.044715, %v8767_v4  ;;  %v2991_v23 = vmul.f32 0.044715, %v8770_v15 }
 0x38e   : > { %3663 = vmatprep.mubr.bf16.mxu0 %v3468_v17  ;;  %v3353_v18 = vadd.f32 1.0, %v6678_v47  ;;  %v8790_v48 = vmul.f32 %v3052_v2, %v8728_v40  ;;  %v3168_v63 = vadd.f32 %v8663_v26, %v8599_v32  ;;  %v3170_v50 = vadd.f32 %v8669_v1, %v8611_v0 }
 0x38f   : > { %v3053_v33 = vmul.f32 %v2989_v38, %v8756_v54  ;;  %v2909_v29 = vmul.f32 0.5, %v8570_v27  ;;  %v2992_v24 = vmul.f32 0.044715, %v8779_v53  ;;  %v8800_v39 = vadd.f32 %v2844_v16, %v8354_v42 }
 0x390   : > { %v6680_v49 = vpop.eup %6679  ;;  %v3415_v2 = vmul.f32 %v3351_v30, %v8731_v43  ;;  %v3417_v6 = vmul.f32 %v3353_v18, %v8736_v12  ;;  %v3232_v13 = vmul.f32 0.7978846, %v3168_v63  ;;  %v3234_v26 = vmul.f32 0.7978846, %v3170_v50 }
 0x391   : > { %v2850_v35 = vpop.f32.mrb[116].mxu1  ;;  %v3356_v56 = vadd.f32 1.0, %v6680_v49  ;;  %v3054_v1 = vmul.f32 %v2990_v19, %v8767_v4  ;;  %v3055_v38 = vmul.f32 %v2991_v23, %v8770_v15  ;;  %v2993_v27 = vmul.f32 0.044715, %v8800_v39 }
 0x392   : > { %v2852_v14 = vpop.f32.mrb[117].mxu1  ;;  %v6682_v47 = vpop.eup %6681  ;;  %v3467_v16 = vpack.c.bf16 %v3417_v6, %v3415_v2  ;;  %6687 = vtanh.f32 %v3232_v13  ;;  %v3167_v20 = vadd.f32 %v8659_v28, %v8595_v8  ;;  %v3169_v43 = vadd.f32 %v8666_v45, %v8606_v31 }
 0x393   : > { %v2854_v17 = vpop.f32.mrb[118].mxu1  ;;  %v3358_v30 = vadd.f32 1.0, %v6682_v47  ;;  %v8812_v18 = vmul.f32 %v3053_v33, %v8756_v54  ;;  %v8815_v19 = vmul.f32 0.5, %v8599_v32  ;;  %6689 = vtanh.f32 %v3234_v26 }
 0x394   : > { %v2856_v12 = vpop.f32.mrb[119].mxu1  ;;  %3664 = vmatmul.mubr.bf16.gmra.mrb[152].mxu0 %v3467_v16  ;;  %v3056_v23 = vmul.f32 %v2992_v24, %v8779_v53  ;;  %v3231_v63 = vmul.f32 0.7978846, %v3167_v20  ;;  %v3233_v50 = vmul.f32 0.7978846, %v3169_v43  ;;  %v8819_v49 = vadd.f32 %v2846_v25, %v8356_v7 }
 0x395   : > { %v3420_v28 = vmul.f32 %v3356_v56, %v8751_v58  ;;  %v3422_v45 = vmul.f32 %v3358_v30, %v2910_v36  ;;  %v8823_v2 = vmul.f32 %v3054_v1, %v8767_v4  ;;  %v2914_v33 = vmul.f32 0.5, %v8611_v0 }
 0x396   : > { %v6684_v6 = vpop.eup %6683  ;;  %v8827_v32 = vmul.f32 %v3055_v38, %v8770_v15  ;;  %v3057_v13 = vmul.f32 %v2993_v27, %v8800_v39  ;;  %6691 = vtanh.f32 %v3231_v63  ;;  %v8831_v20 = vadd.f32 %v2850_v35, %v8354_v42 }
 0x397   : > { %v6686_v25 = vpop.eup %6685  ;;  %v3470_v24 = vpack.c.bf16 %v3422_v45, %v3420_v28  ;;  %v3355_v26 = vadd.f32 1.0, %v6684_v6  ;;  %6693 = vtanh.f32 %v3233_v50  ;;  %v8834_v58 = vadd.f32 %v2852_v14, %v8356_v7 }
 0x398   : > { %v3357_v56 = vadd.f32 1.0, %v6686_v25  ;;  %v8837_v0 = vmul.f32 %v3056_v23, %v8779_v53  ;;  %v2994_v1 = vmul.f32 0.044715, %v8819_v49  ;;  %v3172_v38 = vadd.f32 %v8705_v9, %v8642_v21 }
 0x399   : > { %v2860_v36 = vpop.f32.mrb[120].mxu1  ;;  %3671 = vmatprep.mubr.bf16.mxu0 %v3470_v24  ;;  %v2911_v35 = vmul.f32 0.5, %v8595_v8  ;;  %v2913_v47 = vmul.f32 0.5, %v8606_v31  ;;  %v3174_v14 = vadd.f32 %v8715_v3, %v8656_v55  ;;  %v8847_v16 = vadd.f32 %v2854_v17, %v8354_v42 }
 0x39a   : > { %v2862_v27 = vpop.f32.mrb[121].mxu1  ;;  %v3419_v30 = vmul.f32 %v3355_v26, %v8785_v34  ;;  %v3421_v23 = vmul.f32 %v3357_v56, %v2909_v29  ;;  %v2995_v63 = vmul.f32 0.044715, %v8831_v20  ;;  %v3236_v50 = vmul.f32 0.7978846, %v3172_v38 }
 0x39b   : > { %v2864_v43 = vpop.f32.mrb[122].mxu1  ;;  %v8854_v28 = vmul.f32 %v3057_v13, %v8800_v39  ;;  %v2996_v8 = vmul.f32 0.044715, %v8834_v58  ;;  %v8858_v31 = vmul.f32 0.5, %v8642_v21  ;;  %v3238_v3 = vmul.f32 0.7978846, %v3174_v14 }
 0x39c   : > { %v8851_v9 = vpop.f32.mrb[123].mxu1  ;;  %v6688_v17 = vpop.eup %6687  ;;  %v3469_v45 = vpack.c.bf16 %v3421_v23, %v3419_v30  ;;  %v3058_v6 = vmul.f32 %v2994_v1, %v8819_v49  ;;  %6695 = vtanh.f32 %v3236_v50  ;;  %v3171_v34 = vadd.f32 %v8696_v11, %v8633_v51 }
 0x39d   : > { %v6690_v29 = vpop.eup %6689  ;;  %v3360_v25 = vadd.f32 1.0, %v6688_v17  ;;  %6697 = vtanh.f32 %v3238_v3  ;;  %v2997_v13 = vmul.f32 0.044715, %v8847_v16  ;;  %v3173_v24 = vadd.f32 %v8708_v62, %v8645_v59 }
 0x39e   : > { %3672 = vmatmul.mubr.bf16.gmra.mrb[156].mxu0 %v3469_v45  ;;  %v3362_v21 = vadd.f32 1.0, %v6690_v29  ;;  %v3059_v26 = vmul.f32 %v2995_v63, %v8831_v20  ;;  %v3235_v56 = vmul.f32 0.7978846, %v3171_v34  ;;  %v8868_v38 = vadd.f32 %v2856_v12, %v8356_v7 }
 0x39f   : > { %v3060_v1 = vmul.f32 %v2996_v8, %v8834_v58  ;;  %v2918_v11 = vmul.f32 0.5, %v8656_v55  ;;  %v3237_v14 = vmul.f32 0.7978846, %v3173_v24  ;;  %v8873_v30 = vadd.f32 %v2860_v36, %v8354_v42 }
 0x3a0   : > { %v6692_v50 = vpop.eup %6691  ;;  %v3424_v62 = vmul.f32 %v3360_v25, %v8815_v19  ;;  %v3426_v3 = vmul.f32 %v3362_v21, %v2914_v33  ;;  %v8877_v17 = vmul.f32 %v3058_v6, %v8819_v49  ;;  %6699 = vtanh.f32 %v3235_v56 }
 0x3a1   : > { %v2870_v23 = vpop.f32.mrb[124].mxu1  ;;  %v6694_v12 = vpop.eup %6693  ;;  %v3359_v45 = vadd.f32 1.0, %v6692_v50  ;;  %v3061_v8 = vmul.f32 %v2997_v13, %v8847_v16  ;;  %6701 = vtanh.f32 %v3237_v14  ;;  %v8881_v55 = vadd.f32 %v2862_v27, %v8356_v7 }
 0x3a2   : > { %v2872_v63 = vpop.f32.mrb[125].mxu1  ;;  %v3472_v34 = vpack.c.bf16 %v3426_v3, %v3424_v62  ;;  %v3361_v29 = vadd.f32 1.0, %v6694_v12  ;;  %v8886_v19 = vmul.f32 %v3059_v26, %v8831_v20  ;;  %v2998_v33 = vmul.f32 0.044715, %v8868_v38 }
 0x3a3   : > { %v8883_v36 = vpop.f32.mrb[126].mxu1  ;;  %v8892_v25 = vmul.f32 %v3060_v1, %v8834_v58  ;;  %v2915_v13 = vmul.f32 0.5, %v8633_v51  ;;  %v2999_v24 = vmul.f32 0.044715, %v8873_v30  ;;  %v3176_v27 = vadd.f32 %v8746_v5, %v8685_v41 }
 0x3a4   : > { %v8889_v6 = vpop.f32.mrb[127].mxu1  ;;  %3679 = vmatprep.mubr.bf16.mxu0 %v3472_v34  ;;  %v3423_v21 = vmul.f32 %v3359_v45, %v2911_v35  ;;  %v3425_v56 = vmul.f32 %v3361_v29, %v2913_v47  ;;  %v2917_v26 = vmul.f32 0.5, %v8645_v59  ;;  %v3178_v14 = vadd.f32 %v8774_v44, %v8719_v52 }
 0x3a5   : > { %v8902_v50 = vmul.f32 %v3061_v8, %v8847_v16  ;;  %v3000_v1 = vmul.f32 0.044715, %v8881_v55  ;;  %v3240_v62 = vmul.f32 0.7978846, %v3176_v27  ;;  %v8906_v51 = vadd.f32 %v2864_v43, %v8354_v42 }
 0x3a6   : > { %v6696_v3 = vpop.eup %6695  ;;  %v3471_v12 = vpack.c.bf16 %v3425_v56, %v3423_v21  ;;  %v3062_v5 = vmul.f32 %v2998_v33, %v8868_v38  ;;  %v3242_v35 = vmul.f32 0.7978846, %v3178_v14  ;;  %v3175_v59 = vadd.f32 %v8743_v57, %v8679_v22 }
 0x3a7   : > { %v6698_v47 = vpop.eup %6697  ;;  %v3364_v45 = vadd.f32 1.0, %v6696_v3  ;;  %v3063_v44 = vmul.f32 %v2999_v24, %v8873_v30  ;;  %6703 = vtanh.f32 %v3240_v62  ;;  %v3177_v8 = vadd.f32 %v8763_v46, %v8700_v37 }
 0x3a8   : > { %3680 = vmatmul.mubr.bf16.gmra.mrb[160].mxu0 %v3471_v12  ;;  %v3366_v34 = vadd.f32 1.0, %v6698_v47  ;;  %6705 = vtanh.f32 %v3242_v35  ;;  %v3239_v43 = vmul.f32 0.7978846, %v3175_v59  ;;  %v8916_v29 = vadd.f32 %v8851_v9, %v8356_v7 }
 0x3a9   : > { %v3064_v33 = vmul.f32 %v3000_v1, %v8881_v55  ;;  %v3001_v57 = vmul.f32 0.044715, %v8906_v51  ;;  %v3241_v27 = vmul.f32 0.7978846, %v3177_v8  ;;  %v8921_v21 = vadd.f32 %v2870_v23, %v8354_v42 }
 0x3aa   : > { %v6700_v24 = vpop.eup %6699  ;;  %v3428_v56 = vmul.f32 %v3364_v45, %v8858_v31  ;;  %v3430_v46 = vmul.f32 %v3366_v34, %v2918_v11  ;;  %v2920_v14 = vmul.f32 0.5, %v8685_v41  ;;  %6707 = vtanh.f32 %v3239_v43 }
 0x3ab   : > { %v6702_v62 = vpop.eup %6701  ;;  %v3363_v3 = vadd.f32 1.0, %v6700_v24  ;;  %6709 = vtanh.f32 %v3241_v27  ;;  %v3002_v9 = vmul.f32 0.044715, %v8916_v29  ;;  %v8927_v1 = vadd.f32 %v2872_v63, %v8356_v7 }
 0x3ac   : > { %v3474_v12 = vpack.c.bf16 %v3430_v46, %v3428_v56  ;;  %v3365_v35 = vadd.f32 1.0, %v6702_v62  ;;  %v2922_v23 = vmul.f32 0.5, %v8719_v52  ;;  %v3003_v59 = vmul.f32 0.044715, %v8921_v21 }
 0x3ad   : > { %v8932_v31 = vmul.f32 %v3062_v5, %v8868_v38  ;;  %v8935_v41 = vmul.f32 %v3063_v44, %v8873_v30  ;;  %v8938_v11 = vmul.f32 %v3064_v33, %v8881_v55  ;;  %v3065_v47 = vmul.f32 %v3001_v57, %v8906_v51 }
 0x3ae   : > { %3687 = vmatprep.mubr.bf16.mxu0 %v3474_v12  ;;  %v3427_v63 = vmul.f32 %v3363_v3, %v2915_v13  ;;  %v3429_v45 = vmul.f32 %v3365_v35, %v2917_v26  ;;  %v2919_v8 = vmul.f32 0.5, %v8679_v22  ;;  %v3180_v52 = vadd.f32 %v8790_v48, %v8728_v40 }
 0x3af   : > { %v2921_v34 = vmul.f32 0.5, %v8700_v37  ;;  %v3066_v5 = vmul.f32 %v3002_v9, %v8916_v29  ;;  %v3004_v44 = vmul.f32 0.044715, %v8927_v1  ;;  %v3182_v43 = vadd.f32 %v8823_v2, %v8767_v4 }
 0x3b0   : > { %v3473_v33 = vpack.c.bf16 %v3429_v45, %v3427_v63  ;;  %v3067_v57 = vmul.f32 %v3003_v59, %v8921_v21  ;;  %v3244_v27 = vmul.f32 0.7978846, %v3180_v52  ;;  %v8952_v13 = vadd.f32 %v8883_v36, %v8354_v42 }
 0x3b1   : > { %v6704_v22 = vpop.eup %6703  ;;  %v8955_v48 = vmul.f32 %v3065_v47, %v8906_v51  ;;  %v3246_v37 = vmul.f32 0.7978846, %v3182_v43  ;;  %v3179_v26 = vadd.f32 %v8782_v60, %v8723_v61  ;;  %v3181_v24 = vadd.f32 %v8812_v18, %v8756_v54 }
 0x3b2   : > { %v6706_v2 = vpop.eup %6705  ;;  %3688 = vmatmul.mubr.bf16.gmra.mrb[164].mxu0 %v3473_v33  ;;  %v3368_v56 = vadd.f32 1.0, %v6704_v22  ;;  %v8962_v46 = vmul.f32 0.5, %v8728_v40  ;;  %v8965_v42 = vmul.f32 0.5, %v8767_v4  ;;  %6711 = vtanh.f32 %v3244_v27 }
 0x3b3   : > { %v3370_v36 = vadd.f32 1.0, %v6706_v2  ;;  %v3068_v62 = vmul.f32 %v3004_v44, %v8927_v1  ;;  %6713 = vtanh.f32 %v3246_v37  ;;  %v3243_v3 = vmul.f32 0.7978846, %v3179_v26  ;;  %v6480_v44 = vld [vmem:[#allocation10 + $0x88] sm:$0xff]  }
 0x3b4   : > { %v6708_v9 = vpop.eup %6707  ;;  %v8969_v60 = vmul.f32 %v3066_v5, %v8916_v29  ;;  %v8972_v18 = vmul.f32 %v3067_v57, %v8921_v21  ;;  %v3005_v12 = vmul.f32 0.044715, %v8952_v13  ;;  %v3245_v40 = vmul.f32 0.7978846, %v3181_v24  ;;  %v6479_v5 = vld [vmem:[#allocation10 + $0x80] sm:$0xff]  }
 0x3b5   : > { %v6710_v35 = vpop.eup %6709  ;;  %v3432_v59 = vmul.f32 %v3368_v56, %v2920_v14  ;;  %v3434_v4 = vmul.f32 %v3370_v36, %v2922_v23  ;;  %v3367_v47 = vadd.f32 1.0, %v6708_v9  ;;  %6715 = vtanh.f32 %v3243_v3  ;;  %6036 = vmatprep.subr.bf16.mxu1 %v6479_v5 }
 0x3b6   : > { %v3369_v63 = vadd.f32 1.0, %v6710_v35  ;;  %6717 = vtanh.f32 %v3245_v40  ;;  %v8977_v45 = vadd.f32 %v8889_v6, %v8356_v7  ;;  %v3184_v52 = vadd.f32 %v8837_v0, %v8779_v53  ;;  %6037 = vmatpush3.bf16.msra.mxu1 %v6479_v5 }
 0x3b7   : > { %v3476_v43 = vpack.c.bf16 %v3434_v4, %v3432_v59  ;;  %v8982_v33 = vmul.f32 %v3068_v62, %v8927_v1  ;;  %v2923_v14 = vmul.f32 0.5, %v8723_v61  ;;  %v3186_v23 = vadd.f32 %v8877_v17, %v8819_v49  ;;  %6038 = vmatprep.subr.bf16.mxu1 %v6480_v44  ;;  %v6481_v59 = vld [vmem:[#allocation10 + $0x90] sm:$0xff]   ;;  %v6482_v4 = vld [vmem:[#allocation10 + $0x98] sm:$0xff]  }
 0x3b8   : > { %v3431_v57 = vmul.f32 %v3367_v47, %v2919_v8  ;;  %v3433_v27 = vmul.f32 %v3369_v63, %v2921_v34  ;;  %v2925_v22 = vmul.f32 0.5, %v8756_v54  ;;  %v3248_v7 = vmul.f32 0.7978846, %v3184_v52 }
 0x3b9   : > { %3695 = vmatprep.mubr.bf16.mxu0 %v3476_v43  ;;  %v3069_v0 = vmul.f32 %v3005_v12, %v8952_v13  ;;  %v3250_v6 = vmul.f32 0.7978846, %v3186_v23  ;;  %v3183_v37 = vadd.f32 %v8827_v32, %v8770_v15  ;;  %v3185_v26 = vadd.f32 %v8854_v28, %v8800_v39 }
 0x3ba   : > { %v3475_v61 = vpack.c.bf16 %v3433_v27, %v3431_v57  ;;  %v3006_v17 = vmul.f32 0.044715, %v8977_v45  ;;  %6719 = vtanh.f32 %v3248_v7  ;;  %v3188_v54 = vadd.f32 %v8892_v25, %v8834_v58  ;;  %6039 = vmatpush3.bf16.msra.mxu1 %v6480_v44 }
 0x3bb   : > { %6721 = vtanh.f32 %v3250_v6  ;;  %v3247_v8 = vmul.f32 0.7978846, %v3183_v37  ;;  %v3249_v34 = vmul.f32 0.7978846, %v3185_v26  ;;  %v3190_v24 = vadd.f32 %v8932_v31, %v8868_v38  ;;  %6040 = vmatprep.subr.bf16.mxu1 %v6481_v59 }
 0x3bc   : > { %v6712_v2 = vpop.eup %6711  ;;  %3696 = vmatmul.mubr.bf16.gmra.mrb[168].mxu0 %v3475_v61  ;;  %v2928_v32 = vmul.f32 0.5, %v8779_v53  ;;  %v9000_v28 = vmul.f32 0.5, %v8819_v49  ;;  %v3252_v56 = vmul.f32 0.7978846, %v3188_v54  ;;  %v3187_v36 = vadd.f32 %v8886_v19, %v8831_v20 }
 0x3bd   : > { %v6714_v62 = vpop.eup %6713  ;;  %v3372_v25 = vadd.f32 1.0, %v6712_v2  ;;  %6723 = vtanh.f32 %v3247_v8  ;;  %v3254_v3 = vmul.f32 0.7978846, %v3190_v24  ;;  %v3189_v9 = vadd.f32 %v8902_v50, %v8847_v16 }
 0x3be   : > { %v3374_v31 = vadd.f32 1.0, %v6714_v62  ;;  %v3070_v12 = vmul.f32 %v3006_v17, %v8977_v45  ;;  %6725 = vtanh.f32 %v3249_v34  ;;  %v3251_v53 = vmul.f32 0.7978846, %v3187_v36  ;;  %6041 = vmatpush3.bf16.msra.mxu1 %v6481_v59 }
 0x3bf   : > { %v6716_v40 = vpop.eup %6715  ;;  %v3436_v49 = vmul.f32 %v3372_v25, %v8962_v46  ;;  %v3133_v35 = vmul.f32 %v3069_v0, %v8952_v13  ;;  %6727 = vtanh.f32 %v3252_v56  ;;  %v3253_v19 = vmul.f32 0.7978846, %v3189_v9  ;;  %6042 = vmatprep.subr.bf16.mxu1 %v6482_v4 }
 0x3c0   : > { %v6718_v47 = vpop.eup %6717  ;;  %v3438_v63 = vmul.f32 %v3374_v31, %v8965_v42  ;;  %v3371_v52 = vadd.f32 1.0, %v6716_v40  ;;  %6729 = vtanh.f32 %v3254_v3  ;;  %v3192_v50 = vadd.f32 %v8938_v11, %v8881_v55  ;;  %v6483_v40 = vld [vmem:[#allocation10 + $0xa0] sm:$0xff]  }
 0x3c1   : > { %v3373_v5 = vadd.f32 1.0, %v6718_v47  ;;  %v2927_v44 = vmul.f32 0.5, %v8770_v15  ;;  %6731 = vtanh.f32 %v3251_v53  ;;  %v3194_v46 = vadd.f32 %v8969_v60, %v8916_v29 }
 0x3c2   : > { %v3478_v43 = vpack.c.bf16 %v3438_v63, %v3436_v49  ;;  %v3134_v23 = vmul.f32 %v3070_v12, %v8977_v45  ;;  %6733 = vtanh.f32 %v3253_v19  ;;  %v3256_v57 = vmul.f32 0.7978846, %v3192_v50  ;;  %6043 = vmatpush3.bf16.msra.mxu1 %v6482_v4  ;;  %v6484_v49 = vld [vmem:[#allocation10 + $0xa8] sm:$0xff]  }
 0x3c3   : > { %v3435_v42 = vmul.f32 %v3371_v52, %v2923_v14  ;;  %v3437_v27 = vmul.f32 %v3373_v5, %v2925_v22  ;;  %v3258_v7 = vmul.f32 0.7978846, %v3194_v46  ;;  %v3191_v11 = vadd.f32 %v8935_v41, %v8873_v30  ;;  %6044 = vmatprep.subr.bf16.mxu1 %v6483_v40 }
 0x3c4   : > { %v6720_v0 = vpop.eup %6719  ;;  %3703 = vmatprep.mubr.bf16.mxu0 %v3478_v43  ;;  %v2929_v15 = vmul.f32 0.5, %v8800_v39  ;;  %v2932_v60 = vmul.f32 0.5, %v8834_v58  ;;  %6735 = vtanh.f32 %v3256_v57  ;;  %v3193_v6 = vadd.f32 %v8955_v48, %v8906_v51 }
 0x3c5   : > { %v6722_v37 = vpop.eup %6721  ;;  %v3477_v26 = vpack.c.bf16 %v3437_v27, %v3435_v42  ;;  %v3376_v61 = vadd.f32 1.0, %v6720_v0  ;;  %6737 = vtanh.f32 %v3258_v7  ;;  %v3255_v14 = vmul.f32 0.7978846, %v3191_v11 }
 0x3c6   : > { %v3378_v22 = vadd.f32 1.0, %v6722_v37  ;;  %v3257_v17 = vmul.f32 0.7978846, %v3193_v6  ;;  %v3196_v41 = vadd.f32 %v8982_v33, %v8927_v1  ;;  %v3198_v54 = vadd.f32 %v3134_v23, %v8977_v45  ;;  %6045 = vmatpush3.bf16.msra.mxu1 %v6483_v40 }
 0x3c7   : > { %v6724_v39 = vpop.eup %6723  ;;  %3704 = vmatmul.mubr.bf16.gmra.mrb[172].mxu0 %v3477_v26  ;;  %v3440_v58 = vmul.f32 %v3376_v61, %v2928_v32  ;;  %v2934_v8 = vmul.f32 0.5, %v8868_v38  ;;  %v2931_v48 = vmul.f32 0.5, %v8831_v20  ;;  %6739 = vtanh.f32 %v3255_v14  ;;  %6046 = vmatprep.subr.bf16.mxu1 %v6484_v49 }
 0x3c8   : > { %v6726_v34 = vpop.eup %6725  ;;  %v3442_v24 = vmul.f32 %v3378_v22, %v9000_v28  ;;  %v3375_v2 = vadd.f32 1.0, %v6724_v39  ;;  %6741 = vtanh.f32 %v3257_v17  ;;  %v3260_v56 = vmul.f32 0.7978846, %v3196_v41 }
 0x3c9   : > { %v6728_v36 = vpop.eup %6727  ;;  %v3377_v62 = vadd.f32 1.0, %v6726_v34  ;;  %v3262_v33 = vmul.f32 0.7978846, %v3198_v54  ;;  %v3195_v25 = vadd.f32 %v8972_v18, %v8921_v21  ;;  %v3197_v3 = vadd.f32 %v3133_v35, %v8952_v13 }
 0x3ca   : > { %v6730_v32 = vpop.eup %6729  ;;  %v3480_v9 = vpack.c.bf16 %v3442_v24, %v3440_v58  ;;  %v3439_v38 = vmul.f32 %v3375_v2, %v2927_v44  ;;  %v3380_v31 = vadd.f32 1.0, %v6728_v36  ;;  %6743 = vtanh.f32 %v3260_v56  ;;  %6047 = vmatpush3.bf16.msra.mxu1 %v6484_v49  ;;  %v6485_v24 = vld [vmem:[#allocation10 + $0xb0] sm:$0xff]   ;;  %v6486_v2 = vld [vmem:[#allocation10 + $0xb8] sm:$0xff]  }
 0x3cb   : > { %v6732_v20 = vpop.eup %6731  ;;  %v3441_v12 = vmul.f32 %v3377_v62, %v2929_v15  ;;  %v3382_v53 = vadd.f32 1.0, %v6730_v32  ;;  %6745 = vtanh.f32 %v3262_v33  ;;  %v3259_v28 = vmul.f32 0.7978846, %v3195_v25  ;;  %6048 = vmatprep.subr.bf16.mxu1 %v6485_v24  ;;  %v9043_v32 = vld [vmem:[%s9583_s5 + $0x2] ss:$0 sm:$0xff] }
 0x3cc   : > { %v6734_v19 = vpop.eup %6733  ;;  %3711 = vmatprep.mubr.bf16.mxu0 %v3480_v9  ;;  %v3444_v59 = vmul.f32 %v3380_v31, %v2932_v60  ;;  %v2933_v4 = vmul.f32 0.5, %v8847_v16  ;;  %v3379_v18 = vadd.f32 1.0, %v6732_v20  ;;  %v3261_v47 = vmul.f32 0.7978846, %v3197_v3 }
 0x3cd   : > { %v3479_v35 = vpack.c.bf16 %v3441_v12, %v3439_v38  ;;  %v3446_v63 = vmul.f32 %v3382_v53, %v2934_v8  ;;  %v3381_v52 = vadd.f32 1.0, %v6734_v19  ;;  %6747 = vtanh.f32 %v3259_v28 }
 0x3ce   : > { %v6736_v50 = vpop.eup %6735  ;;  %6749 = vtanh.f32 %v3261_v47  ;;  %v3443_v46 = vmul.f32 %v3379_v18, %v2931_v48  ;;  %v2936_v57 = vmul.f32 0.5, %v8881_v55  ;;  %v2938_v16 = vmul.f32 0.5, %v8916_v29  ;;  %6049 = vmatpush3.bf16.msra.mxu1 %v6485_v24 }
 0x3cf   : > { %v6738_v5 = vpop.eup %6737  ;;  %3712 = vmatmul.mubr.bf16.gmra.mrb[176].mxu0 %v3479_v35  ;;  %v3482_v44 = vpack.c.bf16 %v3446_v63, %v3444_v59  ;;  %v3445_v43 = vmul.f32 %v3381_v52, %v2933_v4  ;;  %v3384_v23 = vadd.f32 1.0, %v6736_v50  ;;  %v2935_v6 = vmul.f32 0.5, %v8873_v30  ;;  %6050 = vmatprep.subr.bf16.mxu1 %v6486_v2 }
 0x3d0   : > { %v3386_v42 = vadd.f32 1.0, %v6738_v5  ;;  %v2937_v37 = vmul.f32 0.5, %v8906_v51  ;;  %v2940_v41 = vmul.f32 0.5, %v8927_v1  ;;  %v2942_v54 = vmul.f32 0.5, %v8977_v45 }
 0x3d1   : > { %v6740_v27 = vpop.eup %6739  ;;  %3719 = vmatprep.mubr.bf16.mxu0 %v3482_v44  ;;  %v3481_v7 = vpack.c.bf16 %v3445_v43, %v3443_v46  ;;  %v3448_v0 = vmul.f32 %v3384_v23, %v2936_v57  ;;  %v2939_v56 = vmul.f32 0.5, %v8921_v21  ;;  %v2941_v36 = vmul.f32 0.5, %v8952_v13 }
 0x3d2   : > { %v6742_v11 = vpop.eup %6741  ;;  %v3450_v15 = vmul.f32 %v3386_v42, %v2938_v16  ;;  %v3383_v60 = vadd.f32 1.0, %v6740_v27  ;;  %6051 = vmatpush3.bf16.msra.mxu1 %v6486_v2 }
 0x3d3   : > { %v3385_v26 = vadd.f32 1.0, %v6742_v11 }
 0x3d4   : > { %v6744_v61 = vpop.eup %6743  ;;  %v3484_v14 = vpack.c.bf16 %v3450_v15, %v3448_v0  ;;  %v3447_v55 = vmul.f32 %v3383_v60, %v2935_v6 }
 0x3d5   : > { %v6746_v22 = vpop.eup %6745  ;;  %v3449_v17 = vmul.f32 %v3385_v26, %v2937_v37  ;;  %v3388_v29 = vadd.f32 1.0, %v6744_v61 }
 0x3d6   : > { %v3390_v39 = vadd.f32 1.0, %v6746_v22 }
 0x3d7   : > { %v6748_v58 = vpop.eup %6747  ;;  %3720 = vmatmul.mubr.bf16.gmra.mrb[180].mxu0 %v3481_v7  ;;  %v3483_v8 = vpack.c.bf16 %v3449_v17, %v3447_v55  ;;  %v3452_v30 = vmul.f32 %v3388_v29, %v2940_v41 }
 0x3d8   : > { %v6750_v48 = vpop.eup %6749  ;;  %3727 = vmatprep.mubr.bf16.mxu0 %v3484_v14  ;;  %v3454_v34 = vmul.f32 %v3390_v39, %v2942_v54  ;;  %v3387_v51 = vadd.f32 1.0, %v6748_v58 }
 0x3d9   : > { %v3389_v62 = vadd.f32 1.0, %v6750_v48 }
 0x3da   : > { %v3486_v33 = vpack.c.bf16 %v3454_v34, %v3452_v30  ;;  %v3451_v1 = vmul.f32 %v3387_v51, %v2939_v56 }
 0x3db   : > { %v3453_v45 = vmul.f32 %v3389_v62, %v2941_v36 }
 0x3dd   : > { %v3485_v25 = vpack.c.bf16 %v3453_v45, %v3451_v1 }
 0x3df   : > { %3728 = vmatmul.mubr.bf16.gmra.mrb[184].mxu0 %v3483_v8 }
 0x3e0   : > { %3735 = vmatprep.mubr.bf16.mxu0 %v3486_v33 }
 0x3e7   : > { %3736 = vmatmul.mubr.bf16.gmra.mrb[188].mxu0 %v3485_v25 }
 0x41e   : > { %v5874_v3 = vpop.f32.mrb[128].mxu0 }
 0x41f   : > { %v5875_v21 = vpop.f32.mrb[129].mxu0 }
 0x420   : > { %v5876_v13 = vadd.f32 %v5875_v21, %v5874_v3  ;;  %v5877_v9 = vpop.f32.mrb[130].mxu0 }
 0x421   : > { %v5878_v38 = vpop.f32.mrb[131].mxu0 }
 0x422   : > { %v3618_v31 = vadd.f32 %v5876_v13, %v9043_v32  ;;  %v5879_v20 = vadd.f32 %v5878_v38, %v5877_v9 }
 0x424   : > { %v3776_v12 = vmul.f32 0.044715, %v3618_v31  ;;  %v3621_v53 = vadd.f32 %v5879_v20, %v9043_v32  ;;  %v3744_v29 = vmul.f32 0.5, %v3618_v31 }
 0x426   : > { %v3808_v28 = vmul.f32 %v3776_v12, %v3618_v31  ;;  %v3777_v40 = vmul.f32 0.044715, %v3621_v53  ;;  %v5880_v49 = vpop.f32.mrb[132].mxu0  ;;  %v3745_v58 = vmul.f32 0.5, %v3621_v53 }
 0x427   : > { %v5881_v19 = vpop.f32.mrb[133].mxu0 }
 0x428   : > { %v3809_v59 = vmul.f32 %v3777_v40, %v3621_v53  ;;  %v5882_v4 = vadd.f32 %v5881_v19, %v5880_v49  ;;  %v5883_v18 = vpop.f32.mrb[134].mxu0  ;;  %v3840_v47 = vmul.f32 %v3808_v28, %v3618_v31 }
 0x429   : > { %v5884_v35 = vpop.f32.mrb[135].mxu0 }
 0x42a   : > { %v3626_v63 = vadd.f32 %v5882_v4, %v9043_v32  ;;  %v5885_v52 = vadd.f32 %v5884_v35, %v5883_v18  ;;  %v3841_v50 = vmul.f32 %v3809_v59, %v3621_v53  ;;  %v3872_v5 = vadd.f32 %v3840_v47, %v3618_v31 }
 0x42c   : > { %v3778_v44 = vmul.f32 0.044715, %v3626_v63  ;;  %v3629_v46 = vadd.f32 %v5885_v52, %v9043_v32  ;;  %v3873_v43 = vadd.f32 %v3841_v50, %v3621_v53  ;;  %v3904_v23 = vmul.f32 0.7978846, %v3872_v5 }
 0x42d   : > { %v3746_v25 = vmul.f32 0.5, %v3626_v63 }
 0x42e   : > { %v3810_v57 = vmul.f32 %v3778_v44, %v3626_v63  ;;  %v3779_v16 = vmul.f32 0.044715, %v3629_v46  ;;  %v3905_v42 = vmul.f32 0.7978846, %v3873_v43  ;;  %6751 = vtanh.f32 %v3904_v23 }
 0x42f   : > { %v3747_v3 = vmul.f32 0.5, %v3629_v46 }
 0x430   : > { %v3842_v27 = vmul.f32 %v3810_v57, %v3626_v63  ;;  %v3811_v7 = vmul.f32 %v3779_v16, %v3629_v46  ;;  %6753 = vtanh.f32 %v3905_v42 }
 0x432   : > { %v3874_v11 = vadd.f32 %v3842_v27, %v3626_v63  ;;  %v3843_v0 = vmul.f32 %v3811_v7, %v3629_v46 }
 0x434   : > { %v3906_v15 = vmul.f32 0.7978846, %v3874_v11  ;;  %v3875_v60 = vadd.f32 %v3843_v0, %v3629_v46 }
 0x435   : > { %v5886_v37 = vpop.f32.mrb[136].mxu0 }
 0x436   : > { %6755 = vtanh.f32 %v3906_v15  ;;  %v3907_v6 = vmul.f32 0.7978846, %v3875_v60  ;;  %v5887_v26 = vpop.f32.mrb[137].mxu0 }
 0x437   : > { %v5888_v14 = vadd.f32 %v5887_v26, %v5886_v37  ;;  %v5889_v22 = vpop.f32.mrb[138].mxu0 }
 0x438   : > { %6757 = vtanh.f32 %v3907_v6  ;;  %v6752_v61 = vpop.eup %6751  ;;  %v5890_v17 = vpop.f32.mrb[139].mxu0 }
 0x439   : > { %v3968_v41 = vadd.f32 1.0, %v6752_v61  ;;  %v3634_v54 = vadd.f32 %v5888_v14, %v9043_v32  ;;  %v5891_v39 = vadd.f32 %v5890_v17, %v5889_v22 }
 0x43a   : > { %v6754_v55 = vpop.eup %6753 }
 0x43b   : > { %v3969_v8 = vadd.f32 1.0, %v6754_v55  ;;  %v3780_v48 = vmul.f32 0.044715, %v3634_v54  ;;  %v3637_v30 = vadd.f32 %v5891_v39, %v9043_v32  ;;  %v4000_v34 = vmul.f32 %v3968_v41, %v3744_v29 }
 0x43c   : > { %v3748_v60 = vmul.f32 0.5, %v3634_v54 }
 0x43d   : > { %v4001_v51 = vmul.f32 %v3969_v8, %v3745_v58  ;;  %v3812_v24 = vmul.f32 %v3780_v48, %v3634_v54  ;;  %v3781_v2 = vmul.f32 0.044715, %v3637_v30  ;;  %v3749_v14 = vmul.f32 0.5, %v3637_v30 }
 0x43f   : > { %v4032_v56 = vpack.c.bf16 %v4001_v51, %v4000_v34  ;;  %v3813_v62 = vmul.f32 %v3781_v2, %v3637_v30  ;;  %v3844_v1 = vmul.f32 %v3812_v24, %v3634_v54 }
 0x440   : > { %v6756_v36 = vpop.eup %6755 }
 0x441   : > { %6052 = vmatprep.mubr.bf16.mxu1 %v4032_v56  ;;  %v3970_v33 = vadd.f32 1.0, %v6756_v36  ;;  %v5892_v21 = vpop.f32.mrb[140].mxu0  ;;  %v3845_v9 = vmul.f32 %v3813_v62, %v3637_v30  ;;  %v3876_v38 = vadd.f32 %v3844_v1, %v3634_v54 }
 0x442   : > { %v6758_v45 = vpop.eup %6757  ;;  %v5893_v31 = vpop.f32.mrb[141].mxu0 }
 0x443   : > { %v3971_v13 = vadd.f32 1.0, %v6758_v45  ;;  %v4002_v20 = vmul.f32 %v3970_v33, %v3746_v25  ;;  %v5894_v12 = vadd.f32 %v5893_v31, %v5892_v21  ;;  %v5895_v53 = vpop.f32.mrb[142].mxu0  ;;  %v3877_v40 = vadd.f32 %v3845_v9, %v3637_v30 }
 0x444   : > { %v3908_v49 = vmul.f32 0.7978846, %v3876_v38  ;;  %v5896_v19 = vpop.f32.mrb[143].mxu0 }
 0x445   : > { %v4003_v28 = vmul.f32 %v3971_v13, %v3747_v3  ;;  %v3642_v59 = vadd.f32 %v5894_v12, %v9043_v32  ;;  %v5897_v4 = vadd.f32 %v5896_v19, %v5895_v53  ;;  %v3909_v47 = vmul.f32 0.7978846, %v3877_v40 }
 0x446   : > { %6759 = vtanh.f32 %v3908_v49 }
 0x447   : > { %v4033_v18 = vpack.c.bf16 %v4003_v28, %v4002_v20  ;;  %v3782_v35 = vmul.f32 0.044715, %v3642_v59  ;;  %v3645_v63 = vadd.f32 %v5897_v4, %v9043_v32  ;;  %6761 = vtanh.f32 %v3909_v47 }
 0x448   : > { %v3750_v25 = vmul.f32 0.5, %v3642_v59 }
 0x449   : > { %6053 = vmatmul.mubr.bf16.vlgmr.msra.gmra.mrb[128].mxu1 %v4033_v18  ;;  %v3814_v52 = vmul.f32 %v3782_v35, %v3642_v59  ;;  %v3783_v50 = vmul.f32 0.044715, %v3645_v63  ;;  %v3751_v21 = vmul.f32 0.5, %v3645_v63 }
 0x44b   : > { %v3815_v5 = vmul.f32 %v3783_v50, %v3645_v63  ;;  %v3846_v44 = vmul.f32 %v3814_v52, %v3642_v59 }
 0x44d   : > { %v3847_v46 = vmul.f32 %v3815_v5, %v3645_v63  ;;  %v3878_v43 = vadd.f32 %v3846_v44, %v3642_v59 }
 0x44e   : > { %v5898_v23 = vpop.f32.mrb[144].mxu0 }
 0x44f   : > { %v5899_v57 = vpop.f32.mrb[145].mxu0  ;;  %v3879_v16 = vadd.f32 %v3847_v46, %v3645_v63  ;;  %v3910_v42 = vmul.f32 0.7978846, %v3878_v43 }
 0x450   : > { %v6760_v27 = vpop.eup %6759  ;;  %v5900_v7 = vadd.f32 %v5899_v57, %v5898_v23  ;;  %v5901_v11 = vpop.f32.mrb[146].mxu0 }
 0x451   : > { %v6762_v0 = vpop.eup %6761  ;;  %v5902_v15 = vpop.f32.mrb[147].mxu0  ;;  %v3972_v6 = vadd.f32 1.0, %v6760_v27  ;;  %v3911_v37 = vmul.f32 0.7978846, %v3879_v16  ;;  %6763 = vtanh.f32 %v3910_v42 }
 0x452   : > { %v3650_v26 = vadd.f32 %v5900_v7, %v9043_v32  ;;  %v5903_v61 = vadd.f32 %v5902_v15, %v5901_v11  ;;  %v3973_v22 = vadd.f32 1.0, %v6762_v0 }
 0x453   : > { %6765 = vtanh.f32 %v3911_v37  ;;  %v4004_v29 = vmul.f32 %v3972_v6, %v3748_v60 }
 0x454   : > { %v3784_v55 = vmul.f32 0.044715, %v3650_v26  ;;  %v3653_v17 = vadd.f32 %v5903_v61, %v9043_v32  ;;  %v4005_v41 = vmul.f32 %v3973_v22, %v3749_v14  ;;  %v3752_v16 = vmul.f32 0.5, %v3650_v26 }
 0x456   : > { %v3816_v39 = vmul.f32 %v3784_v55, %v3650_v26  ;;  %v3785_v58 = vmul.f32 0.044715, %v3653_v17  ;;  %v4034_v8 = vpack.c.bf16 %v4005_v41, %v4004_v29  ;;  %v3753_v7 = vmul.f32 0.5, %v3653_v17 }
 0x458   : > { %v3817_v48 = vmul.f32 %v3785_v58, %v3653_v17  ;;  %6056 = vmatprep.mubr.bf16.mxu1 %v4034_v8  ;;  %v3848_v54 = vmul.f32 %v3816_v39, %v3650_v26 }
 0x45a   : > { %v3849_v34 = vmul.f32 %v3817_v48, %v3653_v17  ;;  %v3880_v51 = vadd.f32 %v3848_v54, %v3650_v26 }
 0x45b   : > { %v6764_v24 = vpop.eup %6763  ;;  %v5904_v2 = vpop.f32.mrb[148].mxu0 }
 0x45c   : > { %v5905_v56 = vpop.f32.mrb[149].mxu0  ;;  %v3974_v36 = vadd.f32 1.0, %v6764_v24  ;;  %v3881_v30 = vadd.f32 %v3849_v34, %v3653_v17  ;;  %v3912_v62 = vmul.f32 0.7978846, %v3880_v51 }
 0x45d   : > { %v6766_v33 = vpop.eup %6765  ;;  %v5906_v1 = vadd.f32 %v5905_v56, %v5904_v2  ;;  %v5907_v45 = vpop.f32.mrb[150].mxu0 }
 0x45e   : > { %v5908_v3 = vpop.f32.mrb[151].mxu0  ;;  %v3975_v13 = vadd.f32 1.0, %v6766_v33  ;;  %v3913_v9 = vmul.f32 0.7978846, %v3881_v30  ;;  %6767 = vtanh.f32 %v3912_v62  ;;  %v4006_v20 = vmul.f32 %v3974_v36, %v3750_v25 }
 0x45f   : > { %v3658_v38 = vadd.f32 %v5906_v1, %v9043_v32  ;;  %v5909_v31 = vadd.f32 %v5908_v3, %v5907_v45 }
 0x460   : > { %v4007_v12 = vmul.f32 %v3975_v13, %v3751_v21  ;;  %6769 = vtanh.f32 %v3913_v9 }
 0x461   : > { %v3786_v53 = vmul.f32 0.044715, %v3658_v38  ;;  %v3661_v28 = vadd.f32 %v5909_v31, %v9043_v32  ;;  %v3754_v1 = vmul.f32 0.5, %v3658_v38 }
 0x462   : > { %v4035_v40 = vpack.c.bf16 %v4007_v12, %v4006_v20 }
 0x463   : > { %v3818_v49 = vmul.f32 %v3786_v53, %v3658_v38  ;;  %v3787_v19 = vmul.f32 0.044715, %v3661_v28  ;;  %v3755_v3 = vmul.f32 0.5, %v3661_v28 }
 0x464   : > { %6057 = vmatmul.mubr.bf16.gmra.mrb[132].mxu1 %v4035_v40 }
 0x465   : > { %v3819_v4 = vmul.f32 %v3787_v19, %v3661_v28  ;;  %v3850_v59 = vmul.f32 %v3818_v49, %v3658_v38 }
 0x467   : > { %v5910_v18 = vpop.f32.mrb[152].mxu0  ;;  %v3851_v47 = vmul.f32 %v3819_v4, %v3661_v28  ;;  %v3882_v35 = vadd.f32 %v3850_v59, %v3658_v38 }
 0x468   : > { %v6768_v63 = vpop.eup %6767  ;;  %v5911_v52 = vpop.f32.mrb[153].mxu0 }
 0x469   : > { %v5912_v50 = vadd.f32 %v5911_v52, %v5910_v18  ;;  %v5913_v5 = vpop.f32.mrb[154].mxu0  ;;  %v3976_v44 = vadd.f32 1.0, %v6768_v63  ;;  %v3883_v46 = vadd.f32 %v3851_v47, %v3661_v28  ;;  %v3914_v43 = vmul.f32 0.7978846, %v3882_v35 }
 0x46a   : > { %v6770_v23 = vpop.eup %6769  ;;  %v5914_v57 = vpop.f32.mrb[155].mxu0 }
 0x46b   : > { %v9058_v42 = vadd.f32 %v5912_v50, %v9043_v32  ;;  %v5915_v27 = vadd.f32 %v5914_v57, %v5913_v5  ;;  %v3977_v11 = vadd.f32 1.0, %v6770_v23  ;;  %v3915_v0 = vmul.f32 0.7978846, %v3883_v46 }
 0x46c   : > { %6771 = vtanh.f32 %v3914_v43  ;;  %v4008_v6 = vmul.f32 %v3976_v44, %v3752_v16 }
 0x46d   : > { %v3788_v15 = vmul.f32 0.044715, %v9058_v42  ;;  %v9062_v60 = vadd.f32 %v5915_v27, %v9043_v32  ;;  %v4009_v37 = vmul.f32 %v3977_v11, %v3753_v7  ;;  %6773 = vtanh.f32 %v3915_v0 }
 0x46e   : > { %v3756_v57 = vmul.f32 0.5, %v9058_v42 }
 0x46f   : > { %v3820_v61 = vmul.f32 %v3788_v15, %v9058_v42  ;;  %v3789_v26 = vmul.f32 0.044715, %v9062_v60  ;;  %v4036_v14 = vpack.c.bf16 %v4009_v37, %v4008_v6  ;;  %v3757_v7 = vmul.f32 0.5, %v9062_v60 }
 0x471   : > { %v3821_v22 = vmul.f32 %v3789_v26, %v9062_v60  ;;  %v5916_v55 = vpop.f32.mrb[156].mxu0  ;;  %6060 = vmatprep.mubr.bf16.mxu1 %v4036_v14  ;;  %v3852_v17 = vmul.f32 %v3820_v61, %v9058_v42 }
 0x472   : > { %v5917_v29 = vpop.f32.mrb[157].mxu0 }
 0x473   : > { %v5918_v41 = vadd.f32 %v5917_v29, %v5916_v55  ;;  %v5919_v39 = vpop.f32.mrb[158].mxu0  ;;  %v3853_v58 = vmul.f32 %v3821_v22, %v9062_v60  ;;  %v3884_v8 = vadd.f32 %v3852_v17, %v9058_v42 }
 0x474   : > { %v5920_v48 = vpop.f32.mrb[159].mxu0 }
 0x475   : > { %v9071_v54 = vadd.f32 %v5918_v41, %v9043_v32  ;;  %v5921_v34 = vadd.f32 %v5920_v48, %v5919_v39  ;;  %v3885_v51 = vadd.f32 %v3853_v58, %v9062_v60  ;;  %v3916_v24 = vmul.f32 0.7978846, %v3884_v8 }
 0x476   : > { %v6772_v2 = vpop.eup %6771 }
 0x477   : > { %v3790_v56 = vmul.f32 0.044715, %v9071_v54  ;;  %v9076_v36 = vadd.f32 %v5921_v34, %v9043_v32  ;;  %v3978_v30 = vadd.f32 1.0, %v6772_v2  ;;  %v3917_v62 = vmul.f32 0.7978846, %v3885_v51  ;;  %v6774_v33 = vpop.eup %6773 }
 0x478   : > { %6775 = vtanh.f32 %v3916_v24  ;;  %v3979_v21 = vadd.f32 1.0, %v6774_v33 }
 0x479   : > { %v3822_v45 = vmul.f32 %v3790_v56, %v9071_v54  ;;  %v3791_v25 = vmul.f32 0.044715, %v9076_v36  ;;  %6777 = vtanh.f32 %v3917_v62  ;;  %v4010_v31 = vmul.f32 %v3978_v30, %v3754_v1 }
 0x47a   : > { %v4011_v20 = vmul.f32 %v3979_v21, %v3755_v3  ;;  %v3758_v56 = vmul.f32 0.5, %v9071_v54  ;;  %v3759_v30 = vmul.f32 0.5, %v9076_v36 }
 0x47b   : > { %v3823_v13 = vmul.f32 %v3791_v25, %v9076_v36  ;;  %v5922_v9 = vpop.f32.mrb[160].mxu0  ;;  %v3854_v12 = vmul.f32 %v3822_v45, %v9071_v54 }
 0x47c   : > { %v5923_v53 = vpop.f32.mrb[161].mxu0  ;;  %v4037_v19 = vpack.c.bf16 %v4011_v20, %v4010_v31 }
 0x47d   : > { %v5924_v40 = vadd.f32 %v5923_v53, %v5922_v9  ;;  %v5925_v49 = vpop.f32.mrb[162].mxu0  ;;  %v3855_v38 = vmul.f32 %v3823_v13, %v9076_v36  ;;  %v3886_v4 = vadd.f32 %v3854_v12, %v9071_v54 }
 0x47e   : > { %v5926_v59 = vpop.f32.mrb[163].mxu0  ;;  %6061 = vmatmul.mubr.bf16.gmra.mrb[136].mxu1 %v4037_v19 }
 0x47f   : > { %v9085_v28 = vadd.f32 %v5924_v40, %v9043_v32  ;;  %v5927_v18 = vadd.f32 %v5926_v59, %v5925_v49  ;;  %v3887_v47 = vadd.f32 %v3855_v38, %v9076_v36  ;;  %v3918_v35 = vmul.f32 0.7978846, %v3886_v4 }
 0x481   : > { %v3792_v63 = vmul.f32 0.044715, %v9085_v28  ;;  %v9090_v52 = vadd.f32 %v5927_v18, %v9043_v32  ;;  %v3919_v50 = vmul.f32 0.7978846, %v3887_v47  ;;  %6779 = vtanh.f32 %v3918_v35 }
 0x482   : > { %v6776_v5 = vpop.eup %6775 }
 0x483   : > { %v3824_v44 = vmul.f32 %v3792_v63, %v9085_v28  ;;  %v3793_v46 = vmul.f32 0.044715, %v9090_v52  ;;  %v3980_v43 = vadd.f32 1.0, %v6776_v5  ;;  %6781 = vtanh.f32 %v3919_v50  ;;  %v6778_v23 = vpop.eup %6777 }
 0x484   : > { %v3981_v11 = vadd.f32 1.0, %v6778_v23  ;;  %v3760_v50 = vmul.f32 0.5, %v9085_v28  ;;  %v3761_v5 = vmul.f32 0.5, %v9090_v52 }
 0x485   : > { %v3825_v16 = vmul.f32 %v3793_v46, %v9090_v52  ;;  %v5928_v27 = vpop.f32.mrb[164].mxu0  ;;  %v3856_v0 = vmul.f32 %v3824_v44, %v9085_v28  ;;  %v4012_v6 = vmul.f32 %v3980_v43, %v3756_v57 }
 0x486   : > { %v5929_v15 = vpop.f32.mrb[165].mxu0  ;;  %v4013_v26 = vmul.f32 %v3981_v11, %v3757_v7 }
 0x487   : > { %v5930_v37 = vadd.f32 %v5929_v15, %v5928_v27  ;;  %v5931_v61 = vpop.f32.mrb[166].mxu0  ;;  %v3857_v14 = vmul.f32 %v3825_v16, %v9090_v52  ;;  %v3888_v22 = vadd.f32 %v3856_v0, %v9085_v28 }
 0x488   : > { %v5932_v55 = vpop.f32.mrb[167].mxu0  ;;  %v4038_v29 = vpack.c.bf16 %v4013_v26, %v4012_v6 }
 0x489   : > { %v9101_v42 = vadd.f32 %v5930_v37, %v9043_v32  ;;  %v5933_v17 = vadd.f32 %v5932_v55, %v5931_v61  ;;  %v3889_v60 = vadd.f32 %v3857_v14, %v9090_v52  ;;  %v3920_v41 = vmul.f32 0.7978846, %v3888_v22 }
 0x48a   : > { %6064 = vmatprep.mubr.bf16.mxu1 %v4038_v29 }
 0x48b   : > { %v6780_v39 = vpop.eup %6779  ;;  %v3794_v58 = vmul.f32 0.044715, %v9101_v42  ;;  %v9106_v8 = vadd.f32 %v5933_v17, %v9043_v32  ;;  %v3921_v48 = vmul.f32 0.7978846, %v3889_v60  ;;  %6783 = vtanh.f32 %v3920_v41 }
 0x48c   : > { %v3982_v34 = vadd.f32 1.0, %v6780_v39  ;;  %v3762_v41 = vmul.f32 0.5, %v9101_v42 }
 0x48d   : > { %v6782_v51 = vpop.eup %6781  ;;  %v3826_v24 = vmul.f32 %v3794_v58, %v9101_v42  ;;  %v3795_v2 = vmul.f32 0.044715, %v9106_v8  ;;  %6785 = vtanh.f32 %v3921_v48 }
 0x48e   : > { %v3983_v62 = vadd.f32 1.0, %v6782_v51  ;;  %v4014_v3 = vmul.f32 %v3982_v34, %v3758_v56  ;;  %v3763_v34 = vmul.f32 0.5, %v9106_v8 }
 0x48f   : > { %v3827_v33 = vmul.f32 %v3795_v2, %v9106_v8  ;;  %v5934_v1 = vpop.f32.mrb[168].mxu0  ;;  %v3858_v45 = vmul.f32 %v3826_v24, %v9101_v42 }
 0x490   : > { %v5935_v25 = vpop.f32.mrb[169].mxu0  ;;  %v4015_v21 = vmul.f32 %v3983_v62, %v3759_v30 }
 0x491   : > { %v5936_v13 = vadd.f32 %v5935_v25, %v5934_v1  ;;  %v5937_v9 = vpop.f32.mrb[170].mxu0  ;;  %v3859_v31 = vmul.f32 %v3827_v33, %v9106_v8  ;;  %v3890_v20 = vadd.f32 %v3858_v45, %v9101_v42 }
 0x492   : > { %v5938_v12 = vpop.f32.mrb[171].mxu0  ;;  %v4039_v53 = vpack.c.bf16 %v4015_v21, %v4014_v3 }
 0x493   : > { %v9117_v54 = vadd.f32 %v5936_v13, %v9043_v32  ;;  %v5939_v36 = vadd.f32 %v5938_v12, %v5937_v9  ;;  %v3891_v40 = vadd.f32 %v3859_v31, %v9106_v8  ;;  %v3922_v49 = vmul.f32 0.7978846, %v3890_v20 }
 0x494   : > { %6065 = vmatmul.mubr.bf16.gmra.mrb[140].mxu1 %v4039_v53  ;;  %v6487_v53 = vld [vmem:[#allocation10 + $0xc0] sm:$0xff]  }
 0x495   : > { %v3796_v19 = vmul.f32 0.044715, %v9117_v54  ;;  %v9122_v38 = vadd.f32 %v5939_v36, %v9043_v32  ;;  %v3923_v4 = vmul.f32 0.7978846, %v3891_v40  ;;  %6787 = vtanh.f32 %v3922_v49  ;;  %v6784_v59 = vpop.eup %6783  ;;  %v6488_v36 = vld [vmem:[#allocation10 + $0xc8] sm:$0xff]   ;;  %6084 = vmatprep.subr.bf16.mxu1 %v6487_v53 }
 0x496   : > { %v3984_v63 = vadd.f32 1.0, %v6784_v59  ;;  %6085 = vmatpush3.bf16.msra.mxu1 %v6487_v53 }
 0x497   : > { %v6786_v18 = vpop.eup %6785  ;;  %v3828_v47 = vmul.f32 %v3796_v19, %v9117_v54  ;;  %v3797_v35 = vmul.f32 0.044715, %v9122_v38  ;;  %6789 = vtanh.f32 %v3923_v4  ;;  %6086 = vmatprep.subr.bf16.mxu1 %v6488_v36 }
 0x498   : > { %v3985_v44 = vadd.f32 1.0, %v6786_v18  ;;  %v4016_v57 = vmul.f32 %v3984_v63, %v3760_v50 }
 0x499   : > { %v3829_v46 = vmul.f32 %v3797_v35, %v9122_v38  ;;  %v3860_v43 = vmul.f32 %v3828_v47, %v9117_v54  ;;  %v3764_v35 = vmul.f32 0.5, %v9117_v54 }
 0x49a   : > { %v5940_v23 = vpop.f32.mrb[172].mxu0  ;;  %v4017_v16 = vmul.f32 %v3985_v44, %v3761_v5  ;;  %v3765_v44 = vmul.f32 0.5, %v9122_v38  ;;  %6087 = vmatpush3.bf16.msra.mxu1 %v6488_v36 }
 0x49b   : > { %v5941_v27 = vpop.f32.mrb[173].mxu0  ;;  %v3861_v7 = vmul.f32 %v3829_v46, %v9122_v38  ;;  %v3892_v11 = vadd.f32 %v3860_v43, %v9117_v54 }
 0x49c   : > { %v5942_v0 = vadd.f32 %v5941_v27, %v5940_v23  ;;  %v5943_v15 = vpop.f32.mrb[174].mxu0  ;;  %v4040_v6 = vpack.c.bf16 %v4017_v16, %v4016_v57  ;;  %v6489_v16 = vld [vmem:[#allocation10 + $0xd0] sm:$0xff]  }
 0x49d   : > { %v5944_v37 = vpop.f32.mrb[175].mxu0  ;;  %v3893_v28 = vadd.f32 %v3861_v7, %v9122_v38  ;;  %v3924_v52 = vmul.f32 0.7978846, %v3892_v11  ;;  %6088 = vmatprep.subr.bf16.mxu1 %v6489_v16 }
 0x49e   : > { %v9134_v61 = vadd.f32 %v5942_v0, %v9043_v32  ;;  %v5945_v26 = vadd.f32 %v5944_v37, %v5943_v15  ;;  %6068 = vmatprep.mubr.bf16.mxu1 %v4040_v6  ;;  %6089 = vmatpush3.bf16.msra.mxu1 %v6489_v16 }
 0x49f   : > { %v6788_v14 = vpop.eup %6787  ;;  %v3925_v22 = vmul.f32 0.7978846, %v3893_v28  ;;  %6791 = vtanh.f32 %v3924_v52  ;;  %v6490_v52 = vld [vmem:[#allocation10 + $0xd8] sm:$0xff]  }
 0x4a0   : > { %v3798_v55 = vmul.f32 0.044715, %v9134_v61  ;;  %v9138_v17 = vadd.f32 %v5945_v26, %v9043_v32  ;;  %v3986_v29 = vadd.f32 1.0, %v6788_v14  ;;  %6090 = vmatprep.subr.bf16.mxu1 %v6490_v52 }
 0x4a1   : > { %v6790_v60 = vpop.eup %6789  ;;  %6793 = vtanh.f32 %v3925_v22 }
 0x4a2   : > { %v3830_v39 = vmul.f32 %v3798_v55, %v9134_v61  ;;  %v3799_v58 = vmul.f32 0.044715, %v9138_v17  ;;  %v5946_v48 = vpop.f32.mrb[176].mxu0  ;;  %v3987_v51 = vadd.f32 1.0, %v6790_v60  ;;  %v4018_v2 = vmul.f32 %v3986_v29, %v3762_v41  ;;  %6091 = vmatpush3.bf16.msra.mxu1 %v6490_v52 }
 0x4a3   : > { %v5947_v24 = vpop.f32.mrb[177].mxu0 }
 0x4a4   : > { %v3831_v56 = vmul.f32 %v3799_v58, %v9138_v17  ;;  %v5948_v30 = vadd.f32 %v5947_v24, %v5946_v48  ;;  %v5949_v62 = vpop.f32.mrb[178].mxu0  ;;  %v4019_v33 = vmul.f32 %v3987_v51, %v3763_v34  ;;  %v3862_v1 = vmul.f32 %v3830_v39, %v9134_v61 }
 0x4a5   : > { %v5950_v45 = vpop.f32.mrb[179].mxu0 }
 0x4a6   : > { %v9147_v42 = vadd.f32 %v5948_v30, %v9043_v32  ;;  %v5951_v25 = vadd.f32 %v5950_v45, %v5949_v62  ;;  %v4041_v3 = vpack.c.bf16 %v4019_v33, %v4018_v2  ;;  %v3863_v21 = vmul.f32 %v3831_v56, %v9138_v17 }
 0x4a7   : > { %v3894_v8 = vadd.f32 %v3862_v1, %v9134_v61  ;;  %v3766_v62 = vmul.f32 0.5, %v9134_v61 }
 0x4a8   : > { %v3800_v13 = vmul.f32 0.044715, %v9147_v42  ;;  %v9153_v9 = vadd.f32 %v5951_v25, %v9043_v32  ;;  %6069 = vmatmul.mubr.bf16.gmra.mrb[144].mxu1 %v4041_v3  ;;  %v3895_v31 = vadd.f32 %v3863_v21, %v9138_v17  ;;  %v3767_v25 = vmul.f32 0.5, %v9138_v17 }
 0x4a9   : > { %v6792_v20 = vpop.eup %6791  ;;  %v3926_v12 = vmul.f32 0.7978846, %v3894_v8 }
 0x4aa   : > { %v3832_v40 = vmul.f32 %v3800_v13, %v9147_v42  ;;  %v3801_v49 = vmul.f32 0.044715, %v9153_v9  ;;  %v5952_v19 = vpop.f32.mrb[180].mxu0  ;;  %v3988_v4 = vadd.f32 1.0, %v6792_v20  ;;  %v3927_v59 = vmul.f32 0.7978846, %v3895_v31 }
 0x4ab   : > { %v6794_v18 = vpop.eup %6793  ;;  %v5953_v47 = vpop.f32.mrb[181].mxu0  ;;  %6795 = vtanh.f32 %v3926_v12 }
 0x4ac   : > { %v3833_v63 = vmul.f32 %v3801_v49, %v9153_v9  ;;  %v5954_v50 = vadd.f32 %v5953_v47, %v5952_v19  ;;  %v5955_v5 = vpop.f32.mrb[182].mxu0  ;;  %v3989_v46 = vadd.f32 1.0, %v6794_v18  ;;  %v4020_v23 = vmul.f32 %v3988_v4, %v3764_v35 }
 0x4ad   : > { %v5956_v43 = vpop.f32.mrb[183].mxu0  ;;  %6797 = vtanh.f32 %v3927_v59  ;;  %v3864_v57 = vmul.f32 %v3832_v40, %v9147_v42 }
 0x4ae   : > { %v9163_v27 = vadd.f32 %v5954_v50, %v9043_v32  ;;  %v5957_v54 = vadd.f32 %v5956_v43, %v5955_v5  ;;  %v4021_v7 = vmul.f32 %v3989_v46, %v3765_v44  ;;  %v3865_v11 = vmul.f32 %v3833_v63, %v9153_v9 }
 0x4af   : > { %v3896_v0 = vadd.f32 %v3864_v57, %v9147_v42  ;;  %v3768_v44 = vmul.f32 0.5, %v9147_v42  ;;  %v3769_v46 = vmul.f32 0.5, %v9153_v9 }
 0x4b0   : > { %v3802_v38 = vmul.f32 0.044715, %v9163_v27  ;;  %v9169_v15 = vadd.f32 %v5957_v54, %v9043_v32  ;;  %v4042_v6 = vpack.c.bf16 %v4021_v7, %v4020_v23  ;;  %v3897_v37 = vadd.f32 %v3865_v11, %v9153_v9  ;;  %v6491_v7 = vld [vmem:[#allocation10 + $0xe0] sm:$0xff]  }
 0x4b1   : > { %v3928_v28 = vmul.f32 0.7978846, %v3896_v0  ;;  %6092 = vmatprep.subr.bf16.mxu1 %v6491_v7 }
 0x4b2   : > { %v3834_v26 = vmul.f32 %v3802_v38, %v9163_v27  ;;  %v3803_v14 = vmul.f32 0.044715, %v9169_v15  ;;  %v5958_v22 = vpop.f32.mrb[184].mxu0  ;;  %6072 = vmatprep.mubr.bf16.mxu1 %v4042_v6  ;;  %v3929_v55 = vmul.f32 0.7978846, %v3897_v37  ;;  %v6492_v6 = vld [vmem:[#allocation10 + $0xe8] sm:$0xff]   ;;  %6093 = vmatpush3.bf16.msra.mxu1 %v6491_v7 }
 0x4b3   : > { %v5959_v29 = vpop.f32.mrb[185].mxu0  ;;  %6799 = vtanh.f32 %v3928_v28  ;;  %6094 = vmatprep.subr.bf16.mxu1 %v6492_v6 }
 0x4b4   : > { %v3835_v60 = vmul.f32 %v3803_v14, %v9169_v15  ;;  %v5960_v41 = vadd.f32 %v5959_v29, %v5958_v22  ;;  %v5961_v39 = vpop.f32.mrb[186].mxu0  ;;  %6801 = vtanh.f32 %v3929_v55  ;;  %v3866_v58 = vmul.f32 %v3834_v26, %v9163_v27 }
 0x4b5   : > { %v6796_v48 = vpop.eup %6795  ;;  %v5962_v34 = vpop.f32.mrb[187].mxu0 }
 0x4b6   : > { %v9177_v51 = vadd.f32 %v5960_v41, %v9043_v32  ;;  %v5963_v24 = vadd.f32 %v5962_v34, %v5961_v39  ;;  %v3990_v2 = vadd.f32 1.0, %v6796_v48  ;;  %v3867_v56 = vmul.f32 %v3835_v60, %v9169_v15  ;;  %6095 = vmatpush3.bf16.msra.mxu1 %v6492_v6 }
 0x4b7   : > { %v6798_v30 = vpop.eup %6797  ;;  %v3898_v33 = vadd.f32 %v3866_v58, %v9163_v27  ;;  %v3770_v41 = vmul.f32 0.5, %v9163_v27  ;;  %v3771_v39 = vmul.f32 0.5, %v9169_v15 }
 0x4b8   : > { %v3804_v1 = vmul.f32 0.044715, %v9177_v51  ;;  %v9184_v45 = vadd.f32 %v5963_v24, %v9043_v32  ;;  %v3991_v3 = vadd.f32 1.0, %v6798_v30  ;;  %v3899_v21 = vadd.f32 %v3867_v56, %v9169_v15  ;;  %v6494_v24 = vld [vmem:[#allocation10 + $0xf8] sm:$0xff]  }
 0x4b9   : > { %v3930_v8 = vmul.f32 0.7978846, %v3898_v33  ;;  %v4022_v61 = vmul.f32 %v3990_v2, %v3766_v62 }
 0x4ba   : > { %v3836_v13 = vmul.f32 %v3804_v1, %v9177_v51  ;;  %v3805_v31 = vmul.f32 0.044715, %v9184_v45  ;;  %v5964_v20 = vpop.f32.mrb[188].mxu0  ;;  %v4023_v12 = vmul.f32 %v3991_v3, %v3767_v25  ;;  %v3931_v36 = vmul.f32 0.7978846, %v3899_v21 }
 0x4bb   : > { %v5965_v53 = vpop.f32.mrb[189].mxu0  ;;  %6803 = vtanh.f32 %v3930_v8  ;;  %v3772_v25 = vmul.f32 0.5, %v9177_v51  ;;  %v3773_v15 = vmul.f32 0.5, %v9184_v45 }
 0x4bc   : > { %v3837_v40 = vmul.f32 %v3805_v31, %v9184_v45  ;;  %v5966_v49 = vadd.f32 %v5965_v53, %v5964_v20  ;;  %v5967_v19 = vpop.f32.mrb[190].mxu0  ;;  %v4043_v17 = vpack.c.bf16 %v4023_v12, %v4022_v61  ;;  %v3868_v4 = vmul.f32 %v3836_v13, %v9177_v51 }
 0x4bd   : > { %v6800_v59 = vpop.eup %6799  ;;  %v5968_v18 = vpop.f32.mrb[191].mxu0  ;;  %6805 = vtanh.f32 %v3931_v36 }
 0x4be   : > { %v6802_v47 = vpop.eup %6801  ;;  %v9193_v35 = vadd.f32 %v5966_v49, %v9043_v32  ;;  %v5969_v63 = vadd.f32 %v5968_v18, %v5967_v19  ;;  %6073 = vmatmul.mubr.bf16.gmra.mrb[148].mxu1 %v4043_v17  ;;  %v3992_v50 = vadd.f32 1.0, %v6800_v59  ;;  %v3869_v5 = vmul.f32 %v3837_v40, %v9184_v45 }
 0x4bf   : > { %v3993_v43 = vadd.f32 1.0, %v6802_v47  ;;  %v3900_v23 = vadd.f32 %v3868_v4, %v9177_v51  ;;  %v9213_v51 = vld [vmem:[%s9583_s5 + $0x3] ss:$0 sm:$0xff] }
 0x4c0   : > { %v3806_v57 = vmul.f32 0.044715, %v9193_v35  ;;  %v3741_v16 = vadd.f32 %v5969_v63, %v9043_v32  ;;  %v3901_v54 = vadd.f32 %v3869_v5, %v9184_v45  ;;  %v4024_v11 = vmul.f32 %v3992_v50, %v3768_v44  ;;  %v6493_v32 = vld [vmem:[#allocation10 + $0xf0] sm:$0xff]  }
 0x4c1   : > { %v4025_v0 = vmul.f32 %v3993_v43, %v3769_v46  ;;  %v3932_v38 = vmul.f32 0.7978846, %v3900_v23  ;;  %6096 = vmatprep.subr.bf16.mxu1 %v6493_v32  ;;  %v3774_v12 = vmul.f32 0.5, %v9193_v35 }
 0x4c2   : > { %v3838_v37 = vmul.f32 %v3806_v57, %v9193_v35  ;;  %v3807_v28 = vmul.f32 0.044715, %v3741_v16  ;;  %v3933_v42 = vmul.f32 0.7978846, %v3901_v54  ;;  %6097 = vmatpush3.bf16.msra.mxu1 %v6493_v32  ;;  %v3775_v53 = vmul.f32 0.5, %v3741_v16 }
 0x4c3   : > { %v4044_v9 = vpack.c.bf16 %v4025_v0, %v4024_v11  ;;  %6807 = vtanh.f32 %v3932_v38  ;;  %6098 = vmatprep.subr.bf16.mxu1 %v6494_v24 }
 0x4c4   : > { %v3839_v52 = vmul.f32 %v3807_v28, %v3741_v16  ;;  %6809 = vtanh.f32 %v3933_v42  ;;  %v3870_v26 = vmul.f32 %v3838_v37, %v9193_v35 }
 0x4c5   : > { %v6804_v14 = vpop.eup %6803  ;;  %6076 = vmatprep.mubr.bf16.mxu1 %v4044_v9 }
 0x4c6   : > { %v3994_v22 = vadd.f32 1.0, %v6804_v14  ;;  %v3871_v55 = vmul.f32 %v3839_v52, %v3741_v16  ;;  %v3902_v29 = vadd.f32 %v3870_v26, %v9193_v35  ;;  %6099 = vmatpush3.bf16.msra.mxu1 %v6494_v24 }
 0x4c7   : > { %v6806_v60 = vpop.eup %6805 }
 0x4c8   : > { %v3995_v58 = vadd.f32 1.0, %v6806_v60  ;;  %v3903_v48 = vadd.f32 %v3871_v55, %v3741_v16  ;;  %v3934_v34 = vmul.f32 0.7978846, %v3902_v29  ;;  %v4026_v2 = vmul.f32 %v3994_v22, %v3770_v41 }
 0x4ca   : > { %v4027_v56 = vmul.f32 %v3995_v58, %v3771_v39  ;;  %v3935_v30 = vmul.f32 0.7978846, %v3903_v48  ;;  %6811 = vtanh.f32 %v3934_v34 }
 0x4cc   : > { %v4045_v62 = vpack.c.bf16 %v4027_v56, %v4026_v2  ;;  %6813 = vtanh.f32 %v3935_v30 }
 0x4cd   : > { %v6808_v33 = vpop.eup %6807 }
 0x4ce   : > { %v6810_v1 = vpop.eup %6809  ;;  %6077 = vmatmul.mubr.bf16.gmra.mrb[152].mxu1 %v4045_v62  ;;  %v3996_v27 = vadd.f32 1.0, %v6808_v33 }
 0x4cf   : > { %v3997_v3 = vadd.f32 1.0, %v6810_v1 }
 0x4d0   : > { %v4028_v21 = vmul.f32 %v3996_v27, %v3772_v25 }
 0x4d1   : > { %v4029_v8 = vmul.f32 %v3997_v3, %v3773_v15 }
 0x4d3   : > { %v4046_v13 = vpack.c.bf16 %v4029_v8, %v4028_v21 }
 0x4d4   : > { %v6812_v31 = vpop.eup %6811 }
 0x4d5   : > { %6080 = vmatprep.mubr.bf16.mxu1 %v4046_v13  ;;  %v3998_v20 = vadd.f32 1.0, %v6812_v31 }
 0x4d6   : > { %v6814_v61 = vpop.eup %6813 }
 0x4d7   : > { %v3999_v36 = vadd.f32 1.0, %v6814_v61  ;;  %v4030_v40 = vmul.f32 %v3998_v20, %v3774_v12 }
 0x4d9   : > { %v4031_v49 = vmul.f32 %v3999_v36, %v3775_v53 }
 0x4db   : > { %v4047_v19 = vpack.c.bf16 %v4031_v49, %v4030_v40 }
 0x4dd   : > { %6081 = vmatmul.mubr.bf16.gmra.mrb[156].mxu1 %v4047_v19 }
 0x51c   : > { %v6054_v45 = vpop.f32.mrb[128].mxu1 }
 0x51d   : > { %v4139_v17 = vadd.f32 %v6054_v45, %v9213_v51  ;;  %v4130_v4 = vpop.f32.mrb[129].mxu1 }
 0x51e   : > { %v4131_v59 = vadd.f32 %v4130_v4, %v9213_v51  ;;  %v6055_v18 = vpop.f32.mrb[130].mxu1 }
 0x51f   : > { %v4291_v47 = vmul.f32 0.044715, %v4139_v17  ;;  %v4142_v35 = vadd.f32 %v6055_v18, %v9213_v51  ;;  %v4133_v63 = vpop.f32.mrb[131].mxu1  ;;  %v4259_v41 = vmul.f32 0.5, %v4139_v17 }
 0x520   : > { %v4289_v50 = vmul.f32 0.044715, %v4131_v59  ;;  %v4134_v5 = vadd.f32 %v4133_v63, %v9213_v51  ;;  %v4257_v48 = vmul.f32 0.5, %v4131_v59 }
 0x521   : > { %v4323_v44 = vmul.f32 %v4291_v47, %v4139_v17  ;;  %v4292_v46 = vmul.f32 0.044715, %v4142_v35  ;;  %v4260_v39 = vmul.f32 0.5, %v4142_v35 }
 0x522   : > { %v4321_v43 = vmul.f32 %v4289_v50, %v4131_v59  ;;  %v4290_v23 = vmul.f32 0.044715, %v4134_v5  ;;  %v4258_v34 = vmul.f32 0.5, %v4134_v5 }
 0x523   : > { %v4355_v57 = vmul.f32 %v4323_v44, %v4139_v17  ;;  %v4324_v16 = vmul.f32 %v4292_v46, %v4142_v35 }
 0x524   : > { %v4353_v54 = vmul.f32 %v4321_v43, %v4131_v59  ;;  %v4322_v7 = vmul.f32 %v4290_v23, %v4134_v5 }
 0x525   : > { %v4387_v11 = vadd.f32 %v4355_v57, %v4139_v17  ;;  %v4356_v0 = vmul.f32 %v4324_v16, %v4142_v35 }
 0x526   : > { %v4354_v38 = vmul.f32 %v4322_v7, %v4134_v5  ;;  %v4385_v6 = vadd.f32 %v4353_v54, %v4131_v59 }
 0x527   : > { %v4419_v37 = vmul.f32 0.7978846, %v4387_v11  ;;  %v4388_v28 = vadd.f32 %v4356_v0, %v4142_v35 }
 0x528   : > { %v4386_v42 = vadd.f32 %v4354_v38, %v4134_v5  ;;  %v4417_v9 = vmul.f32 0.7978846, %v4385_v6 }
 0x529   : > { %6815 = vtanh.f32 %v4419_v37  ;;  %v4420_v52 = vmul.f32 0.7978846, %v4388_v28 }
 0x52a   : > { %v4418_v26 = vmul.f32 0.7978846, %v4386_v42  ;;  %6817 = vtanh.f32 %v4417_v9 }
 0x52b   : > { %6819 = vtanh.f32 %v4420_v52 }
 0x52c   : > { %6821 = vtanh.f32 %v4418_v26 }
 0x533   : > { %v6816_v32 = vpop.eup %6815 }
 0x534   : > { %v6818_v14 = vpop.eup %6817  ;;  %v4483_v22 = vadd.f32 1.0, %v6816_v32 }
 0x535   : > { %v6820_v55 = vpop.eup %6819  ;;  %v4481_v29 = vadd.f32 1.0, %v6818_v14 }
 0x536   : > { %v6822_v60 = vpop.eup %6821  ;;  %v4484_v58 = vadd.f32 1.0, %v6820_v55  ;;  %v4515_v2 = vmul.f32 %v4483_v22, %v4259_v41 }
 0x537   : > { %v4482_v24 = vadd.f32 1.0, %v6822_v60  ;;  %v6058_v30 = vpop.f32.mrb[132].mxu1  ;;  %v4513_v62 = vmul.f32 %v4481_v29, %v4257_v48 }
 0x538   : > { %v4516_v56 = vmul.f32 %v4484_v58, %v4260_v39  ;;  %v4155_v1 = vadd.f32 %v6058_v30, %v9213_v51  ;;  %v4146_v27 = vpop.f32.mrb[133].mxu1 }
 0x539   : > { %v4514_v33 = vmul.f32 %v4482_v24, %v4258_v34  ;;  %v4147_v15 = vadd.f32 %v4146_v27, %v9213_v51  ;;  %v6059_v3 = vpop.f32.mrb[134].mxu1 }
 0x53a   : > { %v4546_v25 = vpack.c.bf16 %v4516_v56, %v4515_v2  ;;  %v4295_v8 = vmul.f32 0.044715, %v4155_v1  ;;  %v4158_v13 = vadd.f32 %v6059_v3, %v9213_v51  ;;  %v4149_v31 = vpop.f32.mrb[135].mxu1  ;;  %v4263_v11 = vmul.f32 0.5, %v4155_v1 }
 0x53b   : > { %v4545_v21 = vpack.c.bf16 %v4514_v33, %v4513_v62  ;;  %v4293_v20 = vmul.f32 0.044715, %v4147_v15  ;;  %v4150_v61 = vadd.f32 %v4149_v31, %v9213_v51  ;;  %v4261_v37 = vmul.f32 0.5, %v4147_v15 }
 0x53c   : > { %v4327_v12 = vmul.f32 %v4295_v8, %v4155_v1  ;;  %v4296_v53 = vmul.f32 0.044715, %v4158_v13  ;;  %v4264_v0 = vmul.f32 0.5, %v4158_v13 }
 0x53d   : > { %6100 = vmatprep.mubr.bf16.mxu1 %v4545_v21  ;;  %v4325_v36 = vmul.f32 %v4293_v20, %v4147_v15  ;;  %v4294_v40 = vmul.f32 0.044715, %v4150_v61  ;;  %v4262_v28 = vmul.f32 0.5, %v4150_v61 }
 0x53e   : > { %6101 = vmatmul.mubr.bf16.vlgmr.msra.gmra.mrb[160].mxu1 %v4546_v25  ;;  %v4359_v49 = vmul.f32 %v4327_v12, %v4155_v1  ;;  %v4328_v19 = vmul.f32 %v4296_v53, %v4158_v13 }
 0x53f   : > { %v4357_v45 = vmul.f32 %v4325_v36, %v4147_v15  ;;  %v4326_v17 = vmul.f32 %v4294_v40, %v4150_v61 }
 0x540   : > { %v4360_v4 = vmul.f32 %v4328_v19, %v4158_v13  ;;  %v4391_v59 = vadd.f32 %v4359_v49, %v4155_v1 }
 0x541   : > { %v4358_v18 = vmul.f32 %v4326_v17, %v4150_v61  ;;  %v4389_v47 = vadd.f32 %v4357_v45, %v4147_v15 }
 0x542   : > { %v4392_v35 = vadd.f32 %v4360_v4, %v4158_v13  ;;  %v4423_v63 = vmul.f32 0.7978846, %v4391_v59 }
 0x543   : > { %v4390_v50 = vadd.f32 %v4358_v18, %v4150_v61  ;;  %v4421_v5 = vmul.f32 0.7978846, %v4389_v47 }
 0x544   : > { %v4424_v44 = vmul.f32 0.7978846, %v4392_v35  ;;  %6823 = vtanh.f32 %v4423_v63 }
 0x545   : > { %v4422_v46 = vmul.f32 0.7978846, %v4390_v50  ;;  %6825 = vtanh.f32 %v4421_v5 }
 0x546   : > { %6827 = vtanh.f32 %v4424_v44 }
 0x547   : > { %6829 = vtanh.f32 %v4422_v46 }
 0x54e   : > { %v6824_v43 = vpop.eup %6823 }
 0x54f   : > { %v6826_v23 = vpop.eup %6825  ;;  %v4487_v57 = vadd.f32 1.0, %v6824_v43 }
 0x550   : > { %v6828_v16 = vpop.eup %6827  ;;  %v4485_v54 = vadd.f32 1.0, %v6826_v23 }
 0x551   : > { %v6830_v7 = vpop.eup %6829  ;;  %v4488_v38 = vadd.f32 1.0, %v6828_v16  ;;  %v6062_v6 = vpop.f32.mrb[136].mxu1  ;;  %v4519_v26 = vmul.f32 %v4487_v57, %v4263_v11 }
 0x552   : > { %v4486_v42 = vadd.f32 1.0, %v6830_v7  ;;  %v4171_v9 = vadd.f32 %v6062_v6, %v9213_v51  ;;  %v4162_v52 = vpop.f32.mrb[137].mxu1  ;;  %v4517_v55 = vmul.f32 %v4485_v54, %v4261_v37 }
 0x553   : > { %v4520_v32 = vmul.f32 %v4488_v38, %v4264_v0  ;;  %v4163_v14 = vadd.f32 %v4162_v52, %v9213_v51  ;;  %v6063_v22 = vpop.f32.mrb[138].mxu1 }
 0x554   : > { %v4518_v29 = vmul.f32 %v4486_v42, %v4262_v28  ;;  %v4299_v60 = vmul.f32 0.044715, %v4171_v9  ;;  %v4174_v41 = vadd.f32 %v6063_v22, %v9213_v51  ;;  %v4165_v39 = vpop.f32.mrb[139].mxu1  ;;  %v4267_v35 = vmul.f32 0.5, %v4171_v9 }
 0x555   : > { %v4548_v58 = vpack.c.bf16 %v4520_v32, %v4519_v26  ;;  %v4297_v48 = vmul.f32 0.044715, %v4163_v14  ;;  %v4166_v34 = vadd.f32 %v4165_v39, %v9213_v51  ;;  %v4265_v46 = vmul.f32 0.5, %v4163_v14 }
 0x556   : > { %v4547_v24 = vpack.c.bf16 %v4518_v29, %v4517_v55  ;;  %v4331_v2 = vmul.f32 %v4299_v60, %v4171_v9  ;;  %v4300_v56 = vmul.f32 0.044715, %v4174_v41  ;;  %v4268_v54 = vmul.f32 0.5, %v4174_v41 }
 0x557   : > { %v4329_v30 = vmul.f32 %v4297_v48, %v4163_v14  ;;  %v4298_v62 = vmul.f32 0.044715, %v4166_v34  ;;  %v4266_v38 = vmul.f32 0.5, %v4166_v34 }
 0x558   : > { %6104 = vmatprep.mubr.bf16.mxu1 %v4547_v24  ;;  %v4363_v33 = vmul.f32 %v4331_v2, %v4171_v9  ;;  %v4332_v1 = vmul.f32 %v4300_v56, %v4174_v41 }
 0x559   : > { %6105 = vmatmul.mubr.bf16.gmra.mrb[164].mxu1 %v4548_v58  ;;  %v4361_v27 = vmul.f32 %v4329_v30, %v4163_v14  ;;  %v4330_v25 = vmul.f32 %v4298_v62, %v4166_v34 }
 0x55a   : > { %v4364_v15 = vmul.f32 %v4332_v1, %v4174_v41  ;;  %v4395_v3 = vadd.f32 %v4363_v33, %v4171_v9 }
 0x55b   : > { %v4362_v21 = vmul.f32 %v4330_v25, %v4166_v34  ;;  %v4393_v8 = vadd.f32 %v4361_v27, %v4163_v14 }
 0x55c   : > { %v4396_v13 = vadd.f32 %v4364_v15, %v4174_v41  ;;  %v4427_v31 = vmul.f32 0.7978846, %v4395_v3 }
 0x55d   : > { %v4394_v20 = vadd.f32 %v4362_v21, %v4166_v34  ;;  %v4425_v61 = vmul.f32 0.7978846, %v4393_v8 }
 0x55e   : > { %v4428_v12 = vmul.f32 0.7978846, %v4396_v13  ;;  %6831 = vtanh.f32 %v4427_v31 }
 0x55f   : > { %v4426_v53 = vmul.f32 0.7978846, %v4394_v20  ;;  %6833 = vtanh.f32 %v4425_v61 }
 0x560   : > { %6835 = vtanh.f32 %v4428_v12 }
 0x561   : > { %6837 = vtanh.f32 %v4426_v53 }
 0x567   : > { %v6066_v36 = vpop.f32.mrb[140].mxu1 }
 0x568   : > { %v9228_v40 = vadd.f32 %v6066_v36, %v9213_v51  ;;  %v4178_v49 = vpop.f32.mrb[141].mxu1  ;;  %v6832_v19 = vpop.eup %6831 }
 0x569   : > { %v9231_v45 = vadd.f32 %v4178_v49, %v9213_v51  ;;  %v6067_v17 = vpop.f32.mrb[142].mxu1  ;;  %v6834_v4 = vpop.eup %6833  ;;  %v4491_v63 = vadd.f32 1.0, %v6832_v19 }
 0x56a   : > { %v4303_v59 = vmul.f32 0.044715, %v9228_v40  ;;  %v9235_v18 = vadd.f32 %v6067_v17, %v9213_v51  ;;  %v4181_v47 = vpop.f32.mrb[143].mxu1  ;;  %v6836_v50 = vpop.eup %6835  ;;  %v4489_v43 = vadd.f32 1.0, %v6834_v4  ;;  %v4271_v20 = vmul.f32 0.5, %v9228_v40 }
 0x56b   : > { %v4301_v5 = vmul.f32 0.044715, %v9231_v45  ;;  %v9239_v44 = vadd.f32 %v4181_v47, %v9213_v51  ;;  %v6838_v23 = vpop.eup %6837  ;;  %v4492_v7 = vadd.f32 1.0, %v6836_v50  ;;  %v4523_v42 = vmul.f32 %v4491_v63, %v4267_v35 }
 0x56c   : > { %v4335_v57 = vmul.f32 %v4303_v59, %v9228_v40  ;;  %v4304_v16 = vmul.f32 0.044715, %v9235_v18  ;;  %v4490_v6 = vadd.f32 1.0, %v6838_v23  ;;  %v4521_v32 = vmul.f32 %v4489_v43, %v4265_v46 }
 0x56d   : > { %v4333_v11 = vmul.f32 %v4301_v5, %v9231_v45  ;;  %v4302_v0 = vmul.f32 0.044715, %v9239_v44  ;;  %v4524_v9 = vmul.f32 %v4492_v7, %v4268_v54  ;;  %v4269_v49 = vmul.f32 0.5, %v9231_v45 }
 0x56e   : > { %v4367_v37 = vmul.f32 %v4335_v57, %v9228_v40  ;;  %v4336_v28 = vmul.f32 %v4304_v16, %v9235_v18  ;;  %v4522_v14 = vmul.f32 %v4490_v6, %v4266_v38  ;;  %v4272_v47 = vmul.f32 0.5, %v9235_v18 }
 0x56f   : > { %v4365_v52 = vmul.f32 %v4333_v11, %v9231_v45  ;;  %v4334_v26 = vmul.f32 %v4302_v0, %v9239_v44  ;;  %v4550_v55 = vpack.c.bf16 %v4524_v9, %v4523_v42  ;;  %v4270_v5 = vmul.f32 0.5, %v9239_v44 }
 0x570   : > { %v4368_v22 = vmul.f32 %v4336_v28, %v9235_v18  ;;  %v4399_v29 = vadd.f32 %v4367_v37, %v9228_v40  ;;  %v4549_v41 = vpack.c.bf16 %v4522_v14, %v4521_v32 }
 0x571   : > { %v4366_v60 = vmul.f32 %v4334_v26, %v9239_v44  ;;  %v4397_v39 = vadd.f32 %v4365_v52, %v9231_v45 }
 0x572   : > { %v4400_v58 = vadd.f32 %v4368_v22, %v9235_v18  ;;  %v4431_v48 = vmul.f32 0.7978846, %v4399_v29  ;;  %6108 = vmatprep.mubr.bf16.mxu1 %v4549_v41 }
 0x573   : > { %v4398_v34 = vadd.f32 %v4366_v60, %v9239_v44  ;;  %v4429_v24 = vmul.f32 0.7978846, %v4397_v39  ;;  %6109 = vmatmul.mubr.bf16.gmra.mrb[168].mxu1 %v4550_v55 }
 0x574   : > { %v4432_v2 = vmul.f32 0.7978846, %v4400_v58  ;;  %6839 = vtanh.f32 %v4431_v48 }
 0x575   : > { %v4430_v56 = vmul.f32 0.7978846, %v4398_v34  ;;  %6841 = vtanh.f32 %v4429_v24 }
 0x576   : > { %6843 = vtanh.f32 %v4432_v2 }
 0x577   : > { %6845 = vtanh.f32 %v4430_v56 }
 0x57b   : > { %v6070_v30 = vpop.f32.mrb[144].mxu1 }
 0x57c   : > { %v4203_v62 = vadd.f32 %v6070_v30, %v9213_v51  ;;  %v4194_v33 = vpop.f32.mrb[145].mxu1 }
 0x57d   : > { %v4195_v1 = vadd.f32 %v4194_v33, %v9213_v51  ;;  %v6071_v27 = vpop.f32.mrb[146].mxu1 }
 0x57e   : > { %v6840_v25 = vpop.eup %6839  ;;  %v4307_v15 = vmul.f32 0.044715, %v4203_v62  ;;  %v9258_v3 = vadd.f32 %v6071_v27, %v9213_v51  ;;  %v4197_v21 = vpop.f32.mrb[147].mxu1  ;;  %v4275_v60 = vmul.f32 0.5, %v4203_v62 }
 0x57f   : > { %v6842_v8 = vpop.eup %6841  ;;  %v4305_v13 = vmul.f32 0.044715, %v4195_v1  ;;  %v4198_v31 = vadd.f32 %v4197_v21, %v9213_v51  ;;  %v4495_v61 = vadd.f32 1.0, %v6840_v25  ;;  %v4273_v24 = vmul.f32 0.5, %v4195_v1 }
 0x580   : > { %v6844_v12 = vpop.eup %6843  ;;  %v4339_v53 = vmul.f32 %v4307_v15, %v4203_v62  ;;  %v4308_v36 = vmul.f32 0.044715, %v9258_v3  ;;  %v4493_v19 = vadd.f32 1.0, %v6842_v8  ;;  %v4276_v27 = vmul.f32 0.5, %v9258_v3 }
 0x581   : > { %v6846_v17 = vpop.eup %6845  ;;  %v4337_v4 = vmul.f32 %v4305_v13, %v4195_v1  ;;  %v4306_v59 = vmul.f32 0.044715, %v4198_v31  ;;  %v4496_v35 = vadd.f32 1.0, %v6844_v12  ;;  %v4527_v23 = vmul.f32 %v4495_v61, %v4271_v20 }
 0x582   : > { %v4371_v63 = vmul.f32 %v4339_v53, %v4203_v62  ;;  %v4340_v50 = vmul.f32 %v4308_v36, %v9258_v3  ;;  %v4494_v40 = vadd.f32 1.0, %v6846_v17  ;;  %v4525_v45 = vmul.f32 %v4493_v19, %v4269_v49 }
 0x583   : > { %v4369_v46 = vmul.f32 %v4337_v4, %v4195_v1  ;;  %v4338_v43 = vmul.f32 %v4306_v59, %v4198_v31  ;;  %v4528_v57 = vmul.f32 %v4496_v35, %v4272_v47  ;;  %v4274_v21 = vmul.f32 0.5, %v4198_v31 }
 0x584   : > { %v4372_v16 = vmul.f32 %v4340_v50, %v9258_v3  ;;  %v4526_v54 = vmul.f32 %v4494_v40, %v4270_v5  ;;  %v4403_v7 = vadd.f32 %v4371_v63, %v4203_v62 }
 0x585   : > { %v4370_v11 = vmul.f32 %v4338_v43, %v4198_v31  ;;  %v4552_v0 = vpack.c.bf16 %v4528_v57, %v4527_v23  ;;  %v4401_v38 = vadd.f32 %v4369_v46, %v4195_v1 }
 0x586   : > { %v4551_v18 = vpack.c.bf16 %v4526_v54, %v4525_v45  ;;  %v4404_v6 = vadd.f32 %v4372_v16, %v9258_v3  ;;  %v4435_v37 = vmul.f32 0.7978846, %v4403_v7 }
 0x587   : > { %v4402_v28 = vadd.f32 %v4370_v11, %v4198_v31  ;;  %v4433_v42 = vmul.f32 0.7978846, %v4401_v38 }
 0x588   : > { %6112 = vmatprep.mubr.bf16.mxu1 %v4551_v18  ;;  %v4436_v44 = vmul.f32 0.7978846, %v4404_v6  ;;  %6847 = vtanh.f32 %v4435_v37 }
 0x589   : > { %6113 = vmatmul.mubr.bf16.gmra.mrb[172].mxu1 %v4552_v0  ;;  %v4434_v9 = vmul.f32 0.7978846, %v4402_v28  ;;  %6849 = vtanh.f32 %v4433_v42 }
 0x58a   : > { %6851 = vtanh.f32 %v4436_v44 }
 0x58b   : > { %6853 = vtanh.f32 %v4434_v9 }
 0x591   : > { %v6074_v52 = vpop.f32.mrb[148].mxu1 }
 0x592   : > { %v6848_v26 = vpop.eup %6847  ;;  %v9270_v32 = vadd.f32 %v6074_v52, %v9213_v51  ;;  %v4210_v14 = vpop.f32.mrb[149].mxu1 }
 0x593   : > { %v6850_v22 = vpop.eup %6849  ;;  %v9273_v55 = vadd.f32 %v4210_v14, %v9213_v51  ;;  %v6075_v29 = vpop.f32.mrb[150].mxu1  ;;  %v4499_v41 = vadd.f32 1.0, %v6848_v26 }
 0x594   : > { %v6852_v39 = vpop.eup %6851  ;;  %v4311_v58 = vmul.f32 0.044715, %v9270_v32  ;;  %v9277_v48 = vadd.f32 %v6075_v29, %v9213_v51  ;;  %v4213_v34 = vpop.f32.mrb[151].mxu1  ;;  %v4497_v2 = vadd.f32 1.0, %v6850_v22  ;;  %v4279_v29 = vmul.f32 0.5, %v9270_v32 }
 0x595   : > { %v6854_v56 = vpop.eup %6853  ;;  %v4309_v30 = vmul.f32 0.044715, %v9273_v55  ;;  %v9281_v33 = vadd.f32 %v4213_v34, %v9213_v51  ;;  %v4500_v25 = vadd.f32 1.0, %v6852_v39  ;;  %v4531_v20 = vmul.f32 %v4499_v41, %v4275_v60 }
 0x596   : > { %v4343_v62 = vmul.f32 %v4311_v58, %v9270_v32  ;;  %v4312_v15 = vmul.f32 0.044715, %v9277_v48  ;;  %v4498_v8 = vadd.f32 1.0, %v6854_v56  ;;  %v4529_v36 = vmul.f32 %v4497_v2, %v4273_v24 }
 0x597   : > { %v4341_v13 = vmul.f32 %v4309_v30, %v9273_v55  ;;  %v4310_v1 = vmul.f32 0.044715, %v9281_v33  ;;  %v4532_v61 = vmul.f32 %v4500_v25, %v4276_v27  ;;  %v4277_v58 = vmul.f32 0.5, %v9273_v55 }
 0x598   : > { %v4375_v12 = vmul.f32 %v4343_v62, %v9270_v32  ;;  %v4344_v53 = vmul.f32 %v4312_v15, %v9277_v48  ;;  %v4530_v49 = vmul.f32 %v4498_v8, %v4274_v21  ;;  %v4280_v30 = vmul.f32 0.5, %v9277_v48 }
 0x599   : > { %v4373_v3 = vmul.f32 %v4341_v13, %v9273_v55  ;;  %v4342_v19 = vmul.f32 %v4310_v1, %v9281_v33  ;;  %v4554_v17 = vpack.c.bf16 %v4532_v61, %v4531_v20  ;;  %v4278_v62 = vmul.f32 0.5, %v9281_v33 }
 0x59a   : > { %v4376_v31 = vmul.f32 %v4344_v53, %v9277_v48  ;;  %v4553_v4 = vpack.c.bf16 %v4530_v49, %v4529_v36  ;;  %v4407_v59 = vadd.f32 %v4375_v12, %v9270_v32 }
 0x59b   : > { %v4374_v47 = vmul.f32 %v4342_v19, %v9281_v33  ;;  %v4405_v35 = vadd.f32 %v4373_v3, %v9273_v55 }
 0x59c   : > { %6116 = vmatprep.mubr.bf16.mxu1 %v4553_v4  ;;  %v4408_v63 = vadd.f32 %v4376_v31, %v9277_v48  ;;  %v4439_v50 = vmul.f32 0.7978846, %v4407_v59 }
 0x59d   : > { %6117 = vmatmul.mubr.bf16.gmra.mrb[176].mxu1 %v4554_v17  ;;  %v4406_v5 = vadd.f32 %v4374_v47, %v9281_v33  ;;  %v4437_v40 = vmul.f32 0.7978846, %v4405_v35 }
 0x59e   : > { %v4440_v46 = vmul.f32 0.7978846, %v4408_v63  ;;  %6855 = vtanh.f32 %v4439_v50 }
 0x59f   : > { %v4438_v43 = vmul.f32 0.7978846, %v4406_v5  ;;  %6857 = vtanh.f32 %v4437_v40 }
 0x5a0   : > { %6859 = vtanh.f32 %v4440_v46 }
 0x5a1   : > { %v6078_v23 = vpop.f32.mrb[152].mxu1  ;;  %6861 = vtanh.f32 %v4438_v43 }
 0x5a2   : > { %v9299_v57 = vadd.f32 %v6078_v23, %v9213_v51  ;;  %v4226_v16 = vpop.f32.mrb[153].mxu1 }
 0x5a3   : > { %v9302_v45 = vadd.f32 %v4226_v16, %v9213_v51  ;;  %v6079_v54 = vpop.f32.mrb[154].mxu1 }
 0x5a4   : > { %v4315_v7 = vmul.f32 0.044715, %v9299_v57  ;;  %v9306_v11 = vadd.f32 %v6079_v54, %v9213_v51  ;;  %v4229_v0 = vpop.f32.mrb[155].mxu1 }
 0x5a5   : > { %v4313_v38 = vmul.f32 0.044715, %v9302_v45  ;;  %v9310_v18 = vadd.f32 %v4229_v0, %v9213_v51 }
 0x5a6   : > { %v4347_v6 = vmul.f32 %v4315_v7, %v9299_v57  ;;  %v4316_v37 = vmul.f32 0.044715, %v9306_v11 }
 0x5a7   : > { %v4345_v28 = vmul.f32 %v4313_v38, %v9302_v45  ;;  %v4314_v42 = vmul.f32 0.044715, %v9310_v18  ;;  %v4283_v38 = vmul.f32 0.5, %v9299_v57 }
 0x5a8   : > { %v6856_v44 = vpop.eup %6855  ;;  %v4379_v9 = vmul.f32 %v4347_v6, %v9299_v57  ;;  %v4348_v52 = vmul.f32 %v4316_v37, %v9306_v11 }
 0x5a9   : > { %v6858_v26 = vpop.eup %6857  ;;  %v4377_v14 = vmul.f32 %v4345_v28, %v9302_v45  ;;  %v4346_v22 = vmul.f32 %v4314_v42, %v9310_v18  ;;  %v4503_v60 = vadd.f32 1.0, %v6856_v44  ;;  %v4281_v44 = vmul.f32 0.5, %v9302_v45 }
 0x5aa   : > { %v6860_v41 = vpop.eup %6859  ;;  %v4380_v39 = vmul.f32 %v4348_v52, %v9306_v11  ;;  %v4501_v34 = vadd.f32 1.0, %v6858_v26  ;;  %v4411_v24 = vadd.f32 %v4379_v9, %v9299_v57  ;;  %v4284_v26 = vmul.f32 0.5, %v9306_v11 }
 0x5ab   : > { %v6862_v2 = vpop.eup %6861  ;;  %v4378_v56 = vmul.f32 %v4346_v22, %v9310_v18  ;;  %v4504_v27 = vadd.f32 1.0, %v6860_v41  ;;  %v4409_v25 = vadd.f32 %v4377_v14, %v9302_v45  ;;  %v4535_v8 = vmul.f32 %v4503_v60, %v4279_v29 }
 0x5ac   : > { %v4502_v32 = vadd.f32 1.0, %v6862_v2  ;;  %v4412_v15 = vadd.f32 %v4380_v39, %v9306_v11  ;;  %v4443_v21 = vmul.f32 0.7978846, %v4411_v24  ;;  %v4533_v20 = vmul.f32 %v4501_v34, %v4277_v58 }
 0x5ad   : > { %v4536_v13 = vmul.f32 %v4504_v27, %v4280_v30  ;;  %v4410_v55 = vadd.f32 %v4378_v56, %v9310_v18  ;;  %v4441_v1 = vmul.f32 0.7978846, %v4409_v25  ;;  %v4282_v60 = vmul.f32 0.5, %v9310_v18 }
 0x5ae   : > { %v4534_v61 = vmul.f32 %v4502_v32, %v4278_v62  ;;  %v4444_v12 = vmul.f32 0.7978846, %v4412_v15  ;;  %6863 = vtanh.f32 %v4443_v21 }
 0x5af   : > { %v4556_v53 = vpack.c.bf16 %v4536_v13, %v4535_v8  ;;  %v4442_v48 = vmul.f32 0.7978846, %v4410_v55  ;;  %6865 = vtanh.f32 %v4441_v1 }
 0x5b0   : > { %v6082_v36 = vpop.f32.mrb[156].mxu1  ;;  %v4555_v49 = vpack.c.bf16 %v4534_v61, %v4533_v20  ;;  %6867 = vtanh.f32 %v4444_v12 }
 0x5b1   : > { %v4251_v33 = vadd.f32 %v6082_v36, %v9213_v51  ;;  %v4242_v3 = vpop.f32.mrb[157].mxu1  ;;  %6869 = vtanh.f32 %v4442_v48 }
 0x5b2   : > { %v4243_v19 = vadd.f32 %v4242_v3, %v9213_v51  ;;  %6120 = vmatprep.mubr.bf16.mxu1 %v4555_v49  ;;  %v6083_v17 = vpop.f32.mrb[158].mxu1  ;;  %v9341_v3 = vld [vmem:[%s9583_s5 + $0x4] ss:$0 sm:$0xff] }
 0x5b3   : > { %v4319_v31 = vmul.f32 0.044715, %v4251_v33  ;;  %v4254_v4 = vadd.f32 %v6083_v17, %v9213_v51  ;;  %6121 = vmatmul.mubr.bf16.gmra.mrb[180].mxu1 %v4556_v53  ;;  %v4245_v59 = vpop.f32.mrb[159].mxu1  ;;  %v4287_v21 = vmul.f32 0.5, %v4251_v33 }
 0x5b4   : > { %v4317_v47 = vmul.f32 0.044715, %v4243_v19  ;;  %v4246_v35 = vadd.f32 %v4245_v59, %v9213_v51  ;;  %v4285_v55 = vmul.f32 0.5, %v4243_v19 }
 0x5b5   : > { %v4351_v63 = vmul.f32 %v4319_v31, %v4251_v33  ;;  %v4320_v50 = vmul.f32 0.044715, %v4254_v4  ;;  %v4288_v8 = vmul.f32 0.5, %v4254_v4 }
 0x5b6   : > { %v4349_v5 = vmul.f32 %v4317_v47, %v4243_v19  ;;  %v4318_v40 = vmul.f32 0.044715, %v4246_v35  ;;  %v4286_v1 = vmul.f32 0.5, %v4246_v35 }
 0x5b7   : > { %v4383_v46 = vmul.f32 %v4351_v63, %v4251_v33  ;;  %v4352_v43 = vmul.f32 %v4320_v50, %v4254_v4 }
 0x5b8   : > { %v6864_v23 = vpop.eup %6863  ;;  %v4381_v16 = vmul.f32 %v4349_v5, %v4243_v19  ;;  %v4350_v54 = vmul.f32 %v4318_v40, %v4246_v35 }
 0x5b9   : > { %v6866_v7 = vpop.eup %6865  ;;  %v4384_v0 = vmul.f32 %v4352_v43, %v4254_v4  ;;  %v4507_v6 = vadd.f32 1.0, %v6864_v23  ;;  %v4415_v37 = vadd.f32 %v4383_v46, %v4251_v33 }
 0x5ba   : > { %v6868_v28 = vpop.eup %6867  ;;  %v4382_v42 = vmul.f32 %v4350_v54, %v4246_v35  ;;  %v4505_v51 = vadd.f32 1.0, %v6866_v7  ;;  %v4413_v9 = vadd.f32 %v4381_v16, %v4243_v19 }
 0x5bb   : > { %v6870_v52 = vpop.eup %6869  ;;  %v4508_v14 = vadd.f32 1.0, %v6868_v28  ;;  %v4416_v22 = vadd.f32 %v4384_v0, %v4254_v4  ;;  %v4447_v29 = vmul.f32 0.7978846, %v4415_v37  ;;  %v4539_v57 = vmul.f32 %v4507_v6, %v4283_v38 }
 0x5bc   : > { %v4506_v41 = vadd.f32 1.0, %v6870_v52  ;;  %v4414_v39 = vadd.f32 %v4382_v42, %v4246_v35  ;;  %v4445_v58 = vmul.f32 0.7978846, %v4413_v9  ;;  %v4537_v2 = vmul.f32 %v4505_v51, %v4281_v44 }
 0x5bd   : > { %v4540_v34 = vmul.f32 %v4508_v14, %v4284_v26  ;;  %v4448_v24 = vmul.f32 0.7978846, %v4416_v22  ;;  %6871 = vtanh.f32 %v4447_v29 }
 0x5be   : > { %v4538_v56 = vmul.f32 %v4506_v41, %v4282_v60  ;;  %v4446_v45 = vmul.f32 0.7978846, %v4414_v39  ;;  %6873 = vtanh.f32 %v4445_v58 }
 0x5bf   : > { %v4558_v30 = vpack.c.bf16 %v4540_v34, %v4539_v57  ;;  %6875 = vtanh.f32 %v4448_v24 }
 0x5c0   : > { %v4557_v27 = vpack.c.bf16 %v4538_v56, %v4537_v2  ;;  %6877 = vtanh.f32 %v4446_v45 }
 0x5c2   : > { %6124 = vmatprep.mubr.bf16.mxu1 %v4557_v27 }
 0x5c3   : > { %6125 = vmatmul.mubr.bf16.gmra.mrb[184].mxu1 %v4558_v30 }
 0x5c7   : > { %v6872_v11 = vpop.eup %6871 }
 0x5c8   : > { %v6874_v25 = vpop.eup %6873  ;;  %v4511_v18 = vadd.f32 1.0, %v6872_v11 }
 0x5c9   : > { %v6876_v62 = vpop.eup %6875  ;;  %v4509_v32 = vadd.f32 1.0, %v6874_v25 }
 0x5ca   : > { %v6878_v15 = vpop.eup %6877  ;;  %v4512_v13 = vadd.f32 1.0, %v6876_v62  ;;  %v4543_v61 = vmul.f32 %v4511_v18, %v4287_v21 }
 0x5cb   : > { %v4510_v20 = vadd.f32 1.0, %v6878_v15  ;;  %v4541_v53 = vmul.f32 %v4509_v32, %v4285_v55 }
 0x5cc   : > { %v4544_v12 = vmul.f32 %v4512_v13, %v4288_v8 }
 0x5cd   : > { %v4542_v48 = vmul.f32 %v4510_v20, %v4286_v1 }
 0x5ce   : > { %v4560_v36 = vpack.c.bf16 %v4544_v12, %v4543_v61 }
 0x5cf   : > { %v4559_v49 = vpack.c.bf16 %v4542_v48, %v4541_v53 }
 0x5d1   : > { %6128 = vmatprep.mubr.bf16.mxu1 %v4559_v49 }
 0x5d2   : > { %6129 = vmatmul.mubr.bf16.gmra.mrb[188].mxu1 %v4560_v36 }
 0x611   : > { %v6102_v17 = vpop.f32.mrb[160].mxu1 }
 0x612   : > { %v4652_v33 = vadd.f32 %v6102_v17, %v9341_v3  ;;  %v4643_v31 = vpop.f32.mrb[161].mxu1 }
 0x613   : > { %v4644_v19 = vadd.f32 %v4643_v31, %v9341_v3  ;;  %v6103_v4 = vpop.f32.mrb[162].mxu1 }
 0x614   : > { %v4804_v59 = vmul.f32 0.044715, %v4652_v33  ;;  %v4655_v47 = vadd.f32 %v6103_v4, %v9341_v3  ;;  %v4646_v35 = vpop.f32.mrb[163].mxu1  ;;  %v4772_v39 = vmul.f32 0.5, %v4652_v33 }
 0x615   : > { %v4802_v63 = vmul.f32 0.044715, %v4644_v19  ;;  %v4647_v50 = vadd.f32 %v4646_v35, %v9341_v3  ;;  %v4770_v34 = vmul.f32 0.5, %v4644_v19 }
 0x616   : > { %v4836_v5 = vmul.f32 %v4804_v59, %v4652_v33  ;;  %v4805_v40 = vmul.f32 0.044715, %v4655_v47  ;;  %v4773_v58 = vmul.f32 0.5, %v4655_v47 }
 0x617   : > { %v4834_v46 = vmul.f32 %v4802_v63, %v4644_v19  ;;  %v4803_v43 = vmul.f32 0.044715, %v4647_v50  ;;  %v4771_v24 = vmul.f32 0.5, %v4647_v50 }
 0x618   : > { %v4868_v23 = vmul.f32 %v4836_v5, %v4652_v33  ;;  %v4837_v16 = vmul.f32 %v4805_v40, %v4655_v47 }
 0x619   : > { %v4866_v54 = vmul.f32 %v4834_v46, %v4644_v19  ;;  %v4835_v7 = vmul.f32 %v4803_v43, %v4647_v50 }
 0x61a   : > { %v4900_v0 = vadd.f32 %v4868_v23, %v4652_v33  ;;  %v4869_v38 = vmul.f32 %v4837_v16, %v4655_v47 }
 0x61b   : > { %v4898_v6 = vadd.f32 %v4866_v54, %v4644_v19  ;;  %v4867_v37 = vmul.f32 %v4835_v7, %v4647_v50 }
 0x61c   : > { %v4932_v28 = vmul.f32 0.7978846, %v4900_v0  ;;  %v4901_v42 = vadd.f32 %v4869_v38, %v4655_v47 }
 0x61d   : > { %v4930_v44 = vmul.f32 0.7978846, %v4898_v6  ;;  %v4899_v51 = vadd.f32 %v4867_v37, %v4647_v50 }
 0x61e   : > { %6879 = vtanh.f32 %v4932_v28  ;;  %v4933_v9 = vmul.f32 0.7978846, %v4901_v42 }
 0x61f   : > { %6881 = vtanh.f32 %v4930_v44  ;;  %v4931_v52 = vmul.f32 0.7978846, %v4899_v51 }
 0x620   : > { %6883 = vtanh.f32 %v4933_v9 }
 0x621   : > { %6885 = vtanh.f32 %v4931_v52 }
 0x628   : > { %v6880_v26 = vpop.eup %6879 }
 0x629   : > { %v6882_v14 = vpop.eup %6881  ;;  %v4996_v22 = vadd.f32 1.0, %v6880_v26 }
 0x62a   : > { %v6884_v29 = vpop.eup %6883  ;;  %v4994_v60 = vadd.f32 1.0, %v6882_v14 }
 0x62b   : > { %v6886_v41 = vpop.eup %6885  ;;  %v4997_v57 = vadd.f32 1.0, %v6884_v29  ;;  %v9347_v56 = vmul.f32 %v4996_v22, %v4772_v39 }
 0x62c   : > { %v4995_v2 = vadd.f32 1.0, %v6886_v41  ;;  %v6106_v30 = vpop.f32.mrb[164].mxu1  ;;  %v9351_v27 = vmul.f32 %v4994_v60, %v4770_v34 }
 0x62d   : > { %v9349_v45 = vmul.f32 %v4997_v57, %v4773_v58  ;;  %v4668_v25 = vadd.f32 %v6106_v30, %v9341_v3  ;;  %v4659_v18 = vpop.f32.mrb[165].mxu1 }
 0x62e   : > { %v9353_v11 = vmul.f32 %v4995_v2, %v4771_v24  ;;  %v4660_v32 = vadd.f32 %v4659_v18, %v9341_v3  ;;  %v6107_v15 = vpop.f32.mrb[166].mxu1 }
 0x62f   : > { %v5060_v62 = vpack.c.bf16 %v9349_v45, %v9347_v56  ;;  %v4808_v8 = vmul.f32 0.044715, %v4668_v25  ;;  %v4671_v13 = vadd.f32 %v6107_v15, %v9341_v3  ;;  %v4662_v55 = vpop.f32.mrb[167].mxu1  ;;  %v4776_v0 = vmul.f32 0.5, %v4668_v25 }
 0x630   : > { %v5059_v21 = vpack.c.bf16 %v9353_v11, %v9351_v27  ;;  %v4806_v1 = vmul.f32 0.044715, %v4660_v32  ;;  %v4663_v20 = vadd.f32 %v4662_v55, %v9341_v3  ;;  %v4774_v28 = vmul.f32 0.5, %v4660_v32 }
 0x631   : > { %v4840_v61 = vmul.f32 %v4808_v8, %v4668_v25  ;;  %v4809_v12 = vmul.f32 0.044715, %v4671_v13  ;;  %v4777_v38 = vmul.f32 0.5, %v4671_v13 }
 0x632   : > { %v4838_v53 = vmul.f32 %v4806_v1, %v4660_v32  ;;  %v4807_v48 = vmul.f32 0.044715, %v4663_v20  ;;  %v4775_v42 = vmul.f32 0.5, %v4663_v20 }
 0x633   : > { %v4872_v36 = vmul.f32 %v4840_v61, %v4668_v25  ;;  %v4841_v49 = vmul.f32 %v4809_v12, %v4671_v13  ;;  %v558_v61 = vld [vmem:[%s9583_s5 + $0x5] ss:$0 sm:$0xff] }
 0x634   : > { %v4870_v17 = vmul.f32 %v4838_v53, %v4660_v32  ;;  %v4839_v33 = vmul.f32 %v4807_v48, %v4663_v20  ;;  %v9382_v48 = vpack.c.bf16 %v558_v61, %v558_v61 }
 0x635   : > { %v4904_v31 = vadd.f32 %v4872_v36, %v4668_v25  ;;  %v4873_v19 = vmul.f32 %v4841_v49, %v4671_v13 }
 0x636   : > { %v4902_v4 = vadd.f32 %v4870_v17, %v4660_v32  ;;  %v4871_v59 = vmul.f32 %v4839_v33, %v4663_v20  ;;  %6034 = vmatprep.mubr.bf16.mxu0 %v9382_v48 }
 0x637   : > { %v4936_v47 = vmul.f32 0.7978846, %v4904_v31  ;;  %v4905_v35 = vadd.f32 %v4873_v19, %v4671_v13 }
 0x638   : > { %v4934_v63 = vmul.f32 0.7978846, %v4902_v4  ;;  %v4903_v50 = vadd.f32 %v4871_v59, %v4663_v20  ;;  %v559_v4 = vld [vmem:[%s9583_s5 + $0x6] ss:$0 sm:$0xff]  ;;  %v7180_v59 = vmov 0  }
 0x639   : > { %6887 = vtanh.f32 %v4936_v47  ;;  %v4937_v5 = vmul.f32 0.7978846, %v4905_v35  ;;  %6222 = vset.pattern.permute.xlu0 %v7180_v59 }
 0x63a   : > { %6889 = vtanh.f32 %v4934_v63  ;;  %v4935_v40 = vmul.f32 0.7978846, %v4903_v50  ;;  %5118 = vperm.xlu0 %6222, %v559_v4  }
 0x63b   : > { %6891 = vtanh.f32 %v4937_v5 }
 0x63c   : > { %6893 = vtanh.f32 %v4935_v40 }
 0x643   : > { %v6888_v46 = vpop.eup %6887 }
 0x644   : > { %v6890_v43 = vpop.eup %6889  ;;  %v5000_v23 = vadd.f32 1.0, %v6888_v46 }
 0x645   : > { %v6892_v16 = vpop.eup %6891  ;;  %v4998_v54 = vadd.f32 1.0, %v6890_v43 }
 0x646   : > { %v6894_v7 = vpop.eup %6893  ;;  %v5001_v6 = vadd.f32 1.0, %v6892_v16  ;;  %v6110_v37 = vpop.f32.mrb[168].mxu1  ;;  %v9364_v52 = vmul.f32 %v5000_v23, %v4776_v0 }
 0x647   : > { %v4999_v44 = vadd.f32 1.0, %v6894_v7  ;;  %v4684_v51 = vadd.f32 %v6110_v37, %v9341_v3  ;;  %v4675_v9 = vpop.f32.mrb[169].mxu1  ;;  %v9369_v29 = vmul.f32 %v4998_v54, %v4774_v28 }
 0x648   : > { %v9366_v26 = vmul.f32 %v5001_v6, %v4777_v38  ;;  %v4676_v14 = vadd.f32 %v4675_v9, %v9341_v3  ;;  %v6111_v22 = vpop.f32.mrb[170].mxu1 }
 0x649   : > { %v9371_v60 = vmul.f32 %v4999_v44, %v4775_v42  ;;  %v4812_v41 = vmul.f32 0.044715, %v4684_v51  ;;  %v4687_v39 = vadd.f32 %v6111_v22, %v9341_v3  ;;  %v4678_v58 = vpop.f32.mrb[171].mxu1  ;;  %v4780_v54 = vmul.f32 0.5, %v4684_v51 }
 0x64a   : > { %v5062_v57 = vpack.c.bf16 %v9366_v26, %v9364_v52  ;;  %v4810_v34 = vmul.f32 0.044715, %v4676_v14  ;;  %v4679_v24 = vadd.f32 %v4678_v58, %v9341_v3  ;;  %v4778_v37 = vmul.f32 0.5, %v4676_v14 }
 0x64b   : > { %v5061_v2 = vpack.c.bf16 %v9371_v60, %v9369_v29  ;;  %v4844_v30 = vmul.f32 %v4812_v41, %v4684_v51  ;;  %v4813_v25 = vmul.f32 0.044715, %v4687_v39  ;;  %v4781_v22 = vmul.f32 0.5, %v4687_v39 }
 0x64c   : > { %v4842_v18 = vmul.f32 %v4810_v34, %v4676_v14  ;;  %v4811_v32 = vmul.f32 0.044715, %v4679_v24 }
 0x64d   : > { %v4876_v15 = vmul.f32 %v4844_v30, %v4684_v51  ;;  %v4845_v8 = vmul.f32 %v4813_v25, %v4687_v39  ;;  %v4779_v30 = vmul.f32 0.5, %v4679_v24 }
 0x64e   : > { %v4874_v13 = vmul.f32 %v4842_v18, %v4676_v14  ;;  %v4843_v55 = vmul.f32 %v4811_v32, %v4679_v24 }
 0x64f   : > { %v4908_v1 = vadd.f32 %v4876_v15, %v4684_v51  ;;  %v4877_v20 = vmul.f32 %v4845_v8, %v4687_v39 }
 0x650   : > { %v4906_v12 = vadd.f32 %v4874_v13, %v4676_v14  ;;  %v4875_v53 = vmul.f32 %v4843_v55, %v4679_v24 }
 0x651   : > { %v4940_v36 = vmul.f32 0.7978846, %v4908_v1  ;;  %v4909_v49 = vadd.f32 %v4877_v20, %v4687_v39 }
 0x652   : > { %v4938_v17 = vmul.f32 0.7978846, %v4906_v12  ;;  %v4907_v33 = vadd.f32 %v4875_v53, %v4679_v24 }
 0x653   : > { %6895 = vtanh.f32 %v4940_v36  ;;  %v4941_v31 = vmul.f32 0.7978846, %v4909_v49 }
 0x654   : > { %6897 = vtanh.f32 %v4938_v17  ;;  %v4939_v19 = vmul.f32 0.7978846, %v4907_v33 }
 0x655   : > { %6899 = vtanh.f32 %v4941_v31 }
 0x656   : > { %6901 = vtanh.f32 %v4939_v19 }
 0x65c   : > { %v6114_v47 = vpop.f32.mrb[172].mxu1 }
 0x65d   : > { %v4700_v35 = vadd.f32 %v6114_v47, %v9341_v3  ;;  %v4691_v63 = vpop.f32.mrb[173].mxu1  ;;  %v6896_v50 = vpop.eup %6895 }
 0x65e   : > { %v4692_v5 = vadd.f32 %v4691_v63, %v9341_v3  ;;  %v6115_v40 = vpop.f32.mrb[174].mxu1  ;;  %v6898_v46 = vpop.eup %6897  ;;  %v5004_v7 = vadd.f32 1.0, %v6896_v50 }
 0x65f   : > { %v4816_v43 = vmul.f32 0.044715, %v4700_v35  ;;  %v9391_v23 = vadd.f32 %v6115_v40, %v9341_v3  ;;  %v4694_v16 = vpop.f32.mrb[175].mxu1  ;;  %v6900_v0 = vpop.eup %6899  ;;  %v5002_v28 = vadd.f32 1.0, %v6898_v46 }
 0x660   : > { %v4814_v38 = vmul.f32 0.044715, %v4692_v5  ;;  %v4695_v6 = vadd.f32 %v4694_v16, %v9341_v3  ;;  %v6902_v42 = vpop.eup %6901  ;;  %v5005_v41 = vadd.f32 1.0, %v6900_v0  ;;  %v9396_v32 = vmul.f32 %v5004_v7, %v4780_v54 }
 0x661   : > { %v4848_v44 = vmul.f32 %v4816_v43, %v4700_v35  ;;  %v4817_v9 = vmul.f32 0.044715, %v9391_v23  ;;  %v5003_v25 = vadd.f32 1.0, %v6902_v42  ;;  %v9400_v13 = vmul.f32 %v5002_v28, %v4778_v37 }
 0x662   : > { %v4846_v58 = vmul.f32 %v4814_v38, %v4692_v5  ;;  %v4815_v34 = vmul.f32 0.044715, %v4695_v6  ;;  %v9398_v15 = vmul.f32 %v5005_v41, %v4781_v22  ;;  %v4784_v0 = vmul.f32 0.5, %v4700_v35 }
 0x663   : > { %v4880_v18 = vmul.f32 %v4848_v44, %v4700_v35  ;;  %v4849_v51 = vmul.f32 %v4817_v9, %v9391_v23  ;;  %v9402_v55 = vmul.f32 %v5003_v25, %v4779_v30  ;;  %v4782_v44 = vmul.f32 0.5, %v4692_v5 }
 0x664   : > { %v4878_v8 = vmul.f32 %v4846_v58, %v4692_v5  ;;  %v4847_v14 = vmul.f32 %v4815_v34, %v4695_v6  ;;  %v5064_v24 = vpack.c.bf16 %v9398_v15, %v9396_v32  ;;  %v4785_v34 = vmul.f32 0.5, %v9391_v23 }
 0x665   : > { %v4912_v1 = vadd.f32 %v4880_v18, %v4700_v35  ;;  %v4881_v39 = vmul.f32 %v4849_v51, %v9391_v23  ;;  %v5063_v12 = vpack.c.bf16 %v9402_v55, %v9400_v13  ;;  %v4783_v51 = vmul.f32 0.5, %v4695_v6 }
 0x666   : > { %v4910_v20 = vadd.f32 %v4878_v8, %v4692_v5  ;;  %v4879_v61 = vmul.f32 %v4847_v14, %v4695_v6  ;;  %v7181_v32 = vmov 1966171168  }
 0x667   : > { %v4944_v53 = vmul.f32 0.7978846, %v4912_v1  ;;  %v4913_v36 = vadd.f32 %v4881_v39, %v9391_v23  ;;  %v5127_v15 = vunpack.c.l.s4 %v7181_v32 }
 0x668   : > { %v4942_v49 = vmul.f32 0.7978846, %v4910_v20  ;;  %v4911_v17 = vadd.f32 %v4879_v61, %v4695_v6 }
 0x669   : > { %6903 = vtanh.f32 %v4944_v53  ;;  %v4945_v33 = vmul.f32 0.7978846, %v4913_v36 }
 0x66a   : > { %6905 = vtanh.f32 %v4942_v49  ;;  %v4943_v31 = vmul.f32 0.7978846, %v4911_v17 }
 0x66b   : > { %6907 = vtanh.f32 %v4945_v33 }
 0x66c   : > { %6909 = vtanh.f32 %v4943_v31 }
 0x670   : > { %v6118_v19 = vpop.f32.mrb[176].mxu1 }
 0x671   : > { %v4716_v4 = vadd.f32 %v6118_v19, %v9341_v3  ;;  %v4707_v59 = vpop.f32.mrb[177].mxu1 }
 0x672   : > { %v4708_v47 = vadd.f32 %v4707_v59, %v9341_v3  ;;  %v6119_v63 = vpop.f32.mrb[178].mxu1 }
 0x673   : > { %v6904_v50 = vpop.eup %6903  ;;  %v4820_v40 = vmul.f32 0.044715, %v4716_v4  ;;  %v4719_v46 = vadd.f32 %v6119_v63, %v9341_v3  ;;  %v4710_v43 = vpop.f32.mrb[179].mxu1 }
 0x674   : > { %v6906_v16 = vpop.eup %6905  ;;  %v4818_v54 = vmul.f32 0.044715, %v4708_v47  ;;  %v4711_v7 = vadd.f32 %v4710_v43, %v9341_v3  ;;  %v5008_v38 = vadd.f32 1.0, %v6904_v50 }
 0x675   : > { %v6908_v37 = vpop.eup %6907  ;;  %v4852_v28 = vmul.f32 %v4820_v40, %v4716_v4  ;;  %v4821_v42 = vmul.f32 0.044715, %v4719_v46  ;;  %v5006_v9 = vadd.f32 1.0, %v6906_v16 }
 0x676   : > { %v6910_v22 = vpop.eup %6909  ;;  %v4850_v41 = vmul.f32 %v4818_v54, %v4708_v47  ;;  %v4819_v58 = vmul.f32 0.044715, %v4711_v7  ;;  %v5009_v30 = vadd.f32 1.0, %v6908_v37  ;;  %v9415_v39 = vmul.f32 %v5008_v38, %v4784_v0 }
 0x677   : > { %v4884_v25 = vmul.f32 %v4852_v28, %v4716_v4  ;;  %v4853_v18 = vmul.f32 %v4821_v42, %v4719_v46  ;;  %v5007_v8 = vadd.f32 1.0, %v6910_v22  ;;  %v9419_v5 = vmul.f32 %v5006_v9, %v4782_v44 }
 0x678   : > { %v4882_v14 = vmul.f32 %v4850_v41, %v4708_v47  ;;  %v4851_v1 = vmul.f32 %v4819_v58, %v4711_v7  ;;  %v9417_v35 = vmul.f32 %v5009_v30, %v4785_v34  ;;  %v4788_v37 = vmul.f32 0.5, %v4716_v4 }
 0x679   : > { %v4885_v20 = vmul.f32 %v4853_v18, %v4719_v46  ;;  %v4916_v61 = vadd.f32 %v4884_v25, %v4716_v4  ;;  %v9421_v53 = vmul.f32 %v5007_v8, %v4783_v51  ;;  %v4786_v41 = vmul.f32 0.5, %v4708_v47 }
 0x67a   : > { %v4883_v36 = vmul.f32 %v4851_v1, %v4711_v7  ;;  %v4914_v49 = vadd.f32 %v4882_v14, %v4708_v47  ;;  %v5066_v23 = vpack.c.bf16 %v9417_v35, %v9415_v39  ;;  %v4789_v18 = vmul.f32 0.5, %v4719_v46 }
 0x67b   : > { %v4917_v17 = vadd.f32 %v4885_v20, %v4719_v46  ;;  %v4948_v6 = vmul.f32 0.7978846, %v4916_v61  ;;  %v5065_v33 = vpack.c.bf16 %v9421_v53, %v9419_v5  ;;  %v4787_v14 = vmul.f32 0.5, %v4711_v7 }
 0x67c   : > { %v4915_v31 = vadd.f32 %v4883_v36, %v4711_v7  ;;  %v4946_v19 = vmul.f32 0.7978846, %v4914_v49  ;;  %v9694_v35 = vlaneseq }
 0x67d   : > { %v4949_v59 = vmul.f32 0.7978846, %v4917_v17  ;;  %6911 = vtanh.f32 %v4948_v6 }
 0x67e   : > { %v4947_v63 = vmul.f32 0.7978846, %v4915_v31  ;;  %6913 = vtanh.f32 %v4946_v19  ;;  %vm5143_vm0 = vcmp.lt.s32.totalorder %v9694_v35, 256 }
 0x67f   : > { %6915 = vtanh.f32 %v4949_v59 }
 0x680   : > { %6917 = vtanh.f32 %v4947_v63 }
 0x686   : > { %v6122_v50 = vpop.f32.mrb[180].mxu1 }
 0x687   : > { %v6912_v40 = vpop.eup %6911  ;;  %v9428_v43 = vadd.f32 %v6122_v50, %v9341_v3  ;;  %v4723_v16 = vpop.f32.mrb[181].mxu1 }
 0x688   : > { %v6914_v54 = vpop.eup %6913  ;;  %v9431_v0 = vadd.f32 %v4723_v16, %v9341_v3  ;;  %v6123_v38 = vpop.f32.mrb[182].mxu1  ;;  %v5012_v28 = vadd.f32 1.0, %v6912_v40 }
 0x689   : > { %v6916_v42 = vpop.eup %6915  ;;  %v4824_v44 = vmul.f32 0.044715, %v9428_v43  ;;  %v9435_v9 = vadd.f32 %v6123_v38, %v9341_v3  ;;  %v4726_v22 = vpop.f32.mrb[183].mxu1  ;;  %v5010_v58 = vadd.f32 1.0, %v6914_v54  ;;  %v4792_v56 = vmul.f32 0.5, %v9428_v43 }
 0x68a   : > { %v6918_v34 = vpop.eup %6917  ;;  %v4822_v30 = vmul.f32 0.044715, %v9431_v0  ;;  %v9439_v25 = vadd.f32 %v4726_v22, %v9341_v3  ;;  %v5013_v51 = vadd.f32 1.0, %v6916_v42  ;;  %v5044_v47 = vmul.f32 %v5012_v28, %v4788_v37 }
 0x68b   : > { %v4856_v4 = vmul.f32 %v4824_v44, %v9428_v43  ;;  %v4825_v8 = vmul.f32 0.044715, %v9435_v9  ;;  %v5011_v1 = vadd.f32 1.0, %v6918_v34  ;;  %v5042_v6 = vmul.f32 %v5010_v58, %v4786_v41 }
 0x68c   : > { %v4854_v20 = vmul.f32 %v4822_v30, %v9431_v0  ;;  %v4823_v61 = vmul.f32 0.044715, %v9439_v25  ;;  %v5045_v36 = vmul.f32 %v5013_v51, %v4789_v18 }
 0x68d   : > { %v4888_v49 = vmul.f32 %v4856_v4, %v9428_v43  ;;  %v4857_v17 = vmul.f32 %v4825_v8, %v9435_v9  ;;  %v5043_v31 = vmul.f32 %v5011_v1, %v4787_v14 }
 0x68e   : > { %v4886_v46 = vmul.f32 %v4854_v20, %v9431_v0  ;;  %v4855_v19 = vmul.f32 %v4823_v61, %v9439_v25  ;;  %v5068_v59 = vpack.c.bf16 %v5045_v36, %v5044_v47 }
 0x68f   : > { %v4889_v7 = vmul.f32 %v4857_v17, %v9435_v9  ;;  %v5067_v63 = vpack.c.bf16 %v5043_v31, %v5042_v6  ;;  %v4920_v50 = vadd.f32 %v4888_v49, %v9428_v43  ;;  %v4790_v31 = vmul.f32 0.5, %v9431_v0 }
 0x690   : > { %v4887_v40 = vmul.f32 %v4855_v19, %v9439_v25  ;;  %v4918_v16 = vadd.f32 %v4886_v46, %v9431_v0 }
 0x691   : > { %6018 = vmatprep.subr.bf16.mxu0 %v5067_v63  ;;  %v4921_v54 = vadd.f32 %v4889_v7, %v9435_v9  ;;  %v4952_v38 = vmul.f32 0.7978846, %v4920_v50  ;;  %v4793_v63 = vmul.f32 0.5, %v9435_v9 }
 0x692   : > { %6019 = vmatpush3.bf16.xpose.msra.mxu0 %v5059_v21  ;;  %v4919_v37 = vadd.f32 %v4887_v40, %v9439_v25  ;;  %v4950_v28 = vmul.f32 0.7978846, %v4918_v16  ;;  %v4791_v16 = vmul.f32 0.5, %v9439_v25 }
 0x693   : > { %6020 = vmatprep.subr.bf16.mxu0 %v5068_v59  ;;  %v4953_v42 = vmul.f32 0.7978846, %v4921_v54  ;;  %6919 = vtanh.f32 %v4952_v38 }
 0x694   : > { %v4951_v44 = vmul.f32 0.7978846, %v4919_v37  ;;  %6921 = vtanh.f32 %v4950_v28 }
 0x695   : > { %6923 = vtanh.f32 %v4953_v42 }
 0x696   : > { %v6126_v22 = vpop.f32.mrb[184].mxu1  ;;  %6925 = vtanh.f32 %v4951_v44 }
 0x697   : > { %v9459_v41 = vadd.f32 %v6126_v22, %v9341_v3  ;;  %v4739_v58 = vpop.f32.mrb[185].mxu1 }
 0x698   : > { %v9462_v34 = vadd.f32 %v4739_v58, %v9341_v3  ;;  %v6127_v27 = vpop.f32.mrb[186].mxu1 }
 0x699   : > { %v4828_v11 = vmul.f32 0.044715, %v9459_v41  ;;  %v9466_v21 = vadd.f32 %v6127_v27, %v9341_v3  ;;  %v4742_v30 = vpop.f32.mrb[187].mxu1  ;;  %v4796_v60 = vmul.f32 0.5, %v9459_v41 }
 0x69a   : > { %v4826_v18 = vmul.f32 0.044715, %v9462_v34  ;;  %v9470_v51 = vadd.f32 %v4742_v30, %v9341_v3  ;;  %6021 = vmatpush3.bf16.xpose.msra.mxu0 %v5060_v62 }
 0x69b   : > { %v4860_v4 = vmul.f32 %v4828_v11, %v9459_v41  ;;  %v4829_v8 = vmul.f32 0.044715, %v9466_v21 }
 0x69c   : > { %v4858_v14 = vmul.f32 %v4826_v18, %v9462_v34  ;;  %v4827_v1 = vmul.f32 0.044715, %v9470_v51 }
 0x69d   : > { %v6920_v20 = vpop.eup %6919  ;;  %v4892_v61 = vmul.f32 %v4860_v4, %v9459_v41  ;;  %v4861_v47 = vmul.f32 %v4829_v8, %v9466_v21 }
 0x69e   : > { %v6922_v36 = vpop.eup %6921  ;;  %v4890_v49 = vmul.f32 %v4858_v14, %v9462_v34  ;;  %v4859_v17 = vmul.f32 %v4827_v1, %v9470_v51  ;;  %v5016_v45 = vadd.f32 1.0, %v6920_v20 }
 0x69f   : > { %v6924_v62 = vpop.eup %6923  ;;  %v4893_v6 = vmul.f32 %v4861_v47, %v9466_v21  ;;  %v5014_v46 = vadd.f32 1.0, %v6922_v36  ;;  %v4924_v19 = vadd.f32 %v4892_v61, %v9459_v41  ;;  %v4795_v41 = vmul.f32 0.5, %v9470_v51 }
 0x6a0   : > { %v6926_v59 = vpop.eup %6925  ;;  %v4891_v7 = vmul.f32 %v4859_v17, %v9470_v51  ;;  %v5017_v50 = vadd.f32 1.0, %v6924_v62  ;;  %v4922_v40 = vadd.f32 %v4890_v49, %v9462_v34  ;;  %v5048_v37 = vmul.f32 %v5016_v45, %v4792_v56 }
 0x6a1   : > { %v5015_v43 = vadd.f32 1.0, %v6926_v59  ;;  %v4925_v54 = vadd.f32 %v4893_v6, %v9466_v21  ;;  %v4956_v38 = vmul.f32 0.7978846, %v4924_v19  ;;  %v5046_v44 = vmul.f32 %v5014_v46, %v4790_v31 }
 0x6a2   : > { %v5049_v28 = vmul.f32 %v5017_v50, %v4793_v63  ;;  %v4923_v0 = vadd.f32 %v4891_v7, %v9470_v51  ;;  %v4954_v42 = vmul.f32 0.7978846, %v4922_v40  ;;  %v4794_v63 = vmul.f32 0.5, %v9462_v34 }
 0x6a3   : > { %v5047_v22 = vmul.f32 %v5015_v43, %v4791_v16  ;;  %v4957_v58 = vmul.f32 0.7978846, %v4925_v54  ;;  %6927 = vtanh.f32 %v4956_v38  ;;  %v4797_v43 = vmul.f32 0.5, %v9466_v21 }
 0x6a4   : > { %v5070_v27 = vpack.c.bf16 %v5049_v28, %v5048_v37  ;;  %v4955_v9 = vmul.f32 0.7978846, %v4923_v0  ;;  %6929 = vtanh.f32 %v4954_v42 }
 0x6a5   : > { %v6130_v11 = vpop.f32.mrb[188].mxu1  ;;  %v5069_v30 = vpack.c.bf16 %v5047_v22, %v5046_v44  ;;  %6931 = vtanh.f32 %v4957_v58 }
 0x6a6   : > { %v4764_v25 = vadd.f32 %v6130_v11, %v9341_v3  ;;  %v4755_v18 = vpop.f32.mrb[189].mxu1  ;;  %6933 = vtanh.f32 %v4955_v9 }
 0x6a7   : > { %v9495_v4 = vadd.f32 %v4755_v18, %v9341_v3  ;;  %6022 = vmatprep.subr.bf16.mxu0 %v5069_v30  ;;  %v6131_v8 = vpop.f32.mrb[190].mxu1 }
 0x6a8   : > { %v4832_v14 = vmul.f32 0.044715, %v4764_v25  ;;  %v4767_v1 = vadd.f32 %v6131_v8, %v9341_v3  ;;  %6023 = vmatpush3.bf16.xpose.msra.mxu0 %v5061_v2  ;;  %v4758_v20 = vpop.f32.mrb[191].mxu1  ;;  %v4800_v8 = vmul.f32 0.5, %v4764_v25 }
 0x6a9   : > { %v4830_v61 = vmul.f32 0.044715, %v9495_v4  ;;  %v4759_v47 = vadd.f32 %v4758_v20, %v9341_v3  ;;  %6024 = vmatprep.subr.bf16.mxu0 %v5070_v27 }
 0x6aa   : > { %v4864_v36 = vmul.f32 %v4832_v14, %v4764_v25  ;;  %v4833_v49 = vmul.f32 0.044715, %v4767_v1  ;;  %v4801_v14 = vmul.f32 0.5, %v4767_v1 }
 0x6ab   : > { %v4862_v17 = vmul.f32 %v4830_v61, %v9495_v4  ;;  %v4831_v56 = vmul.f32 0.044715, %v4759_v47  ;;  %v4798_v61 = vmul.f32 0.5, %v9495_v4 }
 0x6ac   : > { %v4896_v45 = vmul.f32 %v4864_v36, %v4764_v25  ;;  %v4865_v62 = vmul.f32 %v4833_v49, %v4767_v1  ;;  %v4799_v36 = vmul.f32 0.5, %v4759_v47 }
 0x6ad   : > { %v6928_v6 = vpop.eup %6927  ;;  %v4894_v31 = vmul.f32 %v4862_v17, %v9495_v4  ;;  %v4863_v46 = vmul.f32 %v4831_v56, %v4759_v47 }
 0x6ae   : > { %v6930_v19 = vpop.eup %6929  ;;  %v4897_v29 = vmul.f32 %v4865_v62, %v4767_v1  ;;  %v5020_v2 = vadd.f32 1.0, %v6928_v6  ;;  %v4928_v59 = vadd.f32 %v4896_v45, %v4764_v25 }
 0x6af   : > { %v6932_v7 = vpop.eup %6931  ;;  %v4895_v3 = vmul.f32 %v4863_v46, %v4759_v47  ;;  %v5018_v50 = vadd.f32 1.0, %v6930_v19  ;;  %v4926_v40 = vadd.f32 %v4894_v31, %v9495_v4 }
 0x6b0   : > { %v6934_v16 = vpop.eup %6933  ;;  %6025 = vmatpush3.bf16.xpose.msra.mxu0 %v5062_v57  ;;  %v5021_v54 = vadd.f32 1.0, %v6932_v7  ;;  %v4929_v38 = vadd.f32 %v4897_v29, %v4767_v1  ;;  %v4960_v37 = vmul.f32 0.7978846, %v4928_v59  ;;  %v5052_v44 = vmul.f32 %v5020_v2, %v4796_v60 }
 0x6b1   : > { %v5019_v28 = vadd.f32 1.0, %v6934_v16  ;;  %v4927_v0 = vadd.f32 %v4895_v3, %v4759_v47  ;;  %v4958_v42 = vmul.f32 0.7978846, %v4926_v40  ;;  %v5050_v58 = vmul.f32 %v5018_v50, %v4794_v63 }
 0x6b2   : > { %v5053_v34 = vmul.f32 %v5021_v54, %v4797_v43  ;;  %v4961_v22 = vmul.f32 0.7978846, %v4929_v38  ;;  %6935 = vtanh.f32 %v4960_v37 }
 0x6b3   : > { %v5051_v27 = vmul.f32 %v5019_v28, %v4795_v41  ;;  %v4959_v9 = vmul.f32 0.7978846, %v4927_v0  ;;  %6937 = vtanh.f32 %v4958_v42 }
 0x6b4   : > { %v5072_v52 = vpack.c.bf16 %v5053_v34, %v5052_v44  ;;  %6939 = vtanh.f32 %v4961_v22 }
 0x6b5   : > { %v5071_v26 = vpack.c.bf16 %v5051_v27, %v5050_v58  ;;  %6941 = vtanh.f32 %v4959_v9 }
 0x6b7   : > { %6026 = vmatprep.subr.bf16.mxu0 %v5071_v26 }
 0x6b8   : > { %6027 = vmatpush3.bf16.xpose.msra.mxu0 %v5063_v12 }
 0x6b9   : > { %6028 = vmatprep.subr.bf16.mxu0 %v5072_v52  ;;  %v5119_v25 = vpop.permute.xlu0 %5118 }
 0x6bc   : > { %v6936_v57 = vpop.eup %6935 }
 0x6bd   : > { %v6938_v21 = vpop.eup %6937  ;;  %v5024_v51 = vadd.f32 1.0, %v6936_v57 }
 0x6be   : > { %v6940_v11 = vpop.eup %6939  ;;  %v5022_v30 = vadd.f32 1.0, %v6938_v21 }
 0x6bf   : > { %v6942_v18 = vpop.eup %6941  ;;  %v5025_v20 = vadd.f32 1.0, %v6940_v11  ;;  %v5056_v13 = vmul.f32 %v5024_v51, %v4800_v8 }
 0x6c0   : > { %6029 = vmatpush3.bf16.xpose.msra.mxu0 %v5064_v24  ;;  %v5023_v49 = vadd.f32 1.0, %v6942_v18  ;;  %v5054_v12 = vmul.f32 %v5022_v30, %v4798_v61  ;;  %v5128_v24 = vunpack.c.0.s8 %v5127_v15 }
 0x6c1   : > { %v5057_v55 = vmul.f32 %v5025_v20, %v4801_v14 }
 0x6c2   : > { %v5055_v17 = vmul.f32 %v5023_v49, %v4799_v36  ;;  %v5131_v5 = vsub.s32 %v5128_v24, %v8347_v10 }
 0x6c3   : > { %v5074_v56 = vpack.c.bf16 %v5057_v55, %v5056_v13 }
 0x6c4   : > { %v5073_v45 = vpack.c.bf16 %v5055_v17, %v5054_v12 }
 0x6c6   : > { %6030 = vmatprep.subr.bf16.mxu0 %v5073_v45 }
 0x6c8   : > { %6031 = vmatpush3.bf16.xpose.msra.mxu0 %v5065_v33 }
 0x6c9   : > { %6032 = vmatprep.subr.bf16.mxu0 %v5074_v56 }
 0x6d0   : > { %6033 = vmatpush3.bf16.xpose.msra.mxu0 %v5066_v23 }
 0x6d7   : > { %6035 = vmatmul.mubr.bf16.vlgmr.msra.gmra.mrb[192].mxu0 %v9382_v48 }
 0x7aa   : > { %v5109_v4 = vpop.f32.mrb[192].mxu0 }
 0x7ab   : > { %v5111_v1 = vpop.f32.mrb[193].mxu0  ;;  %v5121_v47 = vadd.f32 %v5119_v25, %v5109_v4 }
 0x7ac   : > { %v5113_v62 = vpop.f32.mrb[194].mxu0  ;;  %v5122_v53 = vadd.f32 %v5119_v25, %v5111_v1 }
 0x7ad   : > { %v5114_v33 = vpop.f32.mrb[195].mxu0 }
 0x7ae   : > { %v5125_v39 = vcombine.low %v5121_v47, %v5122_v53 }
 0x7b0   : > { %v5132_v48 = vrot.slane %v5125_v39, %v5131_v5 }
 0x7b2   : > { %v5139_v23 = vrot.slane %v5132_v48, %v5131_v5 }
 0x7b4   : > { %5145 = vst.msk [vmem:[%s354_s9] sm:$0x3] %vm5143_vm0, %v5139_v23 }
 0x7b5   : > { %7102 = shalt.err (!%p7099_p3)
}
 0x7b6   : > { %s7103_s20 = scalar_lea.hbm %s9534_s18, 32  ;;  %s7107_s29 = scalar_lea.hbm %s9584_s6, 64 }
 0x7b7   : > { %p7104_p9 = scmp.ne.s32.totalorder %s9534_s18, %s7103_s20  ;;  %p7108_p7 = scmp.lt.u32.totalorder %s9534_s18, %s9584_s6 }
 0x7b8   : > { %p7109_p12 = scmp.lt.u32.totalorder %s7107_s29, %s7103_s20  ;;  %p7111_p2 = scmp.lt.u32.totalorder %s7103_s20, %s9534_s18 }
 0x7b9   : > { %p7105_p13 = pnand %p7104_p9, %p7369_p5 }
 0x7ba   : > { %p7110_p1 = por %p7109_p12, %p7108_p7 }
 0x7bb   : > { %p7106_p11 = pneg %p7105_p13 }
 0x7bc   : > { %p7112_p4 = por %p7111_p2, %p7110_p1 }
 0x7be   : > { %p7113_p0 = pnand %p7112_p4, %p7106_p11 }
 0x7c0   : > { %7116 = shalt.err (!%p7113_p0)
}
 0x7c1   : > { %6148 = dma.vmem_to_hbm [thread:$0]  (%p7369_p5), %s9536_s0, 32, %s9534_s18, %s5147_s4  }
 0x7c2 PF: > { %s5173_s27 = sand.u32 1, %s7155_s21   ;;  %p9695_p8 = scmp.ne.s32.totalorder %s9614_s28, 0 }
 0x7c3   : > { %p9696_p6 = scmp.ge.s32.totalorder %s7167_s24, 2  ;;  %s5174_s7 = scalar_lea.sflag [#allocation4], %s5173_s27 }
 0x7c5   : > { %p6168_p10 = pnand %p9696_p6, %p9695_p8 }
 0x7c7   : > { %7150 = dma.done.wait (!%p6168_p10), %s5174_s7, 32  }
 0x7c8   : > { %7152 = vsyncadd (!%p6168_p10), %s5174_s7, 4294967264  ;;  %p23_p3 = scmp.ge.s32.totalorder %s7334_s14, 4   ;;  %s9697_s21 = smov %s7159_s22 }
 0x7c9   : > { %s9698_s22 = smov %s7163_s23  ;;  %s9699_s23 = smov %s7365_s11 }
 0x7ca   : > { %s9700_s24 = smov %s7334_s14  ;;  %25 = sbr.rel (!%p23_p3) target bundleno = 13 (0xd), region = 115 }
 0x7d1   :  { %5179 = vsyncpa [#allocation3], 1 }
 0x7d2   :  { %5181 = vsyncpa [#allocation3 + $0x1], 1 }
 0x7d3   :  { %5182 = vsyncpa [#allocation6], 1 }
 0x7d4   :  { %5184 = vsyncpa [#allocation6 + $0x1], 1 }
 0x7d5   :  { %5185 = vsyncpa [#allocation9], 1 }
 0x7d6   :  { %5186 = vsyncpa [#allocation4], 1 }
 0x7d7   :  { %5188 = vsyncpa [#allocation4 + $0x1], 1 }

</bundles_post_ra>
